<compile_context>
chip_gen: v7x
topology: tpu7x:2x2x1
jax: 0.10.0
libtpu: 0.0.40
codegen_flags: <defaults>
</compile_context>

<pallas_src>
import functools

import jax
import jax.numpy as jnp
from jax.experimental import pallas as pl
from jax.experimental.pallas import tpu as pltpu


NUM_CH_DEC = (16, 32, 64, 128, 256)          # hard-coded in the PyTorch module


# ----------------------------------------------------------------------------
# In-kernel helpers.  All ops stay in classes with robust Mosaic lowerings:
# static slices, concats along major/sublane/lane axes, reshapes that keep the
# lane (last) dim, broadcasts, VPU elementwise math, MXU dots, lane reductions.
# ----------------------------------------------------------------------------
def _reflect_pad_hw(x):
    """(H, W, C) -> (H+2, W+2, C), PyTorch ReflectionPad2d(1).  Needs H, W >= 2."""
    H, W = x.shape[0], x.shape[1]
    x = jnp.concatenate([x[1:2], x, x[H - 2:H - 1]], axis=0)          # rows
    x = jnp.concatenate([x[:, 1:2], x, x[:, W - 2:W - 1]], axis=1)    # cols
    return x


def _upsample2x(x):
    """Nearest 2x upsample (h, w, C) -> (2h, 2w, C), entirely in VMEM.
    Built only from sublane-axis concats and lane-preserving reshapes."""
    h, w, C = x.shape
    rows = jnp.concatenate([x, x], axis=1).reshape(2 * h, w, C)       # dup rows
    rf = rows.reshape(2 * h * w, C)
    cols = jnp.concatenate([rf[:, None, :], rf[:, None, :]], axis=1)  # dup cols
    return cols.reshape(4 * h * w, C).reshape(2 * h, 2 * w, C)


def _elu(x):
    # nn.ELU(alpha=1).  min() keeps exp() finite on the (discarded) branch.
    return jnp.where(x > 0.0, x, jnp.exp(jnp.minimum(x, 0.0)) - 1.0)


def _conv3x3(x, w, *, split_dx):
    """Reflect-pad 3x3 conv.  x: (H, W, C); w: (9*C, Cout) with rows in
    dx-major tap order (row = (dx*3+dy)*C + c).  Returns (H*W, Cout) f32.

    split_dx=True  (narrow-C layers): 3 accumulated MXU matmuls of K=3C, one
        per column tap, so only three W-shifted slices / narrow lane concats
        are materialised (im2col plumbing, not the MXU, binds these layers).
    split_dx=False (deep layers, C >= 128): a single big-K matmul.
    """
    H, W, C = x.shape
    xp = _reflect_pad_hw(x)
    if split_dx:
        acc = None
        for dx in range(3):
            xs = xp[:, dx:dx + W, :]                                  # (H+2, W, C)
            patch = jnp.concatenate(
                [xs[dy:dy + H].reshape(H * W, C) for dy in range(3)], axis=-1)
            part = jnp.dot(patch, w[dx * 3 * C:(dx + 1) * 3 * C, :],
                           preferred_element_type=jnp.float32)
            acc = part if acc is None else acc + part
        return acc
    patch = jnp.concatenate(
        [xp[dy:dy + H, dx:dx + W, :].reshape(H * W, C)
         for dx in range(3) for dy in range(3)], axis=-1)             # (H*W, 9C)
    return jnp.dot(patch, w, preferred_element_type=jnp.float32)


# ----------------------------------------------------------------------------
# Fused decoder-stage kernel:
#   upconv0 (3x3 conv + ELU) -> nearest 2x upsample (VMEM) ->
#   upconv1 (3x3 conv + ELU, skip via split-weight accumulation)
#   [-> disparity head: 9 VPU FMAs + lane reduce, exact sigmoid]
# ----------------------------------------------------------------------------
def _stage_kernel(*refs, h, w, has_skip, has_disp, alpha, beta):
    it = iter(refs)
    x_ref = next(it)
    skip_ref = next(it) if has_skip else None
    w0_ref, b0_ref = next(it), next(it)
    w1x_ref = next(it)
    w1s_ref = next(it) if has_skip else None
    b1_ref = next(it)
    wd_ref, bd_ref = (next(it), next(it)) if has_disp else (None, None)
    out_ref = next(it)
    disp_ref = next(it) if has_disp else None

    cin = x_ref.shape[-1]
    cmid = w0_ref.shape[-1]
    cout = w1x_ref.shape[-1]
    H, W = 2 * h, 2 * w

    # ---- upconv0: reflect-pad 3x3 conv + ELU at (h, w) ----
    acc0 = _conv3x3(x_ref[0], w0_ref[...], split_dx=cin < 128)
    y0 = _elu(acc0 + b0_ref[...])                           # (h*w, cmid) f32
    y0 = y0.astype(jnp.bfloat16).reshape(h, w, cmid)

    # ---- nearest 2x upsample, fused: never leaves VMEM ----
    u = _upsample2x(y0)                                     # (H, W, cmid) bf16

    # ---- upconv1: skip fused via split weights (no channel concat) ----
    acc1 = _conv3x3(u, w1x_ref[...], split_dx=cmid < 128)
    if has_skip:
        cskip = skip_ref.shape[-1]
        acc1 = acc1 + _conv3x3(skip_ref[0], w1s_ref[...], split_dx=cskip < 128)
    y1 = _elu(acc1 + b1_ref[...])                           # (H*W, cout) f32
    out_ref[0] = y1.astype(out_ref.dtype).reshape(H, W, cout)

    # ---- disparity head: alpha * sigmoid(conv3x3(y1)) + beta ----
    # Cout=1 would use 1/128..1/256 of the MXU output columns, so it runs as
    # 9 VPU multiply-adds on the already-available f32 activation plus one
    # lane reduce -- no second im2col, no extra pallas_call, no HBM re-read.
    if has_disp:
        yp = _reflect_pad_hw(y1.reshape(H, W, cout))        # f32, reuses y1
        wd = wd_ref[...]                                    # (9, cout) f32
        dacc = None
        for dy in range(3):
            for dx in range(3):
                term = yp[dy:dy + H, dx:dx + W, :] * wd[dy * 3 + dx]
                dacc = term if dacc is None else dacc + term
        d = jnp.sum(dacc, axis=-1) + bd_ref[...]            # (H, W) f32
        sig = 1.0 / (1.0 + jnp.exp(-d))                     # exact sigmoid
        disp_ref[0] = alpha * sig + beta                    # lane-dense (H, W)


def decoder_stage(x, w0, b0, w1x, w1s, b1, *, skip=None,
                  disp_w=None, disp_b=None, alpha=80.0, beta=0.5):
    """One fused decoder stage (a single pallas_call, gridded over batch).

    x     : (N, h, w, Cin)       bf16
    skip  : (N, 2h, 2w, Cskip)   bf16 or None
    w0    : (9*Cin,  Cmid) bf16     b0: (1, Cmid) f32
    w1x   : (9*Cmid, Cout) bf16     b1: (1, Cout) f32
    w1s   : (9*Cskip, Cout) bf16 or None
    disp_w: (9, Cout) f32           disp_b: (1, 1) f32
    returns (N, 2h, 2w, Cout) bf16 [, (N, 2h, 2w) f32 disparity]
    """
    N, h, w_, cin = x.shape
    cmid, cout = w0.shape[-1], w1x.shape[-1]
    H, W = 2 * h, 2 * w_
    has_skip = skip is not None
    has_disp = disp_w is not None
    assert w0.shape[0] == 9 * cin and w1x.shape[0] == 9 * cmid
    if has_skip:
        assert skip.shape[:3] == (N, H, W)
        assert w1s is not None and w1s.shape[0] == 9 * skip.shape[-1]

    kernel = functools.partial(_stage_kernel, h=h, w=w_, has_skip=has_skip,
                               has_disp=has_disp, alpha=float(alpha),
                               beta=float(beta))

    def _const(a):
        # TODO(synk): at production sizes single-buffer these constant blocks
        # (pipeline_mode=pl.Buffered(1)) or DMA them once into scratch; the
        # default double-buffering wastes VMEM better spent on spatial bands.
        return pl.BlockSpec(a.shape, lambda n: (0, 0))

    inputs = [x]
    in_specs = [pl.BlockSpec((1, h, w_, cin), lambda n: (n, 0, 0, 0))]
    if has_skip:
        cskip = skip.shape[-1]
        inputs.append(skip)
        in_specs.append(pl.BlockSpec((1, H, W, cskip), lambda n: (n, 0, 0, 0)))
    inputs += [w0, b0, w1x]
    in_specs += [_const(w0), _const(b0), _const(w1x)]
    if has_skip:
        inputs.append(w1s)
        in_specs.append(_const(w1s))
    inputs.append(b1)
    in_specs.append(_const(b1))
    if has_disp:
        inputs += [disp_w, disp_b]
        in_specs += [_const(disp_w), _const(disp_b)]

    out_shape = [jax.ShapeDtypeStruct((N, H, W, cout), jnp.bfloat16)]
    out_specs = [pl.BlockSpec((1, H, W, cout), lambda n: (n, 0, 0, 0))]
    if has_disp:
        # Lane-dense disparity output: last dim is W (not 1) -> unmasked vst.
        out_shape.append(jax.ShapeDtypeStruct((N, H, W), jnp.float32))
        out_specs.append(pl.BlockSpec((1, H, W), lambda n: (n, 0, 0)))

    # TODO(synk): at production resolutions (e.g. 192x640) add row-band
    # spatial tiling: grid=(N, H//TH), a (TH+2)-row halo fetch for skip and a
    # (TH//2+3)-row halo for x (element-offset index_map or pl.ANY + manual
    # make_async_copy), per-generation TH so the im2col temps fit scoped VMEM
    # (smaller TH on v7x's 64 MiB), band axis marked "parallel" for v7x's two
    # TensorCores, and pltpu.CompilerParams(vmem_limit_bytes=...).  Whole-
    # image blocks are fine at the demo shapes used here.
    # TODO(synk): lane-dense (N, H, W*C) activation layout for the C<128
    # stages would further remove masked partial stores at production sizes.
    return pl.pallas_call(
        kernel,
        out_shape=tuple(out_shape) if has_disp else out_shape[0],
        grid=(N,),
        in_specs=in_specs,
        out_specs=tuple(out_specs) if has_disp else out_specs[0],
        compiler_params=pltpu.CompilerParams(
            dimension_semantics=("parallel",)),
    )(*inputs)


# ----------------------------------------------------------------------------
# Parameters & decoder orchestration (plain JAX glue)
# ----------------------------------------------------------------------------
def _to_matmul_layout(w_hwio):
    """HWIO (3,3,Cin,Cout) -> (9*Cin, Cout) with dx-major rows.
    (A PyTorch OIHW weight maps to HWIO via w.transpose(2, 3, 1, 0).)"""
    return jnp.transpose(w_hwio, (1, 0, 2, 3)).reshape(-1, w_hwio.shape[-1])


def init_conv3x3_params(key, cin, cout, dtype=jnp.bfloat16):
    """He-scaled random 3x3 conv params: HWIO weight + (cout,) f32 bias."""
    kw, kb = jax.random.split(key)
    w = jax.random.normal(kw, (3, 3, cin, cout), jnp.float32) * (9 * cin) ** -0.5
    b = jax.random.normal(kb, (cout,), jnp.float32) * 0.1
    return w.astype(dtype), b


def build_decoder_params(key, num_ch_enc, scales=(0, 1, 2, 3), use_skips=True):
    num_ch_dec = NUM_CH_DEC
    params = {"upconvs0": [], "upconvs1": [], "dispconvs": [],
              "alpha": 80.0, "beta": 0.5}     # nn.Parameter initial values
    keys = jax.random.split(key, 10 + len(scales))
    k = 0
    for i in range(4, -1, -1):
        cin = num_ch_enc[-1] if i == 4 else num_ch_dec[i + 1]
        cmid = num_ch_dec[i]
        params["upconvs0"].append(init_conv3x3_params(keys[k], cin, cmid)); k += 1
        cin1 = cmid + (num_ch_enc[i - 1] if (use_skips and i > 0) else 0)
        params["upconvs1"].append(init_conv3x3_params(keys[k], cin1, cmid)); k += 1
    for s in scales:
        # Disparity heads stay f32: they run on the VPU, not the MXU.
        params["dispconvs"].append(
            init_conv3x3_params(keys[k], num_ch_dec[s], 1, dtype=jnp.float32))
        k += 1
    return params


def decoder_forward(params, input_features, scales=(0, 1, 2, 3), use_skips=True):
    """input_features: list of 5 NHWC arrays at resolutions h/2 ... h/32.
    Returns the module's outputs[0]: the disparity map at scale min(scales),
    shape (N, H, W, 1) NHWC (full image resolution for the default scales)."""
    scales = tuple(scales)
    i_ret = min(scales)                    # the scale whose disp is returned
    disp_idx = scales.index(i_ret)         # == i_to_scaleIdx_conversion[i_ret]
    alpha, beta = params["alpha"], params["beta"]

    feats = [f.astype(jnp.bfloat16) for f in input_features]
    x = feats[-1]
    disp = None
    for cnt, i in enumerate(range(4, -1, -1)):
        w0h, b0 = params["upconvs0"][cnt]
        w1h, b1 = params["upconvs1"][cnt]
        cmid = w0h.shape[-1]
        skip = feats[i - 1] if (use_skips and i > 0) else None
        # Split the upconv1 weight along its input channels: the first cmid
        # rows act on the upsampled x, the rest on the skip features
        # (split-weight accumulation replaces the channel concat in-kernel).
        w1x = _to_matmul_layout(w1h[:, :, :cmid, :])
        w1s = _to_matmul_layout(w1h[:, :, cmid:, :]) if skip is not None else None
        head = {}
        if i == i_ret:
            wd, bd = params["dispconvs"][disp_idx]
            head = dict(disp_w=wd[:, :, :, 0].reshape(9, -1),
                        disp_b=bd.reshape(1, 1), alpha=alpha, beta=beta)
        res = decoder_stage(x, _to_matmul_layout(w0h), b0.reshape(1, -1),
                            w1x, w1s, b1.reshape(1, -1), skip=skip, **head)
        if i == i_ret:
            x, disp = res
        else:
            x = res
        # Disparity heads at other scales do not contribute to the returned
        # outputs[0], so they are not computed.
    return disp[..., None].astype(jnp.float32)


# ----------------------------------------------------------------------------
# Pure-JAX f32 reference mirroring the kernel's bf16 rounding points
# ----------------------------------------------------------------------------
def _ref_conv3x3(x, w_hwio, b):
    xp = jnp.pad(x, ((0, 0), (1, 1), (1, 1), (0, 0)), mode="reflect")
    y = jax.lax.conv_general_dilated(
        xp, w_hwio.astype(jnp.float32), (1, 1), "VALID",
        dimension_numbers=("NHWC", "HWIO", "NHWC"),
        precision=jax.lax.Precision.HIGHEST)
    return y + b.astype(jnp.float32)


def _ref_upsample2x(x):
    return jnp.repeat(jnp.repeat(x, 2, axis=1), 2, axis=2)


def decoder_forward_ref(params, input_features, scales=(0, 1, 2, 3),
                        use_skips=True):
    scales = tuple(scales)
    i_ret = min(scales)
    disp_idx = scales.index(i_ret)
    alpha, beta = params["alpha"], params["beta"]
    feats = [f.astype(jnp.bfloat16).astype(jnp.float32) for f in input_features]
    x = feats[-1]
    disp = None
    for cnt, i in enumerate(range(4, -1, -1)):
        w0h, b0 = params["upconvs0"][cnt]
        w1h, b1 = params["upconvs1"][cnt]
        y0 = _elu(_ref_conv3x3(x, w0h, b0))
        u = _ref_upsample2x(y0.astype(jnp.bfloat16).astype(jnp.float32))
        if use_skips and i > 0:
            u = jnp.concatenate([u, feats[i - 1]], axis=-1)
        y1 = _elu(_ref_conv3x3(u, w1h, b1))
        if i == i_ret:
            wd, bd = params["dispconvs"][disp_idx]
            d = _ref_conv3x3(y1, wd, bd)
            disp = alpha * (1.0 / (1.0 + jnp.exp(-d))) + beta
        x = y1.astype(jnp.bfloat16).astype(jnp.float32)
    return disp


# ----------------------------------------------------------------------------
# Demo
# ----------------------------------------------------------------------------
if __name__ == "__main__":
    key = jax.random.PRNGKey(0)
    kp, kf = jax.random.split(key)

    # Small synthetic encoder (a real resnet18 would be [64, 64, 128, 256, 512]).
    num_ch_enc = [16, 16, 32, 32, 64]
    params = build_decoder_params(kp, num_ch_enc)

    N = 2
    base = 32                      # feature[0] spatial size = full res / 2
    fkeys = jax.random.split(kf, 5)
    input_features = [
        jax.random.normal(fkeys[lvl],
                          (N, base // (2 ** lvl), base // (2 ** lvl),
                           num_ch_enc[lvl]), jnp.float32)
        for lvl in range(5)
    ]

    out = decoder_forward(params, input_features)
    out = jax.block_until_ready(out)
    assert out.shape == (N, 2 * base, 2 * base, 1), out.shape
    assert out.dtype == jnp.float32
    assert bool(jnp.all(jnp.isfinite(out)))

    ref = decoder_forward_ref(params, input_features)
    max_err = float(jnp.max(jnp.abs(out - ref)))
    assert max_err < 1e-1, max_err

    print("KERNEL_OK")
</pallas_src>

<mosaic_0001>
module attributes {stable_mosaic.version = 11 : i64} {
  func.func @_stage_kernel(%arg0: i32, %arg1: memref<1x2x2x64xbf16, #tpu.memory_space<vmem>>, %arg2: memref<1x4x4x32xbf16, #tpu.memory_space<vmem>>, %arg3: memref<576x256xbf16, #tpu.memory_space<vmem>>, %arg4: memref<1x256xf32, #tpu.memory_space<vmem>>, %arg5: memref<2304x256xbf16, #tpu.memory_space<vmem>>, %arg6: memref<288x256xbf16, #tpu.memory_space<vmem>>, %arg7: memref<1x256xf32, #tpu.memory_space<vmem>>, %arg8: memref<1x4x4x256xbf16, #tpu.memory_space<vmem>>) attributes {dimension_semantics = [#tpu.dimension_semantics<parallel>], iteration_bounds = array<i64: 2>, scalar_prefetch = 0 : i64, scratch_operands = 0 : i64, tpu.core_type = #tpu.core_type<tc>, window_params = [{transform_indices = @transform_0, window_bounds = array<i64: 1, 2, 2, 64>}, {transform_indices = @transform_1, window_bounds = array<i64: 1, 4, 4, 32>}, {pipeline_mode = #tpu.pipeline_mode<synchronous>, transform_indices = @transform_2, window_bounds = array<i64: 576, 256>}, {pipeline_mode = #tpu.pipeline_mode<synchronous>, transform_indices = @transform_3, window_bounds = array<i64: 1, 256>}, {pipeline_mode = #tpu.pipeline_mode<synchronous>, transform_indices = @transform_4, window_bounds = array<i64: 2304, 256>}, {pipeline_mode = #tpu.pipeline_mode<synchronous>, transform_indices = @transform_5, window_bounds = array<i64: 288, 256>}, {pipeline_mode = #tpu.pipeline_mode<synchronous>, transform_indices = @transform_6, window_bounds = array<i64: 1, 256>}, {transform_indices = @transform_7, window_bounds = array<i64: 1, 4, 4, 256>}]} {
    %c0 = arith.constant 0 : index
    %c0_0 = arith.constant 0 : index
    %c0_1 = arith.constant 0 : index
    %c0_2 = arith.constant 0 : index
    %0 = vector.load %arg1[%c0, %c0_0, %c0_1, %c0_2] : memref<1x2x2x64xbf16, #tpu.memory_space<vmem>>, vector<1x2x2x64xbf16>
    %1 = vector.shape_cast %0 : vector<1x2x2x64xbf16> to vector<2x2x64xbf16>
    %c0_3 = arith.constant 0 : index
    %c0_4 = arith.constant 0 : index
    %2 = vector.load %arg3[%c0_3, %c0_4] : memref<576x256xbf16, #tpu.memory_space<vmem>>, vector<576x256xbf16>
    %3 = vector.extract_strided_slice %1 {offsets = [1, 0, 0], sizes = [1, 2, 64], strides = [1, 1, 1]} : vector<2x2x64xbf16> to vector<1x2x64xbf16>
    %4 = vector.extract_strided_slice %1 {offsets = [0, 0, 0], sizes = [1, 2, 64], strides = [1, 1, 1]} : vector<2x2x64xbf16> to vector<1x2x64xbf16>
    %5 = tpu.concatenate %3, %1, %4 in 0 : vector<1x2x64xbf16>, vector<2x2x64xbf16>, vector<1x2x64xbf16> -> vector<4x2x64xbf16>
    %6 = vector.extract_strided_slice %5 {offsets = [0, 1, 0], sizes = [4, 1, 64], strides = [1, 1, 1]} : vector<4x2x64xbf16> to vector<4x1x64xbf16>
    %7 = vector.extract_strided_slice %5 {offsets = [0, 0, 0], sizes = [4, 1, 64], strides = [1, 1, 1]} : vector<4x2x64xbf16> to vector<4x1x64xbf16>
    %8 = tpu.concatenate %6, %5, %7 in 1 : vector<4x1x64xbf16>, vector<4x2x64xbf16>, vector<4x1x64xbf16> -> vector<4x4x64xbf16>
    %9 = vector.extract_strided_slice %8 {offsets = [0, 0, 0], sizes = [4, 2, 64], strides = [1, 1, 1]} : vector<4x4x64xbf16> to vector<4x2x64xbf16>
    %10 = vector.extract_strided_slice %9 {offsets = [0, 0, 0], sizes = [2, 2, 64], strides = [1, 1, 1]} : vector<4x2x64xbf16> to vector<2x2x64xbf16>
    %11 = vector.shape_cast %10 : vector<2x2x64xbf16> to vector<4x64xbf16>
    %12 = vector.extract_strided_slice %9 {offsets = [1, 0, 0], sizes = [2, 2, 64], strides = [1, 1, 1]} : vector<4x2x64xbf16> to vector<2x2x64xbf16>
    %13 = vector.shape_cast %12 : vector<2x2x64xbf16> to vector<4x64xbf16>
    %14 = vector.extract_strided_slice %9 {offsets = [2, 0, 0], sizes = [2, 2, 64], strides = [1, 1, 1]} : vector<4x2x64xbf16> to vector<2x2x64xbf16>
    %15 = vector.shape_cast %14 : vector<2x2x64xbf16> to vector<4x64xbf16>
    %16 = tpu.concatenate %11, %13, %15 in 1 : vector<4x64xbf16>, vector<4x64xbf16>, vector<4x64xbf16> -> vector<4x192xbf16>
    %17 = vector.extract_strided_slice %2 {offsets = [0, 0], sizes = [192, 256], strides = [1, 1]} : vector<576x256xbf16> to vector<192x256xbf16>
    %cst = arith.constant dense<0.000000e+00> : vector<4x256xf32>
    %18 = tpu.matmul %16, %17, %cst {dimension_numbers = #tpu.dot_dimension_numbers<[1], [0], [0], [1], [0, 0, 1, 1], [], []>} : vector<4x192xbf16>, vector<192x256xbf16>, vector<4x256xf32> -> vector<4x256xf32>
    %19 = vector.extract_strided_slice %8 {offsets = [0, 1, 0], sizes = [4, 2, 64], strides = [1, 1, 1]} : vector<4x4x64xbf16> to vector<4x2x64xbf16>
    %20 = vector.extract_strided_slice %19 {offsets = [0, 0, 0], sizes = [2, 2, 64], strides = [1, 1, 1]} : vector<4x2x64xbf16> to vector<2x2x64xbf16>
    %21 = vector.shape_cast %20 : vector<2x2x64xbf16> to vector<4x64xbf16>
    %22 = vector.extract_strided_slice %19 {offsets = [1, 0, 0], sizes = [2, 2, 64], strides = [1, 1, 1]} : vector<4x2x64xbf16> to vector<2x2x64xbf16>
    %23 = vector.shape_cast %22 : vector<2x2x64xbf16> to vector<4x64xbf16>
    %24 = vector.extract_strided_slice %19 {offsets = [2, 0, 0], sizes = [2, 2, 64], strides = [1, 1, 1]} : vector<4x2x64xbf16> to vector<2x2x64xbf16>
    %25 = vector.shape_cast %24 : vector<2x2x64xbf16> to vector<4x64xbf16>
    %26 = tpu.concatenate %21, %23, %25 in 1 : vector<4x64xbf16>, vector<4x64xbf16>, vector<4x64xbf16> -> vector<4x192xbf16>
    %27 = vector.extract_strided_slice %2 {offsets = [192, 0], sizes = [192, 256], strides = [1, 1]} : vector<576x256xbf16> to vector<192x256xbf16>
    %cst_5 = arith.constant dense<0.000000e+00> : vector<4x256xf32>
    %28 = tpu.matmul %26, %27, %cst_5 {dimension_numbers = #tpu.dot_dimension_numbers<[1], [0], [0], [1], [0, 0, 1, 1], [], []>} : vector<4x192xbf16>, vector<192x256xbf16>, vector<4x256xf32> -> vector<4x256xf32>
    %29 = arith.addf %18, %28 : vector<4x256xf32>
    %30 = vector.extract_strided_slice %8 {offsets = [0, 2, 0], sizes = [4, 2, 64], strides = [1, 1, 1]} : vector<4x4x64xbf16> to vector<4x2x64xbf16>
    %31 = vector.extract_strided_slice %30 {offsets = [0, 0, 0], sizes = [2, 2, 64], strides = [1, 1, 1]} : vector<4x2x64xbf16> to vector<2x2x64xbf16>
    %32 = vector.shape_cast %31 : vector<2x2x64xbf16> to vector<4x64xbf16>
    %33 = vector.extract_strided_slice %30 {offsets = [1, 0, 0], sizes = [2, 2, 64], strides = [1, 1, 1]} : vector<4x2x64xbf16> to vector<2x2x64xbf16>
    %34 = vector.shape_cast %33 : vector<2x2x64xbf16> to vector<4x64xbf16>
    %35 = vector.extract_strided_slice %30 {offsets = [2, 0, 0], sizes = [2, 2, 64], strides = [1, 1, 1]} : vector<4x2x64xbf16> to vector<2x2x64xbf16>
    %36 = vector.shape_cast %35 : vector<2x2x64xbf16> to vector<4x64xbf16>
    %37 = tpu.concatenate %32, %34, %36 in 1 : vector<4x64xbf16>, vector<4x64xbf16>, vector<4x64xbf16> -> vector<4x192xbf16>
    %38 = vector.extract_strided_slice %2 {offsets = [384, 0], sizes = [192, 256], strides = [1, 1]} : vector<576x256xbf16> to vector<192x256xbf16>
    %cst_6 = arith.constant dense<0.000000e+00> : vector<4x256xf32>
    %39 = tpu.matmul %37, %38, %cst_6 {dimension_numbers = #tpu.dot_dimension_numbers<[1], [0], [0], [1], [0, 0, 1, 1], [], []>} : vector<4x192xbf16>, vector<192x256xbf16>, vector<4x256xf32> -> vector<4x256xf32>
    %40 = arith.addf %29, %39 : vector<4x256xf32>
    %c0_7 = arith.constant 0 : index
    %c0_8 = arith.constant 0 : index
    %41 = vector.load %arg4[%c0_7, %c0_8] : memref<1x256xf32, #tpu.memory_space<vmem>>, vector<1x256xf32>
    %42 = vector.broadcast %41 : vector<1x256xf32> to vector<4x256xf32>
    %43 = arith.addf %40, %42 : vector<4x256xf32>
    %cst_9 = arith.constant 0.000000e+00 : f32
    %44 = vector.broadcast %cst_9 : f32 to vector<4x256xf32>
    %45 = arith.cmpf ogt, %43, %44 : vector<4x256xf32>
    %cst_10 = arith.constant 0.000000e+00 : f32
    %46 = vector.broadcast %cst_10 : f32 to vector<4x256xf32>
    %47 = arith.minimumf %43, %46 : vector<4x256xf32>
    %48 = math.exp %47 : vector<4x256xf32>
    %cst_11 = arith.constant 1.000000e+00 : f32
    %49 = vector.broadcast %cst_11 : f32 to vector<4x256xf32>
    %50 = arith.subf %48, %49 : vector<4x256xf32>
    %51 = arith.select %45, %43, %50 : vector<4x256xi1>, vector<4x256xf32>
    %52 = arith.truncf %51 : vector<4x256xf32> to vector<4x256xbf16>
    %53 = vector.shape_cast %52 : vector<4x256xbf16> to vector<2x2x256xbf16>
    %54 = tpu.concatenate %53, %53 in 1 : vector<2x2x256xbf16>, vector<2x2x256xbf16> -> vector<2x4x256xbf16>
    %55 = vector.shape_cast %54 : vector<2x4x256xbf16> to vector<4x2x256xbf16>
    %56 = vector.shape_cast %55 : vector<4x2x256xbf16> to vector<8x256xbf16>
    %57 = vector.shape_cast %56 : vector<8x256xbf16> to vector<8x1x256xbf16>
    %58 = vector.shape_cast %56 : vector<8x256xbf16> to vector<8x1x256xbf16>
    %59 = tpu.concatenate %57, %58 in 1 : vector<8x1x256xbf16>, vector<8x1x256xbf16> -> vector<8x2x256xbf16>
    %60 = vector.shape_cast %59 : vector<8x2x256xbf16> to vector<16x256xbf16>
    %61 = vector.shape_cast %60 : vector<16x256xbf16> to vector<4x4x256xbf16>
    %c0_12 = arith.constant 0 : index
    %c0_13 = arith.constant 0 : index
    %62 = vector.load %arg5[%c0_12, %c0_13] : memref<2304x256xbf16, #tpu.memory_space<vmem>>, vector<2304x256xbf16>
    %63 = vector.extract_strided_slice %61 {offsets = [1, 0, 0], sizes = [1, 4, 256], strides = [1, 1, 1]} : vector<4x4x256xbf16> to vector<1x4x256xbf16>
    %64 = vector.extract_strided_slice %61 {offsets = [2, 0, 0], sizes = [1, 4, 256], strides = [1, 1, 1]} : vector<4x4x256xbf16> to vector<1x4x256xbf16>
    %65 = tpu.concatenate %63, %61, %64 in 0 : vector<1x4x256xbf16>, vector<4x4x256xbf16>, vector<1x4x256xbf16> -> vector<6x4x256xbf16>
    %66 = vector.extract_strided_slice %65 {offsets = [0, 1, 0], sizes = [6, 1, 256], strides = [1, 1, 1]} : vector<6x4x256xbf16> to vector<6x1x256xbf16>
    %67 = vector.extract_strided_slice %65 {offsets = [0, 2, 0], sizes = [6, 1, 256], strides = [1, 1, 1]} : vector<6x4x256xbf16> to vector<6x1x256xbf16>
    %68 = tpu.concatenate %66, %65, %67 in 1 : vector<6x1x256xbf16>, vector<6x4x256xbf16>, vector<6x1x256xbf16> -> vector<6x6x256xbf16>
    %69 = vector.extract_strided_slice %68 {offsets = [0, 0, 0], sizes = [4, 4, 256], strides = [1, 1, 1]} : vector<6x6x256xbf16> to vector<4x4x256xbf16>
    %70 = vector.shape_cast %69 : vector<4x4x256xbf16> to vector<16x256xbf16>
    %71 = vector.extract_strided_slice %68 {offsets = [1, 0, 0], sizes = [4, 4, 256], strides = [1, 1, 1]} : vector<6x6x256xbf16> to vector<4x4x256xbf16>
    %72 = vector.shape_cast %71 : vector<4x4x256xbf16> to vector<16x256xbf16>
    %73 = vector.extract_strided_slice %68 {offsets = [2, 0, 0], sizes = [4, 4, 256], strides = [1, 1, 1]} : vector<6x6x256xbf16> to vector<4x4x256xbf16>
    %74 = vector.shape_cast %73 : vector<4x4x256xbf16> to vector<16x256xbf16>
    %75 = vector.extract_strided_slice %68 {offsets = [0, 1, 0], sizes = [4, 4, 256], strides = [1, 1, 1]} : vector<6x6x256xbf16> to vector<4x4x256xbf16>
    %76 = vector.shape_cast %75 : vector<4x4x256xbf16> to vector<16x256xbf16>
    %77 = vector.extract_strided_slice %68 {offsets = [1, 1, 0], sizes = [4, 4, 256], strides = [1, 1, 1]} : vector<6x6x256xbf16> to vector<4x4x256xbf16>
    %78 = vector.shape_cast %77 : vector<4x4x256xbf16> to vector<16x256xbf16>
    %79 = vector.extract_strided_slice %68 {offsets = [2, 1, 0], sizes = [4, 4, 256], strides = [1, 1, 1]} : vector<6x6x256xbf16> to vector<4x4x256xbf16>
    %80 = vector.shape_cast %79 : vector<4x4x256xbf16> to vector<16x256xbf16>
    %81 = vector.extract_strided_slice %68 {offsets = [0, 2, 0], sizes = [4, 4, 256], strides = [1, 1, 1]} : vector<6x6x256xbf16> to vector<4x4x256xbf16>
    %82 = vector.shape_cast %81 : vector<4x4x256xbf16> to vector<16x256xbf16>
    %83 = vector.extract_strided_slice %68 {offsets = [1, 2, 0], sizes = [4, 4, 256], strides = [1, 1, 1]} : vector<6x6x256xbf16> to vector<4x4x256xbf16>
    %84 = vector.shape_cast %83 : vector<4x4x256xbf16> to vector<16x256xbf16>
    %85 = vector.extract_strided_slice %68 {offsets = [2, 2, 0], sizes = [4, 4, 256], strides = [1, 1, 1]} : vector<6x6x256xbf16> to vector<4x4x256xbf16>
    %86 = vector.shape_cast %85 : vector<4x4x256xbf16> to vector<16x256xbf16>
    %87 = tpu.concatenate %70, %72, %74, %76, %78, %80, %82, %84, %86 in 1 : vector<16x256xbf16>, vector<16x256xbf16>, vector<16x256xbf16>, vector<16x256xbf16>, vector<16x256xbf16>, vector<16x256xbf16>, vector<16x256xbf16>, vector<16x256xbf16>, vector<16x256xbf16> -> vector<16x2304xbf16>
    %cst_14 = arith.constant dense<0.000000e+00> : vector<16x256xf32>
    %88 = tpu.matmul %87, %62, %cst_14 {dimension_numbers = #tpu.dot_dimension_numbers<[1], [0], [0], [1], [0, 0, 1, 1], [], []>} : vector<16x2304xbf16>, vector<2304x256xbf16>, vector<16x256xf32> -> vector<16x256xf32>
    %c0_15 = arith.constant 0 : index
    %c0_16 = arith.constant 0 : index
    %c0_17 = arith.constant 0 : index
    %c0_18 = arith.constant 0 : index
    %89 = vector.load %arg2[%c0_15, %c0_16, %c0_17, %c0_18] : memref<1x4x4x32xbf16, #tpu.memory_space<vmem>>, vector<1x4x4x32xbf16>
    %90 = vector.shape_cast %89 : vector<1x4x4x32xbf16> to vector<4x4x32xbf16>
    %c0_19 = arith.constant 0 : index
    %c0_20 = arith.constant 0 : index
    %91 = vector.load %arg6[%c0_19, %c0_20] : memref<288x256xbf16, #tpu.memory_space<vmem>>, vector<288x256xbf16>
    %92 = vector.extract_strided_slice %90 {offsets = [1, 0, 0], sizes = [1, 4, 32], strides = [1, 1, 1]} : vector<4x4x32xbf16> to vector<1x4x32xbf16>
    %93 = vector.extract_strided_slice %90 {offsets = [2, 0, 0], sizes = [1, 4, 32], strides = [1, 1, 1]} : vector<4x4x32xbf16> to vector<1x4x32xbf16>
    %94 = tpu.concatenate %92, %90, %93 in 0 : vector<1x4x32xbf16>, vector<4x4x32xbf16>, vector<1x4x32xbf16> -> vector<6x4x32xbf16>
    %95 = vector.extract_strided_slice %94 {offsets = [0, 1, 0], sizes = [6, 1, 32], strides = [1, 1, 1]} : vector<6x4x32xbf16> to vector<6x1x32xbf16>
    %96 = vector.extract_strided_slice %94 {offsets = [0, 2, 0], sizes = [6, 1, 32], strides = [1, 1, 1]} : vector<6x4x32xbf16> to vector<6x1x32xbf16>
    %97 = tpu.concatenate %95, %94, %96 in 1 : vector<6x1x32xbf16>, vector<6x4x32xbf16>, vector<6x1x32xbf16> -> vector<6x6x32xbf16>
    %98 = vector.extract_strided_slice %97 {offsets = [0, 0, 0], sizes = [6, 4, 32], strides = [1, 1, 1]} : vector<6x6x32xbf16> to vector<6x4x32xbf16>
    %99 = vector.extract_strided_slice %98 {offsets = [0, 0, 0], sizes = [4, 4, 32], strides = [1, 1, 1]} : vector<6x4x32xbf16> to vector<4x4x32xbf16>
    %100 = vector.shape_cast %99 : vector<4x4x32xbf16> to vector<16x32xbf16>
    %101 = vector.extract_strided_slice %98 {offsets = [1, 0, 0], sizes = [4, 4, 32], strides = [1, 1, 1]} : vector<6x4x32xbf16> to vector<4x4x32xbf16>
    %102 = vector.shape_cast %101 : vector<4x4x32xbf16> to vector<16x32xbf16>
    %103 = vector.extract_strided_slice %98 {offsets = [2, 0, 0], sizes = [4, 4, 32], strides = [1, 1, 1]} : vector<6x4x32xbf16> to vector<4x4x32xbf16>
    %104 = vector.shape_cast %103 : vector<4x4x32xbf16> to vector<16x32xbf16>
    %105 = tpu.concatenate %100, %102, %104 in 1 : vector<16x32xbf16>, vector<16x32xbf16>, vector<16x32xbf16> -> vector<16x96xbf16>
    %106 = vector.extract_strided_slice %91 {offsets = [0, 0], sizes = [96, 256], strides = [1, 1]} : vector<288x256xbf16> to vector<96x256xbf16>
    %cst_21 = arith.constant dense<0.000000e+00> : vector<16x256xf32>
    %107 = tpu.matmul %105, %106, %cst_21 {dimension_numbers = #tpu.dot_dimension_numbers<[1], [0], [0], [1], [0, 0, 1, 1], [], []>} : vector<16x96xbf16>, vector<96x256xbf16>, vector<16x256xf32> -> vector<16x256xf32>
    %108 = vector.extract_strided_slice %97 {offsets = [0, 1, 0], sizes = [6, 4, 32], strides = [1, 1, 1]} : vector<6x6x32xbf16> to vector<6x4x32xbf16>
    %109 = vector.extract_strided_slice %108 {offsets = [0, 0, 0], sizes = [4, 4, 32], strides = [1, 1, 1]} : vector<6x4x32xbf16> to vector<4x4x32xbf16>
    %110 = vector.shape_cast %109 : vector<4x4x32xbf16> to vector<16x32xbf16>
    %111 = vector.extract_strided_slice %108 {offsets = [1, 0, 0], sizes = [4, 4, 32], strides = [1, 1, 1]} : vector<6x4x32xbf16> to vector<4x4x32xbf16>
    %112 = vector.shape_cast %111 : vector<4x4x32xbf16> to vector<16x32xbf16>
    %113 = vector.extract_strided_slice %108 {offsets = [2, 0, 0], sizes = [4, 4, 32], strides = [1, 1, 1]} : vector<6x4x32xbf16> to vector<4x4x32xbf16>
    %114 = vector.shape_cast %113 : vector<4x4x32xbf16> to vector<16x32xbf16>
    %115 = tpu.concatenate %110, %112, %114 in 1 : vector<16x32xbf16>, vector<16x32xbf16>, vector<16x32xbf16> -> vector<16x96xbf16>
    %116 = vector.extract_strided_slice %91 {offsets = [96, 0], sizes = [96, 256], strides = [1, 1]} : vector<288x256xbf16> to vector<96x256xbf16>
    %cst_22 = arith.constant dense<0.000000e+00> : vector<16x256xf32>
    %117 = tpu.matmul %115, %116, %cst_22 {dimension_numbers = #tpu.dot_dimension_numbers<[1], [0], [0], [1], [0, 0, 1, 1], [], []>} : vector<16x96xbf16>, vector<96x256xbf16>, vector<16x256xf32> -> vector<16x256xf32>
    %118 = arith.addf %107, %117 : vector<16x256xf32>
    %119 = vector.extract_strided_slice %97 {offsets = [0, 2, 0], sizes = [6, 4, 32], strides = [1, 1, 1]} : vector<6x6x32xbf16> to vector<6x4x32xbf16>
    %120 = vector.extract_strided_slice %119 {offsets = [0, 0, 0], sizes = [4, 4, 32], strides = [1, 1, 1]} : vector<6x4x32xbf16> to vector<4x4x32xbf16>
    %121 = vector.shape_cast %120 : vector<4x4x32xbf16> to vector<16x32xbf16>
    %122 = vector.extract_strided_slice %119 {offsets = [1, 0, 0], sizes = [4, 4, 32], strides = [1, 1, 1]} : vector<6x4x32xbf16> to vector<4x4x32xbf16>
    %123 = vector.shape_cast %122 : vector<4x4x32xbf16> to vector<16x32xbf16>
    %124 = vector.extract_strided_slice %119 {offsets = [2, 0, 0], sizes = [4, 4, 32], strides = [1, 1, 1]} : vector<6x4x32xbf16> to vector<4x4x32xbf16>
    %125 = vector.shape_cast %124 : vector<4x4x32xbf16> to vector<16x32xbf16>
    %126 = tpu.concatenate %121, %123, %125 in 1 : vector<16x32xbf16>, vector<16x32xbf16>, vector<16x32xbf16> -> vector<16x96xbf16>
    %127 = vector.extract_strided_slice %91 {offsets = [192, 0], sizes = [96, 256], strides = [1, 1]} : vector<288x256xbf16> to vector<96x256xbf16>
    %cst_23 = arith.constant dense<0.000000e+00> : vector<16x256xf32>
    %128 = tpu.matmul %126, %127, %cst_23 {dimension_numbers = #tpu.dot_dimension_numbers<[1], [0], [0], [1], [0, 0, 1, 1], [], []>} : vector<16x96xbf16>, vector<96x256xbf16>, vector<16x256xf32> -> vector<16x256xf32>
    %129 = arith.addf %118, %128 : vector<16x256xf32>
    %130 = arith.addf %88, %129 : vector<16x256xf32>
    %c0_24 = arith.constant 0 : index
    %c0_25 = arith.constant 0 : index
    %131 = vector.load %arg7[%c0_24, %c0_25] : memref<1x256xf32, #tpu.memory_space<vmem>>, vector<1x256xf32>
    %132 = vector.broadcast %131 : vector<1x256xf32> to vector<16x256xf32>
    %133 = arith.addf %130, %132 : vector<16x256xf32>
    %cst_26 = arith.constant 0.000000e+00 : f32
    %134 = vector.broadcast %cst_26 : f32 to vector<16x256xf32>
    %135 = arith.cmpf ogt, %133, %134 : vector<16x256xf32>
    %cst_27 = arith.constant 0.000000e+00 : f32
    %136 = vector.broadcast %cst_27 : f32 to vector<16x256xf32>
    %137 = arith.minimumf %133, %136 : vector<16x256xf32>
    %138 = math.exp %137 : vector<16x256xf32>
    %cst_28 = arith.constant 1.000000e+00 : f32
    %139 = vector.broadcast %cst_28 : f32 to vector<16x256xf32>
    %140 = arith.subf %138, %139 : vector<16x256xf32>
    %141 = arith.select %135, %133, %140 : vector<16x256xi1>, vector<16x256xf32>
    %142 = arith.truncf %141 : vector<16x256xf32> to vector<16x256xbf16>
    %143 = vector.shape_cast %142 : vector<16x256xbf16> to vector<4x4x256xbf16>
    %c0_29 = arith.constant 0 : index
    %c0_30 = arith.constant 0 : index
    %c0_31 = arith.constant 0 : index
    %c0_32 = arith.constant 0 : index
    %144 = vector.load %arg8[%c0_29, %c0_30, %c0_31, %c0_32] : memref<1x4x4x256xbf16, #tpu.memory_space<vmem>>, vector<1x4x4x256xbf16>
    %145 = vector.shape_cast %144 : vector<1x4x4x256xbf16> to vector<4x4x256xbf16>
    %146 = vector.shape_cast %143 : vector<4x4x256xbf16> to vector<1x4x4x256xbf16>
    tpu.vector_store %arg8[%c0_29, %c0_30, %c0_31, %c0_32], %146 {strides = array<i32>} : memref<1x4x4x256xbf16, #tpu.memory_space<vmem>>, vector<1x4x4x256xbf16>,
    return
  }
  func.func @transform_0(%arg0: i32) -> (i32, i32, i32, i32) {
    %c0_i32 = arith.constant 0 : i32
    %c0_i32_0 = arith.constant 0 : i32
    %c0_i32_1 = arith.constant 0 : i32
    %c0_i32_2 = arith.constant 0 : i32
    return %arg0, %c0_i32, %c0_i32_0, %c0_i32_1 : i32, i32, i32, i32
  }
  func.func @transform_1(%arg0: i32) -> (i32, i32, i32, i32) {
    %c0_i32 = arith.constant 0 : i32
    %c0_i32_0 = arith.constant 0 : i32
    %c0_i32_1 = arith.constant 0 : i32
    %c0_i32_2 = arith.constant 0 : i32
    return %arg0, %c0_i32, %c0_i32_0, %c0_i32_1 : i32, i32, i32, i32
  }
  func.func @transform_2(%arg0: i32) -> (i32, i32) {
    %c0_i32 = arith.constant 0 : i32
    %c0_i32_0 = arith.constant 0 : i32
    %c0_i32_1 = arith.constant 0 : i32
    return %c0_i32, %c0_i32_0 : i32, i32
  }
  func.func @transform_3(%arg0: i32) -> (i32, i32) {
    %c0_i32 = arith.constant 0 : i32
    %c0_i32_0 = arith.constant 0 : i32
    %c0_i32_1 = arith.constant 0 : i32
    return %c0_i32, %c0_i32_0 : i32, i32
  }
  func.func @transform_4(%arg0: i32) -> (i32, i32) {
    %c0_i32 = arith.constant 0 : i32
    %c0_i32_0 = arith.constant 0 : i32
    %c0_i32_1 = arith.constant 0 : i32
    return %c0_i32, %c0_i32_0 : i32, i32
  }
  func.func @transform_5(%arg0: i32) -> (i32, i32) {
    %c0_i32 = arith.constant 0 : i32
    %c0_i32_0 = arith.constant 0 : i32
    %c0_i32_1 = arith.constant 0 : i32
    return %c0_i32, %c0_i32_0 : i32, i32
  }
  func.func @transform_6(%arg0: i32) -> (i32, i32) {
    %c0_i32 = arith.constant 0 : i32
    %c0_i32_0 = arith.constant 0 : i32
    %c0_i32_1 = arith.constant 0 : i32
    return %c0_i32, %c0_i32_0 : i32, i32
  }
  func.func @transform_7(%arg0: i32) -> (i32, i32, i32, i32) {
    %c0_i32 = arith.constant 0 : i32
    %c0_i32_0 = arith.constant 0 : i32
    %c0_i32_1 = arith.constant 0 : i32
    %c0_i32_2 = arith.constant 0 : i32
    return %arg0, %c0_i32, %c0_i32_0, %c0_i32_1 : i32, i32, i32, i32
  }
}

</mosaic_0001>

<bundles_post_ra>
// kernel: tpu_custom_call.1
= control target key start
LH: loop header
LB: loop body
LE: loop exit
PB: predicated region body
PF: predicated region fallthrough
CT: control target
= control target key end

     0   :  { %s7986_s0 = inlined_call_operand.hbm [shape: bf16[2,2,2,64], index: 0, kind: input, shape index: {}]   ;;  %s7987_s1 = inlined_call_operand.hbm [shape: bf16[2,4,4,32], index: 1, kind: input, shape index: {}]   ;;  %s7988_s2 = inlined_call_operand.hbm [shape: bf16[576,256], index: 2, kind: input, shape index: {}]   ;;  %s7989_s3 = inlined_call_operand.hbm [shape: f32[1,256], index: 3, kind: input, shape index: {}]   ;;  %s7990_s4 = inlined_call_operand.hbm [shape: bf16[2304,256], index: 4, kind: input, shape index: {}]   ;;  %s7991_s5 = inlined_call_operand.hbm [shape: bf16[288,256], index: 5, kind: input, shape index: {}]   ;;  %s7992_s6 = inlined_call_operand.hbm [shape: f32[1,256], index: 6, kind: input, shape index: {}]   ;;  %s7993_s7 = inlined_call_operand.hbm [shape: bf16[2,4,4,256], index: 7, kind: output, shape index: {}]  }
   0x1   :  { %7997 = sst [smem:[#allocation21_spill]] %s7986_s0 }
   0x2   :  { %7998 = sst [smem:[#allocation22_spill]] %s7988_s2 }
   0x3   :  { %7999 = sst [smem:[#allocation23_spill]] %s7989_s3 }
   0x4   :  { %8000 = sst [smem:[#allocation24_spill]] %s7990_s4 }
   0x5   :  { %8001 = sst [smem:[#allocation25_spill]] %s7991_s5 }
   0x6   :  { %12 = vsyncpa [#allocation3], 0 }
   0x7   :  { %14 = vsyncpa [#allocation3 + $0x1], 0 }
   0x8   :  { %15 = vsyncpa [#allocation6], 0 }
   0x9   :  { %17 = vsyncpa [#allocation6 + $0x1], 0 }
   0xa   :  { %18 = vsyncpa [#allocation9], 0 }
   0xb   :  { %19 = vsyncpa [#allocation12], 0 }
   0xc   :  { %20 = vsyncpa [#allocation4], 0 }
   0xd   :  { %22 = vsyncpa [#allocation4 + $0x1], 0  ;;  %s6988_s24 = smov 0   ;;  %s6990_s25 = smov 0  }
   0xe   :  { %s6992_s26 = smov 0   ;;  %s6994_s27 = smov 0  }
   0xf LB: > { %s6928_s28 = smov [#allocation7]   ;;  %s7009_s30 = sadd.s32 4294967295, %s6926_s27   ;;  %s6926_s27 = sphi %s6994_s27, %s8044_s27   ;;  %s6922_s26 = sphi %s6992_s26, %s8043_s26   ;;  %s6918_s25 = sphi %s6990_s25, %s8042_s25   ;;  %s6914_s24 = sphi %s6988_s24, %s8041_s24  }
  0x10   : > { %s228_s29 = sshll.u32 %s6928_s28, 4  ;;  %p5417_p0 = scmp.ge.s32.totalorder %s6926_s27, 1  ;;  %s7014_s29 = int_to_ptr.vmem [resolvable:$true] %s228_s29 }
  0x11   : > { %p7994_p1 = scmp.eq.s32.totalorder %s7009_s30, 0  ;;  %p216_p2 = scmp.lt.s32.totalorder %s6926_s27, 3 }
  0x12   : > { %s6929_s9 = smov [#allocation8]   ;;  %s6930_s12 = smov [#allocation11]  }
  0x13   : > { %p7016_p3 = pnand %p5417_p0, %p216_p2  ;;  %s242_s10 = sshll.u32 %s6929_s9, 4  ;;  %s7029_s10 = int_to_ptr.vmem [resolvable:$true] %s242_s10 }
  0x14   : > { %s265_s13 = sshll.u32 %s6930_s12, 4  ;;  %s8004_s2 = sld [smem:[#allocation22_spill]]  ;;  %s7031_s13 = int_to_ptr.vmem [resolvable:$true] %s265_s13 }
  0x15   : > { %s8002_s8 = scalar_select %p7016_p3, 1, 0 }
  0x16   : > { %p5950_p5 = pneg %p7016_p3 }
  0x18   : > { %p7025_p6 = pnand %p5950_p5, %p7994_p1 }
  0x1a   : > { %s6644_s16 = scalar_lea.hbm %s8004_s2, 9216  ;;  %p7041_p8 = pneg %p7025_p6 }
  0x1b   : > { %p6645_p7 = scmp.ne.s32.totalorder %s8004_s2, %s6644_s16  ;;  %p6651_p11 = scmp.lt.u32.totalorder %s6644_s16, %s8004_s2 }
  0x1d   : > { %p6647_p9 = pnand %p7041_p8, %p6645_p7 }
  0x1f   : > { %p6648_p10 = pneg %p6647_p9 }
  0x21   : > { %p6653_p12 = pnand %p6651_p11, %p6648_p10 }
  0x23   : > { %6656 = shalt.err (!%p6653_p12)
}
  0x24   : > { %s6657_s22 = scalar_lea.vmem %s7014_s29, 9216  ;;  %p6665_p5 = scmp.lt.s32.totalorder %s7014_s29, %s7014_s29 }
  0x25   : > { %p6658_p13 = scmp.ne.s32.totalorder %s7014_s29, %s6657_s22  ;;  %p6666_p4 = scmp.lt.s32.totalorder %s6657_s22, %s6657_s22 }
  0x27   : > { %p6660_p0 = pnand %p6658_p13, %p7041_p8  ;;  %p6667_p7 = por %p6666_p4, %p6665_p5 }
  0x29   : > { %p6661_p2 = pneg %p6660_p0 }
  0x2b   : > { %p6668_p9 = pnand %p6667_p7, %p6661_p2 }
  0x2d   : > { %6671 = shalt.err (!%p6668_p9)
}
  0x2e   : > { %s6931_s23 = smov 128   ;;  %s6932_s28 = smov 8  }
  0x2f   : > { %5953 = dma.hbm_to_vmem [thread:$0]  (!%p7025_p6), %s8004_s2, 9216, %s7014_s29, [#allocation6], %s6931_s23, %s6931_s23, %s6932_s28  }
  0x30   : > { %s8006_s3 = sld [smem:[#allocation23_spill]] }
  0x36   : > { %s6672_s16 = scalar_lea.hbm %s8006_s3, 32 }
  0x37   : > { %p6673_p4 = scmp.ne.s32.totalorder %s8006_s3, %s6672_s16  ;;  %p6679_p12 = scmp.lt.u32.totalorder %s6672_s16, %s8006_s3 }
  0x39   : > { %p6675_p10 = pnand %p6673_p4, %p7041_p8 }
  0x3b   : > { %p6676_p11 = pneg %p6675_p10 }
  0x3d   : > { %p6681_p13 = pnand %p6679_p12, %p6676_p11 }
  0x3f   : > { %6684 = shalt.err (!%p6681_p13)
}
  0x40   : > { %s6685_s29 = scalar_lea.vmem %s7029_s10, 32  ;;  %p6693_p7 = scmp.lt.s32.totalorder %s7029_s10, %s7029_s10 }
  0x41   : > { %p6686_p0 = scmp.ne.s32.totalorder %s7029_s10, %s6685_s29  ;;  %p6694_p9 = scmp.lt.s32.totalorder %s6685_s29, %s6685_s29 }
  0x43   : > { %p6688_p2 = pnand %p6686_p0, %p7041_p8  ;;  %p6695_p4 = por %p6694_p9, %p6693_p7 }
  0x45   : > { %p6689_p5 = pneg %p6688_p2 }
  0x47   : > { %p6696_p10 = pnand %p6695_p4, %p6689_p5 }
  0x49   : > { %6699 = shalt.err (!%p6696_p10)
}
  0x4a   : > { %5956 = dma.hbm_to_vmem [thread:$0]  (!%p7025_p6), %s8006_s3, 32, %s7029_s10, [#allocation9]  }
  0x4b   : > { %s8007_s5 = sld [smem:[#allocation25_spill]] }
  0x51   : > { %s6700_s15 = scalar_lea.hbm %s8007_s5, 4608 }
  0x52   : > { %p6701_p11 = scmp.ne.s32.totalorder %s8007_s5, %s6700_s15  ;;  %p6707_p0 = scmp.lt.u32.totalorder %s6700_s15, %s8007_s5 }
  0x54   : > { %p6703_p12 = pnand %p6701_p11, %p7041_p8 }
  0x56   : > { %p6704_p13 = pneg %p6703_p12 }
  0x58   : > { %p6709_p2 = pnand %p6707_p0, %p6704_p13 }
  0x5a   : > { %6712 = shalt.err (!%p6709_p2)
}
  0x5b   : > { %s6713_s10 = scalar_lea.vmem %s7031_s13, 4608  ;;  %p6721_p4 = scmp.lt.s32.totalorder %s7031_s13, %s7031_s13 }
  0x5c   : > { %p6714_p5 = scmp.ne.s32.totalorder %s7031_s13, %s6713_s10  ;;  %p6722_p10 = scmp.lt.s32.totalorder %s6713_s10, %s6713_s10 }
  0x5e   : > { %p6716_p7 = pnand %p6714_p5, %p7041_p8  ;;  %p6723_p11 = por %p6722_p10, %p6721_p4 }
  0x60   : > { %p6717_p9 = pneg %p6716_p7 }
  0x62   : > { %p6724_p12 = pnand %p6723_p11, %p6717_p9 }
  0x64   : > { %6727 = shalt.err (!%p6724_p12)
}
  0x65   : > { %5962 = dma.hbm_to_vmem [thread:$0]  (!%p7025_p6), %s8007_s5, 4608, %s7031_s13, [#allocation12], %s6931_s23, %s6931_s23, %s6932_s28  }
  0x66   : > { %s6933_s22 = smov [#allocation10]   ;;  %s6934_s12 = smov [#allocation13]  }
  0x67   : > { %s252_s9 = sshll.u32 %s6933_s22, 4  ;;  %s279_s14 = sshll.u32 %s6934_s12, 4  ;;  %s253_s9 = int_to_ptr.vmem [resolvable:$true] %s252_s9  ;;  %s280_s14 = int_to_ptr.vmem [resolvable:$true] %s279_s14 }
  0x68   : > { %s8008_s4 = sld [smem:[#allocation24_spill]] }
  0x6e   : > { %s6728_s17 = scalar_lea.hbm %s8008_s4, 36864 }
  0x6f   : > { %p6729_p13 = scmp.ne.s32.totalorder %s8008_s4, %s6728_s17  ;;  %p6735_p5 = scmp.lt.u32.totalorder %s6728_s17, %s8008_s4 }
  0x71   : > { %p6731_p0 = pnand %p6729_p13, %p7041_p8 }
  0x73   : > { %p6732_p2 = pneg %p6731_p0 }
  0x75   : > { %p6737_p7 = pnand %p6735_p5, %p6732_p2 }
  0x77   : > { %6740 = shalt.err (!%p6737_p7)
}
  0x78   : > { %s6741_s13 = scalar_lea.vmem %s253_s9, 36864  ;;  %p6749_p11 = scmp.lt.s32.totalorder %s253_s9, %s253_s9 }
  0x79   : > { %p6742_p9 = scmp.ne.s32.totalorder %s253_s9, %s6741_s13  ;;  %p6750_p12 = scmp.lt.s32.totalorder %s6741_s13, %s6741_s13 }
  0x7b   : > { %p6744_p4 = pnand %p6742_p9, %p7041_p8  ;;  %p6751_p1 = por %p6750_p12, %p6749_p11 }
  0x7d   : > { %p6745_p10 = pneg %p6744_p4 }
  0x7f   : > { %p6752_p3 = pnand %p6751_p1, %p6745_p10 }
  0x81   : > { %6755 = shalt.err (!%p6752_p3)
}
  0x82   : > { %5959 = dma.hbm_to_vmem [thread:$0]  (!%p7025_p6), %s8008_s4, 36864, %s253_s9, [#allocation9], %s6931_s23, %s6931_s23, %s6932_s28  }
  0x83   : > { %s6756_s16 = scalar_lea.hbm %s7992_s6, 32 }
  0x84   : > { %p6757_p1 = scmp.ne.s32.totalorder %s7992_s6, %s6756_s16  ;;  %p6763_p0 = scmp.lt.u32.totalorder %s6756_s16, %s7992_s6 }
  0x86   : > { %p6759_p3 = pnand %p6757_p1, %p7041_p8 }
  0x88   : > { %p6760_p13 = pneg %p6759_p3 }
  0x8a   : > { %p6765_p2 = pnand %p6763_p0, %p6760_p13 }
  0x8c   : > { %6768 = shalt.err (!%p6765_p2)
}
  0x8d   : > { %s6769_s21 = scalar_lea.vmem %s280_s14, 32  ;;  %p6777_p4 = scmp.lt.s32.totalorder %s280_s14, %s280_s14 }
  0x8e   : > { %p6770_p5 = scmp.ne.s32.totalorder %s280_s14, %s6769_s21  ;;  %p6778_p10 = scmp.lt.s32.totalorder %s6769_s21, %s6769_s21 }
  0x90   : > { %p6772_p7 = pnand %p6770_p5, %p7041_p8  ;;  %p6779_p11 = por %p6778_p10, %p6777_p4 }
  0x92   : > { %p6773_p9 = pneg %p6772_p7 }
  0x94   : > { %p6780_p12 = pnand %p6779_p11, %p6773_p9 }
  0x96   : > { %6783 = shalt.err (!%p6780_p12)
}
  0x97   : > { %5965 = dma.hbm_to_vmem [thread:$0]  (!%p7025_p6), %s7992_s6, 32, %s280_s14, [#allocation12]  }
  0x98   : > { %s5416_s19 = sadd.s32 4294967294, %s6926_s27   ;;  %s7155_s11 = sadd.s32 1, %s6926_s27  }
  0x99   : > { %s35_s9 = sadd.s32 1, %s6922_s26  ;;  %s32_s13 = ssub.s32 %s6926_s27, %s7155_s11 }
  0x9a   : > { %p42_p8 = scmp.ne.s32.totalorder %s6922_s26, %s6918_s25  ;;  %p33_p1 = scmp.eq.s32.totalorder %s32_s13, 0 }
  0x9b   : > { %p43_p3 = scmp.eq.s32.totalorder %s6926_s27, 0  ;;  %p48_p13 = scmp.ne.s32.totalorder %s6918_s25, %s6914_s24 }
  0x9c   : > { %p203_p0 = scmp.eq.s32.totalorder %s7009_s30, 1  ;;  %p8009_p5 = scmp.eq.s32.totalorder %s7009_s30, 0 }
  0x9d   : > { %s7167_s29 = scalar_select %p33_p1, %s6922_s26, %s35_s9  }
  0x9e   : > { %p44_p2 = por %p43_p3, %p42_p8  ;;  %p7171_p7 = por %p8009_p5, %p48_p13 }
  0x9f   : > { %p7175_p6 = por %p203_p0, %p42_p8  ;;  %p209_p9 = scmp.eq.s32.totalorder %s5416_s19, 1 }
  0xa0   : > { %p5982_p4 = scmp.lt.s32.totalorder %s6926_s27, 2  ;;  %s7181_s12 = sand.u32 1, %s6922_s26  }
  0xa1   : > { %s8011_s14 = scalar_select %p7175_p6, 1, 0 }
  0xa2   : > { %p7183_p10 = por %p209_p9, %p48_p13  ;;  %s5424_s16 = sshll.u32 %s7181_s12, 1 }
  0xa3   : > { %s5877_s17 = sshll.u32 %s6926_s27, 5  ;;  %s8013_s0 = sld [smem:[#allocation21_spill]] }
  0xa4   : > { %s8012_s15 = scalar_select %p7183_p10, 1, 0 }
  0xa5   : > { %s294_s21 = scalar_lea.vmem [#allocation2], %s5424_s16  ;;  %p7194_p11 = pnand %p5982_p4, %p44_p2 }
  0xa6   : > { %s301_s23 = sshll.u32 %s294_s21, 4  ;;  %s291_s19 = scalar_lea.sflag [#allocation3], %s7181_s12  ;;  %s7198_s23 = int_to_ptr.vmem [resolvable:$true] %s301_s23 }
  0xa7   : > { %p6786_p8 = pneg %p7194_p11 }
  0xa9   : > { %s7192_s10 = scalar_lea.hbm %s8013_s0, %s5877_s17  ;;  %s6789_s17 = scalar_lea.hbm %s8013_s0, 64 }
  0xaa   : > { %s6784_s9 = scalar_lea.hbm %s7192_s10, 32  ;;  %p6790_p13 = scmp.lt.u32.totalorder %s7192_s10, %s8013_s0 }
  0xab   : > { %p6785_p12 = scmp.ne.s32.totalorder %s7192_s10, %s6784_s9  ;;  %p6791_p0 = scmp.lt.u32.totalorder %s6789_s17, %s6784_s9 }
  0xac   : > { %p6793_p5 = scmp.lt.u32.totalorder %s6784_s9, %s7192_s10 }
  0xad   : > { %p6787_p1 = pnand %p6786_p8, %p6785_p12  ;;  %p6792_p2 = por %p6791_p0, %p6790_p13 }
  0xaf   : > { %p6788_p3 = pneg %p6787_p1  ;;  %p6794_p9 = por %p6793_p5, %p6792_p2 }
  0xb1   : > { %p6795_p4 = pnand %p6794_p9, %p6788_p3 }
  0xb3   : > { %6798 = shalt.err (!%p6795_p4)
}
  0xb4   : > { %s6799_s21 = scalar_lea.vmem %s7198_s23, 32  ;;  %s6935_s13 = smov [#allocation2]  }
  0xb5   : > { %p6800_p12 = scmp.ne.s32.totalorder %s7198_s23, %s6799_s21  ;;  %s6804_s16 = sshll.u32 %s6935_s13, 4  ;;  %s6805_s16 = int_to_ptr.vmem [resolvable:$false] %s6804_s16 }
  0xb6   : > { %s6806_s18 = scalar_lea.vmem %s6805_s16, 64  ;;  %p6807_p6 = scmp.lt.s32.totalorder %s7198_s23, %s6805_s16 }
  0xb7   : > { %p6802_p1 = pnand %p6800_p12, %p6786_p8  ;;  %p6808_p13 = scmp.lt.s32.totalorder %s6806_s18, %s6799_s21 }
  0xb9   : > { %p6803_p10 = pneg %p6802_p1  ;;  %p6809_p0 = por %p6808_p13, %p6807_p6 }
  0xbb   : > { %p6810_p2 = pnand %p6809_p0, %p6803_p10 }
  0xbd   : > { %6813 = shalt.err (!%p6810_p2)
}
  0xbe   : > { %s6936_s9 = smov 16   ;;  %s6937_s17 = smov 1  }
  0xbf   : > { %5969 = dma.hbm_to_vmem [thread:$0]  (!%p7194_p11), %s7192_s10, 32, %s7198_s23, %s291_s19, %s6936_s9, %s6936_s9, %s6937_s17  }
  0xc0   : > { %s311_s20 = sand.u32 1, %s6926_s27   ;;  %s5427_s13 = sshll.u32 %s7181_s12, 3 }
  0xc1   : > { %s5878_s16 = sshll.u32 %s6926_s27, 7  ;;  %s315_s21 = scalar_lea.vmem [#allocation5], %s5427_s13 }
  0xc2   : > { %s322_s18 = sshll.u32 %s315_s21, 4  ;;  %s7234_s3 = scalar_lea.hbm %s7987_s1, %s5878_s16  ;;  %s7236_s18 = int_to_ptr.vmem [resolvable:$true] %s322_s18 }
  0xc3   : > { %s7238_s4 = scalar_lea.sflag [#allocation6], %s311_s20  ;;  %s6814_s5 = scalar_lea.hbm %s7234_s3, 128 }
  0xc4   : > { %p6815_p6 = scmp.ne.s32.totalorder %s7234_s3, %s6814_s5  ;;  %s6819_s0 = scalar_lea.hbm %s7987_s1, 256 }
  0xc5   : > { %p6820_p5 = scmp.lt.u32.totalorder %s7234_s3, %s7987_s1  ;;  %p6821_p9 = scmp.lt.u32.totalorder %s6819_s0, %s6814_s5 }
  0xc6   : > { %p6817_p10 = pnand %p6815_p6, %p6786_p8  ;;  %p6823_p12 = scmp.lt.u32.totalorder %s6814_s5, %s7234_s3 }
  0xc7   : > { %p6822_p4 = por %p6821_p9, %p6820_p5 }
  0xc8   : > { %p6818_p3 = pneg %p6817_p10 }
  0xc9   : > { %p6824_p1 = por %p6823_p12, %p6822_p4 }
  0xcb   : > { %p6825_p13 = pnand %p6824_p1, %p6818_p3 }
  0xcd   : > { %6828 = shalt.err (!%p6825_p13)
}
  0xce   : > { %s6829_s19 = scalar_lea.vmem %s7236_s18, 128  ;;  %s6938_s9 = smov [#allocation5]  }
  0xcf   : > { %p6830_p0 = scmp.ne.s32.totalorder %s7236_s18, %s6829_s19  ;;  %s6834_s17 = sshll.u32 %s6938_s9, 4  ;;  %s6835_s17 = int_to_ptr.vmem [resolvable:$false] %s6834_s17 }
  0xd0   : > { %s6836_s20 = scalar_lea.vmem %s6835_s17, 256  ;;  %p6837_p10 = scmp.lt.s32.totalorder %s7236_s18, %s6835_s17 }
  0xd1   : > { %p6832_p2 = pnand %p6830_p0, %p6786_p8  ;;  %p6838_p5 = scmp.lt.s32.totalorder %s6836_s20, %s6829_s19 }
  0xd3   : > { %p6833_p6 = pneg %p6832_p2  ;;  %p6839_p9 = por %p6838_p5, %p6837_p10 }
  0xd5   : > { %p6840_p4 = pnand %p6839_p9, %p6833_p6 }
  0xd7   : > { %6843 = shalt.err (!%p6840_p4)
}
  0xd8   : > { %s6939_s5 = smov 32   ;;  %s6940_s13 = smov 2  }
  0xd9   : > { %5972 = dma.hbm_to_vmem [thread:$0]  (!%p7194_p11), %s7234_s3, 128, %s7236_s18, %s7238_s4, %s6939_s5, %s6939_s5, %s6940_s13  }
  0xda   : > { %p8015_p8 = scmp.ne.s32.totalorder %s8002_s8, 0 }
  0xdb   : > { %s7267_s16 = sand.u32 (!%p8015_p8), 1, %s6918_s25  }
  0xdc   : > { %334 = sbr.rel (%p8015_p8) target bundleno = 1329 (0x531), region = 48  ;;  %s5431_s21 = sshll.u32 (!%p8015_p8), %s7267_s16, 1 }
  0xdd   : > { %s337_s12 = scalar_lea.sflag (!%p8015_p8), [#allocation3], %s7267_s16  ;;  %s340_s10 = scalar_lea.vmem (!%p8015_p8), [#allocation2], %s5431_s21 }
  0xe3   : > { %6889 = dma.done.wait (%p7171_p7), %s337_s12, 32  }
  0xe4   : > { %6891 = vsyncadd (%p7171_p7), %s337_s12, 4294967264  ;;  %s345_s3 = sand.u32 1, %s7009_s30   ;;  %s5432_s4 = sshll.u32 %s7267_s16, 3 }
  0xe5   : > { %s346_s8 = scalar_lea.sflag [#allocation6], %s345_s3  ;;  %s7277_s28 = scalar_lea.vmem [#allocation5], %s5432_s4 }
  0xe6   : > { %6893 = dma.done.wait (%p7171_p7), %s346_s8, 128  }
  0xe7   : > { %6895 = vsyncadd (%p7171_p7), %s346_s8, 4294967168  ;;  %p8016_p11 = scmp.eq.s32.totalorder %s7009_s30, 0 }
  0xe9   : > { %6897 = dma.done.wait (%p8016_p11), [#allocation6], 9216   ;;  %p8017_p3 = pmov %p8016_p11 }
  0xeb   : > { %6899 = vsyncadd (%p8017_p3), [#allocation6], 4294958080  ;;  %p8018_p12 = pmov %p8017_p3 }
  0xec   : > { %p8019_p1 = pmov %p8017_p3 }
  0xed   : > { %6901 = dma.done.wait (%p8018_p12), [#allocation9], 36896  }
  0xee   : > { %6903 = vsyncadd (%p8019_p1), [#allocation9], 4294930400  ;;  %p8020_p13 = pmov %p8019_p1 }
  0xef   : > { %p8021_p0 = pmov %p8019_p1 }
  0xf0   : > { %6905 = dma.done.wait (%p8020_p13), [#allocation12], 4640  }
  0xf1   : > { %6907 = vsyncadd (%p8021_p0), [#allocation12], 4294962656  ;;  %v492_v0 = vlaneseq  ;;  %v6941_v1 = vmov 1966171168   ;;  %vm625_vm0 = vsmask.f32 1284 }
  0xf2   : > { %v490_v2 = vunpack.c.l.s4 %v6941_v1  ;;  %vm533_vm1 = vsmask.f32 256  ;;  %vm627_vm3 = vsmask.f32 2312  ;;  %vm629_vm4 = vsmask.f32 3340 }
  0xf3   : > { %v7295_v3 = vshrl.u32 %v492_v0, 7  ;;  %vm626_vm2 = vmor %vm533_vm1, %vm625_vm0  ;;  %v5440_v6 = vld.sshfl [vmem:[%s340_s10] sm:$0x1 pattern:$0x75316420]  ;;  %vm532_vm5 = vcmask 1040384  }
  0xf4   : > { %v491_v4 = vunpack.c.0.s8 %v490_v2  ;;  %v5439_v7 = vld.sshfl [vmem:[%s340_s10 + $0x1] sm:$0x1 pattern:$0x75316420]  ;;  %vm628_vm6 = vmor %vm626_vm2, %vm627_vm3  ;;  %vm537_vm7 = vcmask 1041408   ;;  %s6942_s22 = smov 64  }
  0xf5   : > { %v6038_v10 = vld [vmem:[#allocation7 + $0xc4] ss:$8 sps:$4 sm:$0xff]   ;;  %v6040_v11 = vld [vmem:[#allocation7 + $0xc0] ss:$8 sps:$4 sm:$0xff]   ;;  %vm7305_vm8 = vmand %vm532_vm5, %vm533_vm1  ;;  %vm538_vm9 = vsmask.f32 1280 }
  0xf6   : > { %v7298_v5 = vsub.s32 %v491_v4, %v7295_v3  ;;  %vm630_vm10 = vmor %vm628_vm6, %vm629_vm4  ;;  %vm631_vm11 = vsmask.f32 4368  ;;  %815 = vmatprep.subr.bf16.mxu0 %v6038_v10  ;;  %v6041_v17 = vld [vmem:[#allocation7 + $0xd4] ss:$8 sps:$4 sm:$0xff]   ;;  %v6043_v19 = vld [vmem:[#allocation7 + $0xd0] ss:$8 sps:$4 sm:$0xff]  }
  0xf7   : > { %816 = vmatpush1.bf16.msra.mxu0 %v6040_v11  ;;  %vm7312_vm12 = vmand %vm537_vm7, %vm538_vm9  ;;  %v6044_v23 = vld [vmem:[#allocation7 + $0xe4] ss:$8 sps:$4 sm:$0xff]   ;;  %vm633_vm14 = vsmask.f32 5396  ;;  %v6046_v28 = vld [vmem:[#allocation7 + $0xe0] ss:$8 sps:$4 sm:$0xff]  }
  0xf8   : > { %v509_v8 = vrot.slane %v5440_v6, %v7298_v5  ;;  %v495_v9 = vrot.slane %v5439_v7, %v7298_v5  ;;  %817 = vmatprep.subr.bf16.mxu0 %v6041_v17  ;;  %vm632_vm13 = vmor %vm630_vm10, %vm631_vm11  ;;  %vm635_vm0 = vsmask.f32 6424  ;;  %v6047_v31 = vld [vmem:[#allocation7 + $0xf4] ss:$8 sps:$4 sm:$0xff]   ;;  %vm637_vm2 = vsmask.f32 7452 }
  0xf9   : > { %vm634_vm15 = vmor %vm632_vm13, %vm633_vm14  ;;  %v6049_v37 = vld [vmem:[#allocation7 + $0xf0] ss:$8 sps:$4 sm:$0xff]   ;;  %v6050_v40 = vld [vmem:[#allocation7 + $0x104] ss:$8 sps:$4 sm:$0xff]   ;;  %vm576_vm4 = vcmask 523264   ;;  %vm2358_vm10 = vcmask 1042432  }
  0xfa   : > { %v514_v12 = vshrl.u32 %v509_v8, 16  ;;  %v523_v13 = vshll.u32 %v509_v8, 16  ;;  %v511_v15 = vshrl.u32 %v495_v9, 16  ;;  %v519_v16 = vshll.u32 %v495_v9, 16  ;;  %vm636_vm1 = vmor %vm634_vm15, %vm635_vm0  ;;  %v6052_v46 = vld [vmem:[#allocation7 + $0x100] ss:$8 sps:$4 sm:$0xff]  }
  0xfb   : > { %818 = vmatpush1.bf16.msra.mxu0 %v6043_v19  ;;  %vm638_vm3 = vmor %vm636_vm1, %vm637_vm2  ;;  %v6053_v48 = vld [vmem:[#allocation7 + $0x114] ss:$8 sps:$4 sm:$0xff]   ;;  %v6055_v55 = vld [vmem:[#allocation7 + $0x110] ss:$8 sps:$4 sm:$0xff]   ;;  %vm2412_vm6 = vsmask.f32 3336 }
  0xfc   : > { %v522_v18 = vrot.slane %v514_v12, 7  ;;  %v518_v20 = vrot.slane %v511_v15, 7  ;;  %v529_v21 = vrot.slane %v523_v13, 7  ;;  %v528_v25 = vrot.slane %v519_v16, 7  ;;  %819 = vmatprep.subr.bf16.mxu0 %v6044_v23  ;;  %v6056_v57 = vld [vmem:[#allocation7 + $0x124] ss:$8 sps:$4 sm:$0xff]  }
  0xfd   : > { %v6058_v62 = vld [vmem:[#allocation7 + $0x120] ss:$8 sps:$4 sm:$0xff]   ;;  %v6059_v63 = vld [vmem:[#allocation7 + $0x134] ss:$8 sps:$4 sm:$0xff]   ;;  %v6061_v4 = vld [vmem:[#allocation7 + $0x130] ss:$8 sps:$4 sm:$0xff]  }
  0xfe   : > { %v525_v24 = vor.u32 %v523_v13, %v522_v18  ;;  %v521_v26 = vor.u32 %v519_v16, %v518_v20  ;;  %v6062_v6 = vld [vmem:[#allocation7 + $0x144] ss:$8 sps:$4 sm:$0xff]   ;;  %v6064_v7 = vld [vmem:[#allocation7 + $0x140] ss:$8 sps:$4 sm:$0xff]   ;;  %v6065_v8 = vld [vmem:[#allocation7 + $0x154] ss:$8 sps:$4 sm:$0xff]  }
  0xff   : > { %820 = vmatpush1.bf16.msra.mxu0 %v6046_v28  ;;  %v6067_v9 = vld [vmem:[#allocation7 + $0x150] ss:$8 sps:$4 sm:$0xff]   ;;  %v6068_v10 = vld [vmem:[#allocation7 + $0x164] ss:$8 sps:$4 sm:$0xff]   ;;  %v6070_v11 = vld [vmem:[#allocation7 + $0x160] ss:$8 sps:$4 sm:$0xff]  }
 0x100   : > { %v536_v27 = vsel %vm7305_vm8, %v514_v12, %v525_v24  ;;  %v535_v29 = vsel %vm7305_vm8, %v511_v15, %v521_v26  ;;  %821 = vmatprep.subr.bf16.mxu0 %v6047_v31  ;;  %v6071_v12 = vld [vmem:[#allocation7 + $0x174] ss:$8 sps:$4 sm:$0xff]   ;;  %v6073_v13 = vld [vmem:[#allocation7 + $0x170] ss:$8 sps:$4 sm:$0xff]   ;;  %v6076_v15 = vld [vmem:[#allocation7 + $0x4] ss:$8 sps:$4 sm:$0xff]  }
 0x101   : > { %v7322_v30 = vsel %vm7312_vm12, %v536_v27, %v529_v21  ;;  %v7326_v32 = vsel %vm7312_vm12, %v535_v29, %v528_v25  ;;  %vm2414_vm7 = vsmask.f32 5392  ;;  %vm2359_vm11 = vsmask.f32 2304  ;;  %vm2413_vm12 = vmor %vm538_vm9, %vm2412_vm6  ;;  %s6944_s18 = smov 32   ;;  %s5438_s0 = sshll.u32 %s7267_s16, 4 }
 0x102   : > { %v609_v33 = vrot.slane %v7322_v30, %v7298_v5  ;;  %v587_v34 = vrot.slane %v7326_v32, %v7298_v5  ;;  %v559_v51 = vcombine.low %v7322_v30, %v7326_v32  ;;  %v544_v16 = vcombine.low %v7326_v32, %v7322_v30  ;;  %v5530_v19 = vld.sshfl [vmem:[%s7277_s28] sm:$0x3 pattern:$0x76325410]  ;;  %vm7366_vm15 = vmand %vm2358_vm10, %vm2359_vm11  ;;  %s404_s2 = scalar_lea.vmem [#allocation14], %s5438_s0  ;;  %s5879_s23 = sshll.u32 %s7009_s30, 8 }
 0x103   : > { %822 = vmatpush1.bf16.msra.mxu0 %v6049_v37  ;;  %v6943_v17 = vmov 1983009808   ;;  %vm2475_vm13 = vcmask 1042434   ;;  %vm2477_vm14 = vcmask 1044484   ;;  %v2729_v21 = vshrl.u32 %v5530_v19, 16  ;;  %vm7372_vm0 = vmor %vm2413_vm12, %vm2414_vm7  ;;  %s5273_s19 = sshll.u32 %s404_s2, 4  ;;  %s7938_s20 = scalar_lea.hbm %s7993_s7, %s5879_s23  ;;  %s7940_s19 = int_to_ptr.vmem [resolvable:$true] %s5273_s19 }
 0x104   : > { %v610_v35 = vcombine.high %v609_v33, %v609_v33  ;;  %v617_v36 = vrot.slane %v609_v33, %v7298_v5  ;;  %v588_v38 = vcombine.high %v587_v34, %v587_v34  ;;  %v595_v39 = vrot.slane %v587_v34, %v7298_v5  ;;  %823 = vmatprep.subr.bf16.mxu0 %v6050_v40  ;;  %v5529_v20 = vld.sshfl [vmem:[%s7277_s28 + $0x2] sm:$0x3 pattern:$0x76325410]  ;;  %vm7378_vm9 = vmor %vm532_vm5, %vm2475_vm13  ;;  %s5260_s5 = scalar_lea.sflag [#allocation4], %s7267_s16  ;;  %s6844_s30 = scalar_lea.vmem %s7940_s19, 256 }
 0x105   : > { %v566_v60 = vrot.slane %v559_v51, %v7298_v5  ;;  %v2377_v18 = vunpack.c.l.s4 %v6943_v17  ;;  %v2746_v22 = vshll.u32 %v5530_v19, 16  ;;  %v5531_v25 = vld.sshfl [vmem:[%s7277_s28 + $0x4] sm:$0x3 pattern:$0x76325410]  ;;  %v2726_v26 = vshrl.u32 %v5529_v20, 16  ;;  %vm7396_vm1 = vmor %vm7378_vm9, %vm2477_vm14  ;;  %p6845_p7 = scmp.ne.s32.totalorder %s7940_s19, %s6844_s30 }
 0x106   : > { %v7335_v41 = vrot.slane %v610_v35, %v7298_v5  ;;  %v649_v42 = vshrl.u32 %v617_v36, 16  ;;  %v7338_v43 = vrot.slane %v588_v38, %v7298_v5  ;;  %v640_v44 = vshrl.u32 %v595_v39, 16  ;;  %v5532_v29 = vld.sshfl [vmem:[%s7277_s28 + $0x6] sm:$0x3 pattern:$0x76325410] }
 0x107   : > { %824 = vmatpush1.bf16.msra.mxu0 %v6052_v46  ;;  %v573_v2 = vrot.slane %v566_v60, %v7298_v5  ;;  %v2378_v24 = vunpack.c.0.s8 %v2377_v18  ;;  %v2742_v27 = vshll.u32 %v5529_v20, 16  ;;  %v2732_v31 = vshrl.u32 %v5531_v25, 16  ;;  %p8038_p2 = scmp.ne.s32.totalorder %s8011_s14, 0  ;;  %s6946_s13 = smov [#allocation14]  }
 0x108   : > { %v654_v45 = vshll.u32 %v7335_v41, 16  ;;  %v645_v47 = vshll.u32 %v7338_v43, 16  ;;  %v1034_v49 = vcombine.low %v7335_v41, %v7338_v43  ;;  %825 = vmatprep.subr.bf16.mxu0 %v6053_v48  ;;  %v2745_v33 = vrot.slane %v2729_v21, 7  ;;  %s6848_s21 = sshll.u32 %s6946_s13, 4  ;;  %s6849_s21 = int_to_ptr.vmem [resolvable:$false] %s6848_s21 }
 0x109   : > { %v7383_v35 = vsub.s32 %v2378_v24, %v7295_v3  ;;  %v2735_v36 = vshrl.u32 %v5532_v29, 16  ;;  %v2741_v37 = vrot.slane %v2726_v26, 7  ;;  %v2750_v38 = vshll.u32 %v5531_v25, 16  ;;  %p6846_p6 = pnand %p6845_p7, %p8038_p2  ;;  %s6850_s12 = scalar_lea.vmem %s6849_s21, 512 }
 0x10a   : > { %v656_v50 = vsel %vm638_vm3, %v649_v42, %v654_v45  ;;  %v647_v52 = vsel %vm638_vm3, %v640_v44, %v645_v47  ;;  %v1041_v53 = vrot.slane %v1034_v49, %v7298_v5  ;;  %v2748_v39 = vor.u32 %v2746_v22, %v2745_v33  ;;  %p6851_p5 = scmp.lt.s32.totalorder %s7940_s19, %s6849_s21  ;;  %p6852_p9 = scmp.lt.s32.totalorder %s6850_s12, %s6844_s30 }
 0x10b   : > { %v672_v54 = vcombine.low %v656_v50, %v647_v52  ;;  %v657_v56 = vcombine.low %v647_v52, %v656_v50  ;;  %826 = vmatpush1.bf16.msra.mxu0 %v6055_v55  ;;  %v2749_v40 = vrot.slane %v2732_v31, 7  ;;  %v2754_v42 = vshll.u32 %v5532_v29, 16  ;;  %p6847_p10 = pneg %p6846_p6 }
 0x10c   : > { %v1048_v58 = vrot.slane %v1041_v53, %v7298_v5  ;;  %827 = vmatprep.subr.bf16.mxu0 %v6056_v57  ;;  %v2761_v44 = vrot.slane %v2742_v27, 7  ;;  %v2744_v45 = vor.u32 %v2742_v27, %v2741_v37  ;;  %v2753_v46 = vrot.slane %v2735_v36, 7  ;;  %p6853_p4 = por %p6852_p9, %p6851_p5 }
 0x10d   : > { %v679_v59 = vrot.slane %v672_v54, %v7298_v5  ;;  %v664_v61 = vrot.slane %v657_v56, %v7298_v5  ;;  %v2762_v47 = vrot.slane %v2746_v22, 7  ;;  %v2763_v48 = vrot.slane %v2750_v38, 7 }
 0x10e   : > { %1049 = vrot.lane.b32.xlu1 %v1048_v58, %s6942_s22  ;;  %v2752_v49 = vor.u32 %v2750_v38, %v2749_v40  ;;  %v2764_v50 = vrot.slane %v2754_v42, 7  ;;  %v2770_v51 = vsel %vm7305_vm8, %v2729_v21, %v2748_v39  ;;  %v2756_v52 = vor.u32 %v2754_v42, %v2753_v46  ;;  %p6854_p8 = pnand %p6853_p4, %p6847_p10 }
 0x10f   : > { %v686_v0 = vrot.slane %v679_v59, %v7298_v5  ;;  %v7354_v1 = vrot.slane %v664_v61, %v7298_v5  ;;  %828 = vmatpush1.bf16.msra.mxu0 %v6058_v62  ;;  %v2769_v53 = vsel %vm7305_vm8, %v2726_v26, %v2744_v45  ;;  %v7391_v54 = vsel %vm7366_vm15, %v2770_v51, %v2762_v47 }
 0x110   : > { %829 = vmatprep.subr.bf16.mxu0 %v6059_v63  ;;  %vm2416_vm2 = vsmask.f32 7448  ;;  %v2771_v56 = vsel %vm7305_vm8, %v2732_v31, %v2752_v49  ;;  %v7404_v57 = vsel %vm7366_vm15, %v2769_v53, %v2761_v44  ;;  %v7408_v58 = vrot.slane %v7391_v54, %v7383_v35 }
 0x111   : > { %687 = vrot.lane.b32.xlu0 %v686_v0, %s6942_s22  ;;  %5467 = vmatprep.mubr.msk.bf16.mxu0 %vm576_vm4, %v7354_v1  ;;  %v2772_v59 = vsel %vm7305_vm8, %v2735_v36, %v2756_v52  ;;  %v7414_v60 = vsel %vm7366_vm15, %v2771_v56, %v2763_v48  ;;  %v7418_v61 = vrot.slane %v7404_v57, %v7383_v35  ;;  %vm2479_vm3 = vcmask 1046534   ;;  %vm7447_vm6 = vmor %vm7372_vm0, %vm2416_vm2 }
 0x112   : > { %v7422_v62 = vsel %vm7366_vm15, %v2772_v59, %v2764_v50  ;;  %v7426_v63 = vcombine.high %v7408_v58, %v7408_v58  ;;  %v7430_v0 = vrot.slane %v7414_v60, %v7383_v35  ;;  %vm7456_vm7 = vmor %vm7396_vm1, %vm2479_vm3  ;;  %v551_v31 = vrot.slane %v544_v16, %v7298_v5 }
 0x113   : > { %830 = vmatpush1.bf16.msra.mxu0 %v6061_v4  ;;  %v2841_v4 = vcombine.high %v7418_v61, %v7418_v61  ;;  %v2906_v29 = vrot.slane %v7422_v62, %v7383_v35  ;;  %v2798_v34 = vcombine.low %v7391_v54, %v7404_v57  ;;  %v2799_v51 = vcombine.low %v7414_v60, %v7422_v62 }
 0x114   : > { %831 = vmatprep.subr.bf16.mxu0 %v6062_v6  ;;  %v2859_v6 = vshrl.u32 %v7418_v61, 16  ;;  %v2890_v22 = vshll.u32 %v7430_v0, 16  ;;  %v7477_v16 = vrot.slane %v551_v31, %v7298_v5  ;;  %v2781_v53 = vcombine.low %v7404_v57, %v7414_v60 }
 0x115   : > { %574 = vrot.lane.b32.xlu0 %v573_v2, %s6942_s22  ;;  %v2873_v2 = vshrl.u32 %v7408_v58, 16  ;;  %v2868_v18 = vshll.u32 %v2841_v4, 16  ;;  %v2907_v38 = vcombine.high %v2906_v29, %v2906_v29  ;;  %v2909_v39 = vshrl.u32 %v2906_v29, 16 }
 0x116   : > { %v2892_v33 = vrot.slane %v2890_v22, 7  ;;  %v2912_v44 = vshll.u32 %v2906_v29, 16  ;;  %v2806_v52 = vrot.slane %v2798_v34, %v7383_v35  ;;  %v6077_v34 = vld [vmem:[#allocation7 + $0x10] ss:$8 sps:$4 sm:$0xff]   ;;  %vm2828_vm10 = vcmask 261120  }
 0x117   : > { %832 = vmatpush1.bf16.msra.mxu0 %v6064_v7  ;;  %v2862_v7 = vshll.u32 %v7418_v61, 16  ;;  %v2870_v27 = vrot.slane %v2868_v18, 7  ;;  %v2911_v30 = vrot.slane %v2909_v39, 6  ;;  %v2918_v32 = vshll.u32 %v2907_v38, 16  ;;  %v6074_v18 = vld [vmem:[#allocation7] ss:$8 sps:$4 sm:$0xff]  }
 0x118   : > { %833 = vmatprep.subr.bf16.mxu0 %v6065_v8  ;;  %v2876_v8 = vshll.u32 %v7408_v58, 16  ;;  %v2914_v48 = vrot.slane %v2912_v44, 7  ;;  %v3199_v22 = vrot.slane %v2907_v38, 7  ;;  %v6082_v39 = vld [vmem:[#allocation7 + $0x24] ss:$8 sps:$4 sm:$0xff]   ;;  %vm3034_vm11 = vcmask 785408  }
 0x119   : > { %v2864_v17 = vrot.slane %v2862_v7, 7  ;;  %v2920_v59 = vrot.slane %v2918_v32, 7  ;;  %v2817_v7 = vcombine.low %v7422_v62, %v7414_v60  ;;  %v5562_v60 = vrot.slane %v2906_v29, 9  ;;  %v6079_v62 = vld [vmem:[#allocation7 + $0x14] ss:$8 sps:$4 sm:$0xff]  }
 0x11a   : > { %v2878_v19 = vrot.slane %v2876_v8, 7  ;;  %v2915_v56 = vor.u32 %v2914_v48, %v2911_v30  ;;  %v3187_v8 = vrot.slane %v2841_v4, 7  ;;  %v6080_v48 = vld [vmem:[#allocation7 + $0x20] ss:$8 sps:$4 sm:$0xff]  }
 0x11b   : > { %834 = vmatpush1.bf16.msra.mxu0 %v6067_v9  ;;  %v7440_v9 = vcombine.high %v7430_v0, %v7430_v0  ;;  %v3200_v38 = vsel %vm7456_vm7, %v5562_v60, %v3199_v22  ;;  %v6106_v60 = vld [vmem:[#allocation7 + $0xa4] ss:$8 sps:$4 sm:$0xff]  }
 0x11c   : > { %835 = vmatprep.subr.bf16.mxu0 %v6068_v10  ;;  %v2875_v10 = vrot.slane %v2873_v2, 6  ;;  %v5559_v2 = vrot.slane %v7418_v61, 9  ;;  %v2813_v61 = vrot.slane %v2799_v51, %v7383_v35 }
 0x11d   : > { %v2896_v24 = vshll.u32 %v7440_v9, 16 }
 0x11e   : > { %v2879_v28 = vor.u32 %v2878_v19, %v2875_v10  ;;  %v5560_v10 = vrot.slane %v7408_v58, 9 }
 0x11f   : > { %836 = vmatpush1.bf16.msra.mxu0 %v6070_v11  ;;  %v2882_v11 = vshll.u32 %v7426_v63, 16  ;;  %v2898_v42 = vrot.slane %v2896_v24, 7 }
 0x120   : > { %837 = vmatprep.subr.bf16.mxu0 %v6071_v12  ;;  %v2887_v12 = vshrl.u32 %v7430_v0, 16  ;;  %v2880_v37 = vrot.slane %v2879_v28, 2  ;;  %v2824_v28 = vrot.slane %v2817_v7, %v7383_v35  ;;  %v6091_v7 = vld [vmem:[#allocation7 + $0x54] ss:$8 sps:$4 sm:$0xff]  }
 0x121   : > { %v2884_v20 = vrot.slane %v2882_v11, 7  ;;  %v2916_v11 = vrot.slane %v2915_v56, 2 }
 0x122   : > { %v2889_v21 = vrot.slane %v2887_v12, 6  ;;  %v3191_v12 = vrot.slane %v7426_v63, 7 }
 0x123   : > { %838 = vmatpush1.bf16.msra.mxu0 %v6073_v13  ;;  %v7474_v46 = vsel %vm7447_vm6, %v2880_v37, %v2884_v20  ;;  %v7502_v20 = vsel %vm7456_vm7, %v5559_v2, %v3187_v8  ;;  %v2921_v58 = vsel %vm7447_vm6, %v2916_v11, %v2920_v59  ;;  %v6088_v2 = vld [vmem:[#allocation7 + $0x44] ss:$8 sps:$4 sm:$0xff]   ;;  %v6089_v8 = vld [vmem:[#allocation7 + $0x50] ss:$8 sps:$4 sm:$0xff]   ;;  %v6092_v11 = vld [vmem:[#allocation7 + $0x60] ss:$8 sps:$4 sm:$0xff]  }
 0x124   : > { %978 = vmatprep.subr.bf16.mxu0 %v6076_v15  ;;  %v2861_v15 = vrot.slane %v2859_v6, 6  ;;  %v2893_v40 = vor.u32 %v2892_v33, %v2889_v21 }
 0x126   : > { %v2865_v26 = vor.u32 %v2864_v17, %v2861_v15  ;;  %v2894_v47 = vrot.slane %v2893_v40, 2  ;;  %v5561_v15 = vrot.slane %v7430_v0, 9  ;;  %v3195_v17 = vrot.slane %v7440_v9, 7 }
 0x127   : > { %v7511_v0 = vsel %vm7456_vm7, %v5560_v10, %v3191_v12  ;;  %v6094_v10 = vld [vmem:[#allocation7 + $0x64] ss:$8 sps:$4 sm:$0xff]   ;;  %v6097_v12 = vld [vmem:[#allocation7 + $0x74] ss:$8 sps:$4 sm:$0xff]  }
 0x128   : > { %v2866_v36 = vrot.slane %v2865_v26, 2  ;;  %v2899_v55 = vsel %vm7447_vm6, %v2894_v47, %v2898_v42  ;;  %v3196_v4 = vsel %vm7456_vm7, %v5561_v15, %v3195_v17  ;;  %v3201_v24 = vcombine.low %v7502_v20, %v7511_v0  ;;  %v6095_v15 = vld [vmem:[#allocation7 + $0x70] ss:$8 sps:$4 sm:$0xff]   ;;  %v6100_v17 = vld [vmem:[#allocation7 + $0x84] ss:$8 sps:$4 sm:$0xff]  }
 0x129   : > { %v2940_v9 = vcombine.low %v2899_v55, %v2921_v58  ;;  %v2958_v21 = vcombine.low %v2921_v58, %v2899_v55  ;;  %v3218_v29 = vcombine.low %v7511_v0, %v7502_v20  ;;  %v3202_v31 = vcombine.low %v7502_v20, %v3196_v4  ;;  %v6202_v20 = vld [vmem:[#allocation10 + $0x4] ss:$8 sps:$4 sm:$0xff]   ;;  %v6200_v0 = vld [vmem:[#allocation10] ss:$8 sps:$4 sm:$0xff]  }
 0x12a   : > { %v7470_v45 = vsel %vm7447_vm6, %v2866_v36, %v2870_v27  ;;  %v7518_v27 = vrot.slane %v2781_v53, %v7383_v35  ;;  %v3219_v40 = vcombine.low %v3196_v4, %v3200_v38  ;;  %v3237_v42 = vcombine.low %v3200_v38, %v3196_v4  ;;  %v6109_v4 = vld [vmem:[#allocation7 + $0xb4] ss:$8 sps:$4 sm:$0xff]   ;;  %v6122_v38 = vld [vmem:[#allocation7 + $0x1c0] ss:$8 sps:$4 sm:$0xff]  }
 0x12b   : > { %v2922_v49 = vcombine.low %v7470_v45, %v7474_v46  ;;  %v2939_v50 = vcombine.low %v7474_v46, %v7470_v45  ;;  %v2923_v6 = vcombine.low %v7470_v45, %v2899_v55  ;;  %v2954_v36 = vrot.slane %v2940_v9, %v7383_v35  ;;  %v6085_v55 = vld [vmem:[#allocation7 + $0x34] ss:$8 sps:$4 sm:$0xff]   ;;  %v6107_v9 = vld [vmem:[#allocation7 + $0xb0] ss:$8 sps:$4 sm:$0xff]   ;;  %v6170_v46 = vld [vmem:[#allocation11 + $0x20] ss:$8 sps:$4 sm:$0xff]  }
 0x12c   : > { %v2965_v37 = vrot.slane %v2958_v21, %v7383_v35  ;;  %v2825_v32 = vcombine.low %v7518_v27, %v2824_v28  ;;  %v3226_v47 = vrot.slane %v3218_v29, %v7383_v35  ;;  %v7538_v51 = vrot.slane %v3202_v31, %v7383_v35  ;;  %v6110_v29 = vld [vmem:[#allocation7 + $0x180] ss:$8 sps:$4 sm:$0xff]  }
 0x12d   : > { %v2947_v19 = vrot.slane %v2939_v50, %v7383_v35  ;;  %v7507_v63 = vrot.slane %v2923_v6, %v7383_v35  ;;  %v3233_v50 = vrot.slane %v3219_v40, %v7383_v35  ;;  %v3244_v53 = vrot.slane %v3237_v42, %v7383_v35  ;;  %v6086_v6 = vld [vmem:[#allocation7 + $0x40] ss:$8 sps:$4 sm:$0xff]   ;;  %v6125_v40 = vld [vmem:[#allocation7 + $0x1d0] ss:$8 sps:$4 sm:$0xff]   ;;  %v6130_v42 = vld [vmem:[#allocation7 + $0x1e4] ss:$8 sps:$4 sm:$0xff]  }
 0x12e   : > { %v1019_v58 = vcombine.low %v7338_v43, %v7335_v41  ;;  %v6113_v41 = vld [vmem:[#allocation7 + $0x190] ss:$8 sps:$4 sm:$0xff]   ;;  %v6118_v43 = vld [vmem:[#allocation7 + $0x1a4] ss:$8 sps:$4 sm:$0xff]  }
 0x12f   : > { %v2955_v44 = vcombine.low %v2947_v19, %v2954_v36  ;;  %v2966_v30 = vcombine.low %v7507_v63, %v2965_v37  ;;  %v3234_v56 = vcombine.low %v3226_v47, %v3233_v50  ;;  %v3245_v59 = vcombine.low %v7538_v51, %v3244_v53  ;;  %v6103_v19 = vld [vmem:[#allocation7 + $0x94] ss:$8 sps:$4 sm:$0xff]   ;;  %v6119_v37 = vld [vmem:[#allocation7 + $0x1b0] ss:$8 sps:$4 sm:$0xff]   ;;  %v6134_v47 = vld [vmem:[#allocation7 + $0x200] ss:$8 sps:$4 sm:$0xff]  }
 0x130   : > { %v1026_v21 = vrot.slane %v1019_v58, %v7298_v5  ;;  %v6121_v36 = vld [vmem:[#allocation7 + $0x1b4] ss:$8 sps:$4 sm:$0xff]   ;;  %v6137_v50 = vld [vmem:[#allocation7 + $0x210] ss:$8 sps:$4 sm:$0xff]   ;;  %v6142_v53 = vld [vmem:[#allocation7 + $0x224] ss:$8 sps:$4 sm:$0xff]  }
 0x131   : > { %2956 = vrot.lane.b32.xlu1 %v2955_v44, %s6944_s18  ;;  %2967 = vrot.lane.b32.xlu0 %v2966_v30, %s6942_s22  ;;  %v6128_v44 = vld [vmem:[#allocation7 + $0x1e0] ss:$8 sps:$4 sm:$0xff]   ;;  %v6133_v30 = vld [vmem:[#allocation7 + $0x1f4] ss:$8 sps:$4 sm:$0xff]  }
 0x132   : > { %v1033_v31 = vrot.slane %v1026_v21, %v7298_v5  ;;  %v6166_v58 = vld [vmem:[#allocation11 + $0x4] ss:$8 sps:$4 sm:$0xff]  }
 0x133   : > { %v6172_v45 = vld [vmem:[#allocation11 + $0x24] ss:$8 sps:$4 sm:$0xff]  }
 0x135   : > { %2826 = vrot.lane.b32.xlu0 %v2825_v32, %s6942_s22  ;;  %v6136_v32 = vld [vmem:[#allocation7 + $0x204] ss:$8 sps:$4 sm:$0xff]  }
 0x139   : > { %3246 = vrot.lane.b32.xlu0 %v3245_v59, %s6942_s22  ;;  %v6148_v59 = vld [vmem:[#allocation11 + $0x60] ss:$8 sps:$4 sm:$0xff]  }
 0x183   : > { %v688_v26 = vpop.permute.xlu0 %687 }
 0x184   : > { %v691_v33 = vsel %vm576_vm4, %v7354_v1, %v688_v26  ;;  %v2814_v1 = vcombine.low %v2806_v52, %v2813_v61  ;;  %v6083_v52 = vld [vmem:[#allocation7 + $0x30] ss:$8 sps:$4 sm:$0xff]   ;;  %v6112_v26 = vld [vmem:[#allocation7 + $0x184] ss:$8 sps:$4 sm:$0xff]  }
 0x185   : > { %848 = vmatmul.mubr.bf16.vlgmr.msra.gmra.mrb[0].mxu0 %v691_v33  ;;  %v6101_v61 = vld [vmem:[#allocation7 + $0x90] ss:$8 sps:$4 sm:$0xff]   ;;  %v6115_v33 = vld [vmem:[#allocation7 + $0x194] ss:$8 sps:$4 sm:$0xff]  }
 0x186   : > { %979 = vmatpush1.bf16.msra.mxu0 %v6074_v18  ;;  %5492 = vmatprep.mubr.msk.bf16.mxu0 %vm576_vm4, %v7477_v16  ;;  %v6098_v18 = vld [vmem:[#allocation7 + $0x80] ss:$8 sps:$4 sm:$0xff]  }
 0x187   : > { %980 = vmatprep.subr.bf16.mxu0 %v6079_v62  ;;  %2815 = vrot.lane.b32.xlu1 %v2814_v1, %s6944_s18  ;;  %v6104_v62 = vld [vmem:[#allocation7 + $0xa0] ss:$8 sps:$4 sm:$0xff]   ;;  %v575_v22 = vpop.permute.xlu0 %574  ;;  %v6131_v1 = vld [vmem:[#allocation7 + $0x1f0] ss:$8 sps:$4 sm:$0xff]  }
 0x188   : > { %v579_v28 = vsel %vm576_vm4, %v7477_v16, %v575_v22  ;;  %v6124_v16 = vld [vmem:[#allocation7 + $0x1c4] ss:$8 sps:$4 sm:$0xff]  }
 0x18a   : > { %981 = vmatpush1.bf16.msra.mxu0 %v6077_v34  ;;  %v6116_v34 = vld [vmem:[#allocation7 + $0x1a0] ss:$8 sps:$4 sm:$0xff]  }
 0x18b   : > { %982 = vmatprep.subr.bf16.mxu0 %v6082_v39  ;;  %3235 = vrot.lane.b32.xlu1 %v3234_v56, %s6944_s18  ;;  %v6127_v39 = vld [vmem:[#allocation7 + $0x1d4] ss:$8 sps:$4 sm:$0xff]   ;;  %v6146_v56 = vld [vmem:[#allocation11 + $0x64] ss:$8 sps:$4 sm:$0xff]  }
 0x18c   : > { %3037 = vmatprep.subr.bf16.mxu1 %v6146_v56 }
 0x18d   : > { %3038 = vmatpush1.bf16.msra.mxu1 %v6148_v59 }
 0x18e   : > { %983 = vmatpush1.bf16.msra.mxu0 %v6080_v48  ;;  %v6139_v48 = vld [vmem:[#allocation7 + $0x214] ss:$8 sps:$4 sm:$0xff]  }
 0x18f   : > { %984 = vmatprep.subr.bf16.mxu0 %v6085_v55  ;;  %v6140_v55 = vld [vmem:[#allocation7 + $0x220] ss:$8 sps:$4 sm:$0xff]  }
 0x192   : > { %985 = vmatpush1.bf16.msra.mxu0 %v6083_v52  ;;  %v6145_v52 = vld [vmem:[#allocation7 + $0x234] ss:$8 sps:$4 sm:$0xff]  }
 0x193   : > { %986 = vmatprep.subr.bf16.mxu0 %v6088_v2  ;;  %v6149_v2 = vld [vmem:[#allocation11 + $0x74] ss:$8 sps:$4 sm:$0xff]  }
 0x194   : > { %3039 = vmatprep.subr.bf16.mxu1 %v6149_v2  ;;  %v6197_v2 = vld [vmem:[#allocation11 + $0x110] ss:$8 sps:$4 sm:$0xff]  }
 0x196   : > { %987 = vmatpush1.bf16.msra.mxu0 %v6086_v6  ;;  %v6143_v6 = vld [vmem:[#allocation7 + $0x230] ss:$8 sps:$4 sm:$0xff]  }
 0x197   : > { %988 = vmatprep.subr.bf16.mxu0 %v6091_v7  ;;  %v6151_v7 = vld [vmem:[#allocation11 + $0x70] ss:$8 sps:$4 sm:$0xff]  }
 0x198   : > { %3040 = vmatpush1.bf16.msra.mxu1 %v6151_v7 }
 0x19a   : > { %989 = vmatpush1.bf16.msra.mxu0 %v6089_v8  ;;  %v1050_v8 = vpop.permute.xlu1 %1049 }
 0x19b   : > { %990 = vmatprep.subr.bf16.mxu0 %v6094_v10  ;;  %v6152_v10 = vld [vmem:[#allocation11 + $0x84] ss:$8 sps:$4 sm:$0xff]  }
 0x19c   : > { %3041 = vmatprep.subr.bf16.mxu1 %v6152_v10  ;;  %v6203_v10 = vld [vmem:[#allocation10 + $0x10] ss:$8 sps:$4 sm:$0xff]  }
 0x19e   : > { %991 = vmatpush1.bf16.msra.mxu0 %v6092_v11  ;;  %v6945_v11 = vmov 0  }
 0x19f   : > { %992 = vmatprep.subr.bf16.mxu0 %v6097_v12  ;;  %3069 = vmatprep.mubr.bf16.mxu1 %v6945_v11  ;;  %v1053_v12 = vsel %vm576_vm4, %v1033_v31, %v1050_v8 }
 0x1a2   : > { %993 = vmatpush1.bf16.msra.mxu0 %v6095_v15  ;;  %v6154_v15 = vld [vmem:[#allocation11 + $0x80] ss:$8 sps:$4 sm:$0xff]  }
 0x1a3   : > { %994 = vmatprep.subr.bf16.mxu0 %v6100_v17  ;;  %v6155_v17 = vld [vmem:[#allocation11 + $0x94] ss:$8 sps:$4 sm:$0xff]   ;;  %3042 = vmatpush1.bf16.msra.mxu1 %v6154_v15  ;;  %v2957_v21 = vpop.permute.xlu1 %2956  ;;  %v2968_v22 = vpop.permute.xlu0 %2967  ;;  %v6206_v15 = vld [vmem:[#allocation10 + $0x20] ss:$8 sps:$4 sm:$0xff]  }
 0x1a4   : > { %3043 = vmatprep.subr.bf16.mxu1 %v6155_v17 }
 0x1a6   : > { %995 = vmatpush1.bf16.msra.mxu0 %v6098_v18  ;;  %v6157_v18 = vld [vmem:[#allocation11 + $0x90] ss:$8 sps:$4 sm:$0xff]  }
 0x1a7   : > { %996 = vmatprep.subr.bf16.mxu0 %v6103_v19  ;;  %v6158_v19 = vld [vmem:[#allocation11 + $0xa4] ss:$8 sps:$4 sm:$0xff]   ;;  %3044 = vmatpush1.bf16.msra.mxu1 %v6157_v18 }
 0x1a8   : > { %3045 = vmatprep.subr.bf16.mxu1 %v6158_v19  ;;  %v6211_v19 = vld [vmem:[#allocation10 + $0x404] ss:$8 sps:$4 sm:$0xff]  }
 0x1aa   : > { %997 = vmatpush1.bf16.msra.mxu0 %v6101_v61  ;;  %v6160_v61 = vld [vmem:[#allocation11 + $0xa0] ss:$8 sps:$4 sm:$0xff]  }
 0x1ab   : > { %998 = vmatprep.subr.bf16.mxu0 %v6106_v60  ;;  %v6161_v60 = vld [vmem:[#allocation11 + $0xb4] ss:$8 sps:$4 sm:$0xff]   ;;  %3046 = vmatpush1.bf16.msra.mxu1 %v6160_v61  ;;  %v6209_v61 = vld [vmem:[#allocation10 + $0x400] ss:$8 sps:$4 sm:$0xff]  }
 0x1ac   : > { %3047 = vmatprep.subr.bf16.mxu1 %v6161_v60  ;;  %v6214_v60 = vld [vmem:[#allocation10 + $0x34] ss:$8 sps:$4 sm:$0xff]  }
 0x1ae   : > { %999 = vmatpush1.bf16.msra.mxu0 %v6104_v62  ;;  %v6163_v62 = vld [vmem:[#allocation11 + $0xb0] ss:$8 sps:$4 sm:$0xff]  }
 0x1af   : > { %1000 = vmatprep.subr.bf16.mxu0 %v6109_v4  ;;  %3048 = vmatpush1.bf16.msra.mxu1 %v6163_v62  ;;  %v2930_v4 = vrot.slane %v2922_v49, %v7383_v35  ;;  %v6175_v49 = vld [vmem:[#allocation11 + $0x34] ss:$8 sps:$4 sm:$0xff]   ;;  %v6212_v62 = vld [vmem:[#allocation10 + $0x30] ss:$8 sps:$4 sm:$0xff]  }
 0x1b0   : > { %3142 = vmatprep.subr.bf16.mxu1 %v6166_v58  ;;  %v6217_v58 = vld [vmem:[#allocation10 + $0x414] ss:$8 sps:$4 sm:$0xff]  }
 0x1b2   : > { %1001 = vmatpush1.bf16.msra.mxu0 %v6107_v9  ;;  %v2938_v9 = vcombine.low %v2930_v4, %v7507_v63  ;;  %v6173_v63 = vld [vmem:[#allocation11 + $0x30] ss:$8 sps:$4 sm:$0xff]  }
 0x1b3   : > { %1177 = vmatprep.subr.bf16.mxu0 %v6112_v26  ;;  %v6164_v26 = vld [vmem:[#allocation11] ss:$8 sps:$4 sm:$0xff]   ;;  %v6215_v4 = vld [vmem:[#allocation10 + $0x410] ss:$8 sps:$4 sm:$0xff]  }
 0x1b5   : > { %1011 = vmatmul.mubr.bf16.vlgmr.msra.gmra.mrb[4].mxu0 %v579_v28  ;;  %v2971_v28 = vsel %vm2828_vm10, %v2938_v9, %v2957_v21  ;;  %v6220_v9 = vld [vmem:[#allocation10 + $0x44] ss:$8 sps:$4 sm:$0xff]   ;;  %v6218_v21 = vld [vmem:[#allocation10 + $0x40] ss:$8 sps:$4 sm:$0xff]  }
 0x1b6   : > { %1178 = vmatpush1.bf16.msra.mxu0 %v6110_v29  ;;  %5517 = vmatprep.mubr.msk.bf16.mxu0 %vm576_vm4, %v1033_v31  ;;  %v6169_v29 = vld [vmem:[#allocation11 + $0x14] ss:$8 sps:$4 sm:$0xff]   ;;  %v2973_v31 = vsel %vm576_vm4, %v2971_v28, %v2968_v22  ;;  %v6223_v22 = vld [vmem:[#allocation10 + $0x424] ss:$8 sps:$4 sm:$0xff]  }
 0x1b7   : > { %1179 = vmatprep.subr.bf16.mxu0 %v6115_v33  ;;  %5545 = vmatmul.mubr.msk.bf16.vlgmr.msra.gmra.mrb[0].mxu1 %vm3034_vm11, %v2973_v31  ;;  %v6167_v33 = vld [vmem:[#allocation11 + $0x10] ss:$8 sps:$4 sm:$0xff]   ;;  %v6226_v28 = vld [vmem:[#allocation10 + $0x54] ss:$8 sps:$4 sm:$0xff]  }
 0x1b8   : > { %3143 = vmatpush1.bf16.msra.mxu1 %v6164_v26  ;;  %3174 = vmatprep.mubr.bf16.mxu1 %v6945_v11  ;;  %v6221_v26 = vld [vmem:[#allocation10 + $0x420] ss:$8 sps:$4 sm:$0xff]   ;;  %v6229_v31 = vld [vmem:[#allocation10 + $0x434] ss:$8 sps:$4 sm:$0xff]  }
 0x1b9   : > { %3144 = vmatprep.subr.bf16.mxu1 %v6169_v29  ;;  %v6224_v29 = vld [vmem:[#allocation10 + $0x50] ss:$8 sps:$4 sm:$0xff]  }
 0x1ba   : > { %1180 = vmatpush1.bf16.msra.mxu0 %v6113_v41  ;;  %v6178_v41 = vld [vmem:[#allocation11 + $0x44] ss:$8 sps:$4 sm:$0xff]  }
 0x1bb   : > { %1181 = vmatprep.subr.bf16.mxu0 %v6118_v43  ;;  %v2780_v43 = vcombine.low %v7404_v57, %v7391_v54  ;;  %v6182_v54 = vld [vmem:[#allocation11 + $0xc0] ss:$8 sps:$4 sm:$0xff]   ;;  %v6187_v57 = vld [vmem:[#allocation11 + $0xd4] ss:$8 sps:$4 sm:$0xff]  }
 0x1bc   : > { %3145 = vmatpush1.bf16.msra.mxu1 %v6167_v33  ;;  %v6227_v33 = vld [vmem:[#allocation10 + $0x430] ss:$8 sps:$4 sm:$0xff]  }
 0x1bd   : > { %3146 = vmatprep.subr.bf16.mxu1 %v6172_v45  ;;  %v6232_v45 = vld [vmem:[#allocation10 + $0x64] ss:$8 sps:$4 sm:$0xff]  }
 0x1be   : > { %1182 = vmatpush1.bf16.msra.mxu0 %v6116_v34  ;;  %v2788_v34 = vrot.slane %v2780_v43, %v7383_v35  ;;  %v6236_v43 = vld [vmem:[#allocation10 + $0x70] ss:$8 sps:$4 sm:$0xff]  }
 0x1bf   : > { %1183 = vmatprep.subr.bf16.mxu0 %v6121_v36  ;;  %v6176_v36 = vld [vmem:[#allocation11 + $0x40] ss:$8 sps:$4 sm:$0xff]  }
 0x1c0   : > { %3147 = vmatpush1.bf16.msra.mxu1 %v6170_v46  ;;  %v6230_v46 = vld [vmem:[#allocation10 + $0x60] ss:$8 sps:$4 sm:$0xff]  }
 0x1c1   : > { %3148 = vmatprep.subr.bf16.mxu1 %v6175_v49  ;;  %v6235_v49 = vld [vmem:[#allocation10 + $0x444] ss:$8 sps:$4 sm:$0xff]  }
 0x1c2   : > { %1184 = vmatpush1.bf16.msra.mxu0 %v6119_v37  ;;  %v6181_v37 = vld [vmem:[#allocation11 + $0x54] ss:$8 sps:$4 sm:$0xff]  }
 0x1c3   : > { %1185 = vmatprep.subr.bf16.mxu0 %v6124_v16  ;;  %v2796_v16 = vcombine.low %v2788_v34, %v7518_v27  ;;  %v6190_v27 = vld [vmem:[#allocation11 + $0xe4] ss:$8 sps:$4 sm:$0xff]   ;;  %v6241_v34 = vld [vmem:[#allocation10 + $0x454] ss:$8 sps:$4 sm:$0xff]  }
 0x1c4   : > { %3149 = vmatpush1.bf16.msra.mxu1 %v6173_v63  ;;  %v6233_v63 = vld [vmem:[#allocation10 + $0x440] ss:$8 sps:$4 sm:$0xff]  }
 0x1c5   : > { %3150 = vmatprep.subr.bf16.mxu1 %v6178_v41  ;;  %v6238_v41 = vld [vmem:[#allocation10 + $0x74] ss:$8 sps:$4 sm:$0xff]  }
 0x1c6   : > { %1186 = vmatpush1.bf16.msra.mxu0 %v6122_v38 }
 0x1c7   : > { %1187 = vmatprep.subr.bf16.mxu0 %v6127_v39  ;;  %v6179_v39 = vld [vmem:[#allocation11 + $0x50] ss:$8 sps:$4 sm:$0xff]  }
 0x1c8   : > { %3151 = vmatpush1.bf16.msra.mxu1 %v6176_v36  ;;  %v6239_v36 = vld [vmem:[#allocation10 + $0x450] ss:$8 sps:$4 sm:$0xff]  }
 0x1c9   : > { %3152 = vmatprep.subr.bf16.mxu1 %v6181_v37  ;;  %v6244_v37 = vld [vmem:[#allocation10 + $0x84] ss:$8 sps:$4 sm:$0xff]  }
 0x1ca   : > { %1188 = vmatpush1.bf16.msra.mxu0 %v6125_v40 }
 0x1cb   : > { %1189 = vmatprep.subr.bf16.mxu0 %v6130_v42  ;;  %v2827_v42 = vpop.permute.xlu0 %2826 }
 0x1cc   : > { %3153 = vmatpush1.bf16.msra.mxu1 %v6179_v39  ;;  %v6245_v39 = vld [vmem:[#allocation10 + $0x460] ss:$8 sps:$4 sm:$0xff]  }
 0x1ce   : > { %1190 = vmatpush1.bf16.msra.mxu0 %v6128_v44  ;;  %v6184_v44 = vld [vmem:[#allocation11 + $0xc4] ss:$8 sps:$4 sm:$0xff]  }
 0x1cf   : > { %1191 = vmatprep.subr.bf16.mxu0 %v6133_v30  ;;  %3315 = vmatprep.subr.bf16.mxu1 %v6184_v44  ;;  %v3247_v7 = vpop.permute.xlu0 %3246  ;;  %v6253_v44 = vld [vmem:[#allocation10 + $0x474] ss:$8 sps:$4 sm:$0xff]  }
 0x1d2   : > { %1192 = vmatpush1.bf16.msra.mxu0 %v6131_v1  ;;  %v6185_v1 = vld [vmem:[#allocation11 + $0xd0] ss:$8 sps:$4 sm:$0xff]  }
 0x1d3   : > { %1193 = vmatprep.subr.bf16.mxu0 %v6136_v32  ;;  %v6188_v32 = vld [vmem:[#allocation11 + $0xe0] ss:$8 sps:$4 sm:$0xff]  }
 0x1d6   : > { %1194 = vmatpush1.bf16.msra.mxu0 %v6134_v47  ;;  %v6193_v47 = vld [vmem:[#allocation11 + $0xf4] ss:$8 sps:$4 sm:$0xff]  }
 0x1d7   : > { %1195 = vmatprep.subr.bf16.mxu0 %v6139_v48  ;;  %v6191_v48 = vld [vmem:[#allocation11 + $0xf0] ss:$8 sps:$4 sm:$0xff]  }
 0x1da   : > { %1196 = vmatpush1.bf16.msra.mxu0 %v6137_v50  ;;  %v6196_v50 = vld [vmem:[#allocation11 + $0x104] ss:$8 sps:$4 sm:$0xff]  }
 0x1db   : > { %1197 = vmatprep.subr.bf16.mxu0 %v6142_v53  ;;  %v3209_v53 = vrot.slane %v3201_v24, %v7383_v35  ;;  %v6205_v24 = vld [vmem:[#allocation10 + $0x14] ss:$8 sps:$4 sm:$0xff]  }
 0x1dd   : > { %v3217_v56 = vcombine.low %v3209_v53, %v7538_v51  ;;  %v6266_v53 = vld [vmem:[#allocation10 + $0xc0] ss:$8 sps:$4 sm:$0xff]  }
 0x1de   : > { %1198 = vmatpush1.bf16.msra.mxu0 %v6140_v55  ;;  %v6194_v55 = vld [vmem:[#allocation11 + $0x100] ss:$8 sps:$4 sm:$0xff]  }
 0x1df   : > { %1199 = vmatprep.subr.bf16.mxu0 %v6145_v52  ;;  %v6199_v52 = vld [vmem:[#allocation11 + $0x114] ss:$8 sps:$4 sm:$0xff]  }
 0x1e2   : > { %1200 = vmatpush1.bf16.msra.mxu0 %v6143_v6 }
 0x1e3   : > { %4802 = vmatprep.subr.bf16.mxu0 %v6202_v20  ;;  %v6278_v20 = vld [vmem:[#allocation10 + $0xe0] ss:$8 sps:$4 sm:$0xff]  }
 0x1e5   : > { %1210 = vmatmul.mubr.bf16.vlgmr.msra.gmra.mrb[8].mxu0 %v1053_v12 }
 0x1e6   : > { %4803 = vmatpush1.bf16.msra.mxu0 %v6200_v0  ;;  %v6283_v0 = vld [vmem:[#allocation10 + $0x4c4] ss:$8 sps:$4 sm:$0xff]  }
 0x1e7   : > { %4804 = vmatprep.subr.bf16.mxu0 %v6205_v24 }
 0x1ea   : > { %4805 = vmatpush1.bf16.msra.mxu0 %v6203_v10  ;;  %v6286_v10 = vld [vmem:[#allocation10 + $0xf4] ss:$8 sps:$4 sm:$0xff]  }
 0x1f9   : > { %v2816_v38 = vpop.permute.xlu1 %2815 }
 0x1fa   : > { %v2831_v40 = vsel %vm2828_vm10, %v2796_v16, %v2816_v38  ;;  %v6242_v16 = vld [vmem:[#allocation10 + $0x80] ss:$8 sps:$4 sm:$0xff]   ;;  %v6247_v38 = vld [vmem:[#allocation10 + $0x464] ss:$8 sps:$4 sm:$0xff]  }
 0x1fb   : > { %v2833_v30 = vsel %vm576_vm4, %v2831_v40, %v2827_v42  ;;  %v6250_v40 = vld [vmem:[#allocation10 + $0x94] ss:$8 sps:$4 sm:$0xff]   ;;  %v6248_v42 = vld [vmem:[#allocation10 + $0x90] ss:$8 sps:$4 sm:$0xff]  }
 0x1fc   : > { %5558 = vmatmul.mubr.msk.bf16.vlgmr.msra.gmra.mrb[0].mxu1 %vm3034_vm11, %v2833_v30  ;;  %v6251_v30 = vld [vmem:[#allocation10 + $0x470] ss:$8 sps:$4 sm:$0xff]  }
 0x1fd   : > { %3316 = vmatpush1.bf16.msra.mxu1 %v6182_v54  ;;  %3347 = vmatprep.mubr.bf16.mxu1 %v6945_v11  ;;  %v3236_v59 = vpop.permute.xlu1 %3235  ;;  %v6208_v11 = vld [vmem:[#allocation10 + $0x24] ss:$8 sps:$4 sm:$0xff]  }
 0x1fe   : > { %3317 = vmatprep.subr.bf16.mxu1 %v6187_v57  ;;  %v3250_v6 = vsel %vm2828_vm10, %v3217_v56, %v3236_v59  ;;  %4806 = vmatprep.subr.bf16.mxu0 %v6208_v11  ;;  %v6256_v54 = vld [vmem:[#allocation10 + $0xa4] ss:$8 sps:$4 sm:$0xff]   ;;  %v6254_v57 = vld [vmem:[#allocation10 + $0xa0] ss:$8 sps:$4 sm:$0xff]   ;;  %v6274_v56 = vld [vmem:[#allocation10 + $0xd4] ss:$8 sps:$4 sm:$0xff]  }
 0x1ff   : > { %v3252_v8 = vsel %vm576_vm4, %v3250_v6, %v3247_v7  ;;  %4807 = vmatpush1.bf16.msra.mxu0 %v6206_v15  ;;  %v6269_v59 = vld [vmem:[#allocation10 + $0x4a0] ss:$8 sps:$4 sm:$0xff]   ;;  %v6277_v6 = vld [vmem:[#allocation10 + $0x4b4] ss:$8 sps:$4 sm:$0xff]   ;;  %v6280_v7 = vld [vmem:[#allocation10 + $0xe4] ss:$8 sps:$4 sm:$0xff]  }
 0x200   : > { %4808 = vmatprep.subr.bf16.mxu0 %v6214_v60  ;;  %v6284_v60 = vld [vmem:[#allocation10 + $0xf0] ss:$8 sps:$4 sm:$0xff]  }
 0x201   : > { %3318 = vmatpush1.bf16.msra.mxu1 %v6185_v1  ;;  %v6259_v1 = vld [vmem:[#allocation10 + $0x484] ss:$8 sps:$4 sm:$0xff]  }
 0x202   : > { %3319 = vmatprep.subr.bf16.mxu1 %v6190_v27  ;;  %v6257_v27 = vld [vmem:[#allocation10 + $0x480] ss:$8 sps:$4 sm:$0xff]  }
 0x203   : > { %4809 = vmatpush1.bf16.msra.mxu0 %v6212_v62  ;;  %v6289_v62 = vld [vmem:[#allocation10 + $0x4d4] ss:$8 sps:$4 sm:$0xff]  }
 0x204   : > { %4810 = vmatprep.subr.bf16.mxu0 %v6220_v9  ;;  %v6295_v9 = vld [vmem:[#allocation10 + $0x4e4] ss:$8 sps:$4 sm:$0xff]  }
 0x205   : > { %3320 = vmatpush1.bf16.msra.mxu1 %v6188_v32  ;;  %v6262_v32 = vld [vmem:[#allocation10 + $0xb4] ss:$8 sps:$4 sm:$0xff]  }
 0x206   : > { %3321 = vmatprep.subr.bf16.mxu1 %v6193_v47  ;;  %v6260_v47 = vld [vmem:[#allocation10 + $0xb0] ss:$8 sps:$4 sm:$0xff]  }
 0x207   : > { %4811 = vmatpush1.bf16.msra.mxu0 %v6218_v21  ;;  %v6301_v21 = vld [vmem:[#allocation10 + $0x4f4] ss:$8 sps:$4 sm:$0xff]  }
 0x208   : > { %4812 = vmatprep.subr.bf16.mxu0 %v6226_v28  ;;  %v1220_v28 = vld [vmem:[#allocation8] sm:$0x3] }
 0x209   : > { %3322 = vmatpush1.bf16.msra.mxu1 %v6191_v48  ;;  %v6263_v48 = vld [vmem:[#allocation10 + $0x490] ss:$8 sps:$4 sm:$0xff]  }
 0x20a   : > { %3323 = vmatprep.subr.bf16.mxu1 %v6196_v50  ;;  %v6265_v50 = vld [vmem:[#allocation10 + $0x494] ss:$8 sps:$4 sm:$0xff]  }
 0x20b   : > { %4813 = vmatpush1.bf16.msra.mxu0 %v6224_v29  ;;  %v7588_v29 = vsub.s32 1, %v7295_v3 }
 0x20c   : > { %4814 = vmatprep.subr.bf16.mxu0 %v6232_v45 }
 0x20d   : > { %3324 = vmatpush1.bf16.msra.mxu1 %v6194_v55  ;;  %v6268_v55 = vld [vmem:[#allocation10 + $0xc4] ss:$8 sps:$4 sm:$0xff]   ;;  %v1229_v45 = vrot.slane %v1220_v28, %v7588_v29 }
 0x20e   : > { %3325 = vmatprep.subr.bf16.mxu1 %v6199_v52  ;;  %v6271_v52 = vld [vmem:[#allocation10 + $0x4a4] ss:$8 sps:$4 sm:$0xff]  }
 0x20f   : > { %4815 = vmatpush1.bf16.msra.mxu0 %v6230_v46 }
 0x210   : > { %4816 = vmatprep.subr.bf16.mxu0 %v6238_v41 }
 0x211   : > { %3326 = vmatpush1.bf16.msra.mxu1 %v6197_v2  ;;  %v6272_v2 = vld [vmem:[#allocation10 + $0xd0] ss:$8 sps:$4 sm:$0xff]  }
 0x212   : > { %4974 = vmatprep.subr.bf16.mxu1 %v6211_v19  ;;  %v6281_v19 = vld [vmem:[#allocation10 + $0x4c0] ss:$8 sps:$4 sm:$0xff]  }
 0x213   : > { %4817 = vmatpush1.bf16.msra.mxu0 %v6236_v43 }
 0x214   : > { %5575 = vmatmul.mubr.msk.bf16.vlgmr.msra.gmra.mrb[0].mxu1 %vm3034_vm11, %v3252_v8  ;;  %4818 = vmatprep.subr.bf16.mxu0 %v6244_v37  ;;  %v6275_v8 = vld [vmem:[#allocation10 + $0x4b0] ss:$8 sps:$4 sm:$0xff]  }
 0x215   : > { %4975 = vmatpush1.bf16.msra.mxu1 %v6209_v61 }
 0x216   : > { %4976 = vmatprep.subr.bf16.mxu1 %v6217_v58  ;;  %v6287_v58 = vld [vmem:[#allocation10 + $0x4d0] ss:$8 sps:$4 sm:$0xff]  }
 0x217   : > { %4819 = vmatpush1.bf16.msra.mxu0 %v6242_v16 }
 0x218   : > { %4820 = vmatprep.subr.bf16.mxu0 %v6250_v40 }
 0x219   : > { %4977 = vmatpush1.bf16.msra.mxu1 %v6215_v4  ;;  %v6292_v4 = vld [vmem:[#allocation10 + $0x104] ss:$8 sps:$4 sm:$0xff]  }
 0x21a   : > { %4978 = vmatprep.subr.bf16.mxu1 %v6223_v22  ;;  %v6307_v22 = vld [vmem:[#allocation10 + $0x504] ss:$8 sps:$4 sm:$0xff]  }
 0x21b   : > { %4821 = vmatpush1.bf16.msra.mxu0 %v6248_v42 }
 0x21c   : > { %4822 = vmatprep.subr.bf16.mxu0 %v6256_v54 }
 0x21d   : > { %4979 = vmatpush1.bf16.msra.mxu1 %v6221_v26  ;;  %v7585_v26 = vsub.s32 0, %v7295_v3 }
 0x21e   : > { %4980 = vmatprep.subr.bf16.mxu1 %v6229_v31 }
 0x21f   : > { %4823 = vmatpush1.bf16.msra.mxu0 %v6254_v57  ;;  %v1225_v31 = vrot.slane %v1220_v28, %v7585_v26 }
 0x220   : > { %4824 = vmatprep.subr.bf16.mxu0 %v6262_v32 }
 0x221   : > { %4981 = vmatpush1.bf16.msra.mxu1 %v6227_v33 }
 0x222   : > { %4982 = vmatprep.subr.bf16.mxu1 %v6235_v49 }
 0x223   : > { %4825 = vmatpush1.bf16.msra.mxu0 %v6260_v47 }
 0x224   : > { %4826 = vmatprep.subr.bf16.mxu0 %v6268_v55 }
 0x225   : > { %4983 = vmatpush1.bf16.msra.mxu1 %v6233_v63 }
 0x226   : > { %4984 = vmatprep.subr.bf16.mxu1 %v6241_v34 }
 0x227   : > { %4827 = vmatpush1.bf16.msra.mxu0 %v6266_v53 }
 0x228   : > { %4828 = vmatprep.subr.bf16.mxu0 %v6274_v56 }
 0x229   : > { %4985 = vmatpush1.bf16.msra.mxu1 %v6239_v36 }
 0x22a   : > { %4986 = vmatprep.subr.bf16.mxu1 %v6247_v38 }
 0x22b   : > { %4829 = vmatpush1.bf16.msra.mxu0 %v6272_v2 }
 0x22c   : > { %4830 = vmatprep.subr.bf16.mxu0 %v6280_v7 }
 0x22d   : > { %4987 = vmatpush1.bf16.msra.mxu1 %v6245_v39 }
 0x22e   : > { %4988 = vmatprep.subr.bf16.mxu1 %v6253_v44 }
 0x22f   : > { %4831 = vmatpush1.bf16.msra.mxu0 %v6278_v20 }
 0x230   : > { %4832 = vmatprep.subr.bf16.mxu0 %v6286_v10 }
 0x231   : > { %4989 = vmatpush1.bf16.msra.mxu1 %v6251_v30 }
 0x232   : > { %4990 = vmatprep.subr.bf16.mxu1 %v6259_v1 }
 0x233   : > { %4833 = vmatpush1.bf16.msra.mxu0 %v6284_v60 }
 0x234   : > { %4845 = vmatprep.subr.bf16.mxu0 %v6292_v4 }
 0x235   : > { %4991 = vmatpush1.bf16.msra.mxu1 %v6257_v27 }
 0x236   : > { %4992 = vmatprep.subr.bf16.mxu1 %v6265_v50 }
 0x239   : > { %4993 = vmatpush1.bf16.msra.mxu1 %v6263_v48 }
 0x23a   : > { %4994 = vmatprep.subr.bf16.mxu1 %v6271_v52 }
 0x23d   : > { %4995 = vmatpush1.bf16.msra.mxu1 %v6269_v59 }
 0x23e   : > { %4996 = vmatprep.subr.bf16.mxu1 %v6277_v6 }
 0x241   : > { %4997 = vmatpush1.bf16.msra.mxu1 %v6275_v8 }
 0x242   : > { %4998 = vmatprep.subr.bf16.mxu1 %v6283_v0 }
 0x245   : > { %4999 = vmatpush1.bf16.msra.mxu1 %v6281_v19 }
 0x246   : > { %5000 = vmatprep.subr.bf16.mxu1 %v6289_v62 }
 0x249   : > { %5001 = vmatpush1.bf16.msra.mxu1 %v6287_v58 }
 0x24a   : > { %5002 = vmatprep.subr.bf16.mxu1 %v6295_v9 }
 0x258   : > { %v7578_v51 = vpop.f32.mrb[0].mxu0 }
 0x259   : > { %v7580_v12 = vpop.f32.mrb[1].mxu0 }
 0x25a   : > { %v853_v17 = vpop.f32.mrb[2].mxu0 }
 0x25b   : > { %v854_v18 = vpop.f32.mrb[3].mxu0 }
 0x288   : > { %v1012_v24 = vpop.f32.mrb[4].mxu0 }
 0x289   : > { %v1013_v11 = vadd.f32 %v1012_v24, %v7578_v51  ;;  %v1014_v15 = vpop.f32.mrb[5].mxu0  ;;  %v6293_v51 = vld [vmem:[#allocation10 + $0x4e0] ss:$8 sps:$4 sm:$0xff]  }
 0x28a   : > { %v1015_v17 = vadd.f32 %v1014_v15, %v7580_v12  ;;  %v1016_v18 = vpop.f32.mrb[6].mxu0  ;;  %5003 = vmatpush1.bf16.msra.mxu1 %v6293_v51  ;;  %v6299_v12 = vld [vmem:[#allocation10 + $0x4f0] ss:$8 sps:$4 sm:$0xff]  }
 0x28b   : > { %v1017_v61 = vpop.f32.mrb[7].mxu0  ;;  %5004 = vmatprep.subr.bf16.mxu1 %v6301_v21 }
 0x28e   : > { %5005 = vmatpush1.bf16.msra.mxu1 %v6299_v12 }
 0x28f   : > { %5017 = vmatprep.subr.bf16.mxu1 %v6307_v22 }
 0x2b8   : > { %v1211_v33 = vpop.f32.mrb[8].mxu0 }
 0x2b9   : > { %v1218_v46 = vadd.f32 %v1211_v33, %v1013_v11  ;;  %v1213_v49 = vpop.f32.mrb[9].mxu0 }
 0x2ba   : > { %v1219_v63 = vadd.f32 %v1213_v49, %v1015_v17  ;;  %v1215_v41 = vpop.f32.mrb[10].mxu0 }
 0x2bb   : > { %v1232_v43 = vadd.f32 %v1225_v31, %v1218_v46  ;;  %v1216_v34 = vpop.f32.mrb[11].mxu0 }
 0x2bc   : > { %v1233_v36 = vadd.f32 %v1229_v45, %v1219_v63 }
 0x2bd   : > { %v1236_v37 = vmin.f32 %v1232_v43, 0.0  ;;  %vm1234_vm4 = vcmp.gt.f32.partialorder %v1232_v43, 0.0 }
 0x2be   : > { %v1237_v16 = vmin.f32 %v1233_v36, 0.0  ;;  %vm1235_vm12 = vcmp.gt.f32.partialorder %v1233_v36, 0.0 }
 0x2bf   : > { %v1238_v38 = vmul.f32 1.442695, %v1236_v37 }
 0x2c0   : > { %v1240_v39 = vmul.f32 1.442695, %v1237_v16 }
 0x2c1   : > { %6632 = vpow2.f32 %v1238_v38 }
 0x2c2   : > { %6634 = vpow2.f32 %v1240_v39 }
 0x2cb   : > { %v6633_v3 = vpop.eup %6632 }
 0x2cc   : > { %v6635_v40 = vpop.eup %6634  ;;  %v5518_v42 = vadd.f32 -1.0, %v6633_v3 }
 0x2cd   : > { %v5519_v44 = vadd.f32 -1.0, %v6635_v40 }
 0x2ce   : > { %v1244_v30 = vsel %vm1234_vm4, %v1232_v43, %v5518_v42 }
 0x2cf   : > { %v1245_v54 = vsel %vm1235_vm12, %v1233_v36, %v5519_v44 }
 0x2d0   : > { %v5520_v57 = vpack.c.bf16 %v1245_v54, %v1244_v30 }
 0x2d2   : > { %v1257_v1 = vrot.slane %v5520_v57, %v7298_v5 }
 0x2d4   : > { %v1258_v27 = vcombine.high %v1257_v1, %v1257_v1  ;;  %v1265_v32 = vrot.slane %v1257_v1, %v7298_v5 }
 0x2d6   : > { %v1272_v47 = vrot.slane %v1258_v27, %v7298_v5  ;;  %v1279_v48 = vrot.slane %v1265_v32, %v7298_v5  ;;  %v1317_v50 = vcombine.low %v1265_v32, %v1265_v32 }
 0x2d8   : > { %v1280_v53 = vcombine.high %v1279_v48, %v1279_v48  ;;  %v1301_v55 = vrot.slane %v1272_v47, %v7298_v5  ;;  %v1324_v52 = vrot.slane %v1317_v50, %v7298_v5  ;;  %v1340_v56 = vcombine.low %v1272_v47, %v1272_v47 }
 0x2d9   : > { %v1287_v8 = vrot.slane %v1279_v48, %v7298_v5 }
 0x2da   : > { %v1325_v59 = vcombine.high %v1324_v52, %v1324_v52  ;;  %v1302_v2 = vcombine.high %v1301_v55, %v1301_v55  ;;  %v1332_v6 = vrot.slane %v1324_v52, %v7298_v5  ;;  %v1347_v7 = vrot.slane %v1340_v56, %v7298_v5 }
 0x2db   : > { %v1294_v20 = vrot.slane %v1280_v53, %v7298_v5  ;;  %v1309_v17 = vrot.slane %v1301_v55, %v7298_v5 }
 0x2dc   : > { %v1339_v0 = vrot.slane %v1325_v59, %v7298_v5  ;;  %v1348_v24 = vcombine.high %v1347_v7, %v1347_v7  ;;  %v1355_v10 = vrot.slane %v1347_v7, %v7298_v5  ;;  %v1366_v11 = vsel %vm532_vm5, %v1287_v8, %v1332_v6 }
 0x2dd   : > { %v1316_v18 = vrot.slane %v1302_v2, %v7298_v5 }
 0x2de   : > { %v1369_v15 = vsel %vm532_vm5, %v1294_v20, %v1339_v0  ;;  %v1362_v19 = vrot.slane %v1348_v24, %v7298_v5  ;;  %v1372_v60 = vsel %vm532_vm5, %v1309_v17, %v1355_v10 }
 0x2df   : > { %v1380_v61 = vcombine.low %v1366_v11, %v1369_v15 }
 0x2e0   : > { %v1375_v62 = vsel %vm532_vm5, %v1316_v18, %v1362_v19 }
 0x2e1   : > { %v1387_v58 = vrot.slane %v1380_v61, %v7298_v5  ;;  %v1403_v4 = vcombine.low %v1372_v60, %v1375_v62 }
 0x2e3   : > { %v1388_v51 = vcombine.high %v1387_v58, %v1387_v58  ;;  %v1395_v9 = vrot.slane %v1387_v58, %v7298_v5  ;;  %v1410_v21 = vrot.slane %v1403_v4, %v7298_v5 }
 0x2e5   : > { %v1402_v12 = vrot.slane %v1388_v51, %v7298_v5  ;;  %v1427_v22 = vunpack.i.h.s16 %v1395_v9  ;;  %v5521_v28 = vpack.i.b16 %v1395_v9, %v1395_v9  ;;  %v1411_v31 = vcombine.high %v1410_v21, %v1410_v21 }
 0x2e6   : > { %v1418_v33 = vrot.slane %v1410_v21, %v7298_v5 }
 0x2e7   : > { %v1429_v45 = vunpack.i.h.s16 %v1402_v12  ;;  %v1435_v46 = vpack.i.b16 %v1427_v22, %v1427_v22  ;;  %v5522_v49 = vpack.i.b16 %v1402_v12, %v1402_v12  ;;  %v1445_v63 = vrot.slane %v5521_v28, %v7585_v26 }
 0x2e8   : > { %v1425_v41 = vrot.slane %v1411_v31, %v7298_v5  ;;  %v1431_v43 = vunpack.i.h.s16 %v1418_v33  ;;  %v5523_v34 = vpack.i.b16 %v1418_v33, %v1418_v33  ;;  %v1449_v36 = vrot.slane %v5521_v28, %v7588_v29 }
 0x2e9   : > { %v1437_v37 = vpack.i.b16 %v1429_v45, %v1429_v45  ;;  %v1453_v16 = vrot.slane %v1435_v46, %v7585_v26  ;;  %v1457_v38 = vrot.slane %v1435_v46, %v7588_v29  ;;  %v1461_v39 = vrot.slane %v5522_v49, %v7585_v26 }
 0x2ea   : > { %v1433_v3 = vunpack.i.h.s16 %v1425_v41  ;;  %v1439_v40 = vpack.i.b16 %v1431_v43, %v1431_v43  ;;  %v5524_v42 = vpack.i.b16 %v1425_v41, %v1425_v41  ;;  %v1465_v44 = vrot.slane %v5522_v49, %v7588_v29 }
 0x2eb   : > { %v1469_v30 = vrot.slane %v1437_v37, %v7585_v26  ;;  %v1473_v54 = vrot.slane %v1437_v37, %v7588_v29  ;;  %v1477_v57 = vrot.slane %v5523_v34, %v7585_v26  ;;  %v1481_v1 = vrot.slane %v5523_v34, %v7588_v29 }
 0x2ec   : > { %v1441_v27 = vpack.i.b16 %v1433_v3, %v1433_v3  ;;  %v1485_v32 = vrot.slane %v1439_v40, %v7585_v26  ;;  %v1489_v47 = vrot.slane %v1439_v40, %v7588_v29  ;;  %v1493_v48 = vrot.slane %v5524_v42, %v7585_v26 }
 0x2ed   : > { %v1497_v50 = vrot.slane %v5524_v42, %v7588_v29  ;;  %v1538_v53 = vcombine.low %v1445_v63, %v1449_v36  ;;  %v1553_v55 = vcombine.low %v1453_v16, %v1457_v38  ;;  %v1568_v52 = vcombine.low %v1461_v39, %v1465_v44 }
 0x2ee   : > { %v1501_v56 = vrot.slane %v1441_v27, %v7585_v26  ;;  %v1505_v59 = vrot.slane %v1441_v27, %v7588_v29  ;;  %v1583_v2 = vcombine.low %v1469_v30, %v1473_v54  ;;  %v1598_v6 = vcombine.low %v1477_v57, %v1481_v1 }
 0x2ef   : > { %v1545_v7 = vrot.slane %v1538_v53, %v7298_v5  ;;  %v1560_v8 = vrot.slane %v1553_v55, %v7298_v5  ;;  %v1575_v20 = vrot.slane %v1568_v52, %v7298_v5  ;;  %v1613_v0 = vcombine.low %v1485_v32, %v1489_v47 }
 0x2f0   : > { %v1590_v24 = vrot.slane %v1583_v2, %v7298_v5  ;;  %v1605_v10 = vrot.slane %v1598_v6, %v7298_v5  ;;  %v1628_v11 = vcombine.low %v1493_v48, %v1497_v50  ;;  %v7638_v15 = vcombine.low %v1501_v56, %v1505_v59 }
 0x2f1   : > { %v1552_v17 = vrot.slane %v1545_v7, %v7298_v5  ;;  %v7642_v18 = vrot.slane %v1560_v8, %v7298_v5  ;;  %v1582_v19 = vrot.slane %v1575_v20, %v7298_v5  ;;  %v1620_v61 = vrot.slane %v1613_v0, %v7298_v5 }
 0x2f2   : > { %v1597_v60 = vrot.slane %v1590_v24, %v7298_v5  ;;  %v1612_v62 = vrot.slane %v1605_v10, %v7298_v5  ;;  %v1635_v4 = vrot.slane %v1628_v11, %v7298_v5  ;;  %v1650_v21 = vrot.slane %v7638_v15, %v7298_v5 }
 0x2f3   : > { %v1627_v58 = vrot.slane %v1620_v61, %v7298_v5  ;;  %v1952_v51 = vrot.slane %v1582_v19, %v7298_v5  ;;  %v2089_v9 = vcombine.low %v1552_v17, %v7642_v18  ;;  %v1974_v33 = vrot.slane %v1552_v17, %v7298_v5 }
 0x2f4   : > { %v1996_v12 = vrot.slane %v1612_v62, %v7298_v5  ;;  %v2066_v22 = vcombine.low %v1582_v19, %v1597_v60  ;;  %v7656_v28 = vrot.slane %v1597_v60, %v7298_v5  ;;  %v7664_v34 = vrot.slane %v1635_v4, %v7298_v5 }
 0x2f5   : > { %v1960_v31 = vrot.slane %v1952_v51, %v7298_v5  ;;  %v2096_v45 = vrot.slane %v2089_v9, %v7298_v5  ;;  %v2112_v46 = vcombine.low %v1612_v62, %v1627_v58  ;;  %v1953_v49 = vcombine.high %v1952_v51, %v1952_v51 }
 0x2f6   : > { %v1997_v63 = vcombine.high %v1996_v12, %v1996_v12  ;;  %v2004_v41 = vrot.slane %v1996_v12, %v7298_v5  ;;  %v2073_v43 = vrot.slane %v2066_v22, %v7298_v5  ;;  %v2229_v37 = vcombine.high %v7656_v28, %v7656_v28 }
 0x2f7   : > { %v2119_v36 = vrot.slane %v2112_v46, %v7298_v5  ;;  %v2272_v16 = vrot.slane %v1627_v58, %v7298_v5  ;;  %v7673_v39 = vshrl.u32 %v1960_v31, 16  ;;  %v2097_v40 = vcombine.high %v2096_v45, %v2096_v45 }
 0x2f8   : > { %v7671_v38 = vrot.slane %v1997_v63, %v7298_v5  ;;  %v2074_v3 = vcombine.high %v2073_v43, %v2073_v43  ;;  %v7677_v57 = vshrl.u32 %v2004_v41, 16  ;;  %v2081_v1 = vrot.slane %v2073_v43, %v7298_v5 }
 0x2f9   : > { %v2120_v42 = vcombine.high %v2119_v36, %v2119_v36  ;;  %v2127_v44 = vrot.slane %v2119_v36, %v7298_v5  ;;  %v2273_v30 = vcombine.high %v2272_v16, %v2272_v16  ;;  %v2280_v54 = vrot.slane %v2272_v16, %v7298_v5 }
 0x2fa   : > { %v1967_v27 = vrot.slane %v1953_v49, %v7298_v5  ;;  %v1975_v32 = vcombine.high %v1974_v33, %v1974_v33  ;;  %v2050_v47 = vshrl.u32 %v7671_v38, 16  ;;  %v2088_v55 = vrot.slane %v2074_v3, %v7298_v5 }
 0x2fb   : > { %v2134_v48 = vrot.slane %v2120_v42, %v7298_v5  ;;  %v2187_v50 = vshrl.u32 %v2127_v44, 16  ;;  %v2287_v53 = vrot.slane %v2273_v30, %v7298_v5  ;;  %v2327_v52 = vshll.u32 %v2280_v54, 16 }
 0x2fc   : > { %v1982_v56 = vrot.slane %v1974_v33, %v7298_v5  ;;  %v1989_v59 = vrot.slane %v1975_v32, %v7298_v5  ;;  %v2190_v6 = vshll.u32 %v2127_v44, 16  ;;  %v2038_v8 = vshrl.u32 %v1967_v27, 16 }
 0x2fd   : > { %v2189_v2 = vrot.slane %v2187_v50, 7  ;;  %v2194_v7 = vshrl.u32 %v2134_v48, 16  ;;  %v2197_v20 = vshll.u32 %v2134_v48, 16  ;;  %v2329_v0 = vrot.slane %v2327_v52, 6 }
 0x2fe   : > { %v2331_v24 = vshll.u32 %v2287_v53, 16  ;;  %v2104_v10 = vrot.slane %v2096_v45, %v7298_v5  ;;  %v2041_v17 = vshrl.u32 %v1982_v56, 16  ;;  %v2044_v19 = vshrl.u32 %v1989_v59, 16 }
 0x2ff   : > { %v2192_v11 = vor.u32 %v2190_v6, %v2189_v2  ;;  %v2111_v61 = vrot.slane %v2097_v40, %v7298_v5  ;;  %v2196_v60 = vrot.slane %v2194_v7, 7  ;;  %v2159_v62 = vshrl.u32 %v2081_v1, 16 }
 0x300   : > { %v2162_v58 = vshll.u32 %v2081_v1, 16  ;;  %v2166_v4 = vshrl.u32 %v2088_v55, 16  ;;  %v2169_v51 = vshll.u32 %v2088_v55, 16  ;;  %v2173_v9 = vshrl.u32 %v2104_v10, 16 }
 0x301   : > { %v2176_v12 = vshll.u32 %v2104_v10, 16  ;;  %v2180_v22 = vshrl.u32 %v2111_v61, 16  ;;  %v2161_v31 = vrot.slane %v2159_v62, 7  ;;  %v2183_v46 = vshll.u32 %v2111_v61, 16 }
 0x302   : > { %v2168_v33 = vrot.slane %v2166_v4, 7  ;;  %v2236_v49 = vrot.slane %v7656_v28, %v7298_v5  ;;  %v2175_v45 = vrot.slane %v2173_v9, 7  ;;  %v2243_v41 = vrot.slane %v2229_v37, %v7298_v5 }
 0x303   : > { %v2182_v63 = vrot.slane %v2180_v22, 7  ;;  %v2250_v43 = vrot.slane %v7642_v18, %v7298_v5  ;;  %v2164_v36 = vor.u32 %v2162_v58, %v2161_v31  ;;  %v2199_v38 = vor.u32 %v2197_v20, %v2196_v60 }
 0x304   : > { %v2171_v16 = vor.u32 %v2169_v51, %v2168_v33  ;;  %v2311_v3 = vshll.u32 %v2236_v49, 16  ;;  %v2178_v40 = vor.u32 %v2176_v12, %v2175_v45  ;;  %v2333_v54 = vrot.slane %v2331_v24, 6 }
 0x305   : > { %v2185_v42 = vor.u32 %v2183_v46, %v2182_v63  ;;  %v2251_v44 = vcombine.high %v2250_v43, %v2250_v43  ;;  %v2258_v30 = vrot.slane %v2250_v43, %v7298_v5  ;;  %v2315_v27 = vshll.u32 %v2243_v41, 16 }
 0x306   : > { %v2313_v1 = vrot.slane %v2311_v3, 6  ;;  %v2354_v28 = vsel %vm7305_vm8, %v7677_v57, %v2192_v11  ;;  %v2350_v18 = vsel %vm7305_vm8, %v7673_v39, %v2164_v36  ;;  %v2351_v48 = vsel %vm7305_vm8, %v2038_v8, %v2171_v16 }
 0x307   : > { %v2265_v37 = vrot.slane %v2251_v44, %v7298_v5  ;;  %v2319_v32 = vshll.u32 %v2258_v30, 16  ;;  %v2317_v50 = vrot.slane %v2315_v27, 6  ;;  %v2352_v53 = vsel %vm7305_vm8, %v2041_v17, %v2178_v40 }
 0x308   : > { %v2353_v55 = vsel %vm7305_vm8, %v2044_v19, %v2185_v42  ;;  %v2355_v57 = vsel %vm7305_vm8, %v2050_v47, %v2199_v38  ;;  %v2365_v56 = vsel %vm7366_vm15, %v2354_v28, %v2329_v0  ;;  %v1657_v59 = vrot.slane %v1650_v21, %v7298_v5 }
 0x309   : > { %v2323_v52 = vshll.u32 %v2265_v37, 16  ;;  %v2366_v39 = vsel %vm7366_vm15, %v2355_v57, %v2333_v54  ;;  %v2361_v2 = vsel %vm7366_vm15, %v2350_v18, %v2313_v1  ;;  %v2362_v6 = vsel %vm7366_vm15, %v2351_v48, %v2317_v50  ;;  %v6290_v57 = vld [vmem:[#allocation10 + $0x100] ss:$8 sps:$4 sm:$0xff]  }
 0x30a   : > { %v2391_v7 = vcombine.low %v2365_v56, %v2366_v39  ;;  %v2018_v47 = vrot.slane %v7664_v34, %v7298_v5  ;;  %v2321_v8 = vrot.slane %v2319_v32, 6  ;;  %v2375_v0 = vcombine.low %v2361_v2, %v2362_v6  ;;  %v6298_v6 = vld [vmem:[#allocation10 + $0x114] ss:$8 sps:$4 sm:$0xff]  }
 0x30b   : > { %v2325_v20 = vrot.slane %v2323_v52, 6  ;;  %v2135_v24 = vcombine.low %v7664_v34, %v1657_v59  ;;  %v2294_v11 = vrot.slane %v1657_v59, %v7298_v5  ;;  %v7738_v34 = vpop.f32.mrb[0].mxu1 }
 0x30c   : > { %v7726_v10 = vrot.slane %v2391_v7, %v7383_v35  ;;  %v2019_v15 = vcombine.high %v2018_v47, %v2018_v47  ;;  %v2026_v21 = vrot.slane %v2018_v47, %v7298_v5  ;;  %v2363_v17 = vsel %vm7366_vm15, %v2352_v53, %v2321_v8  ;;  %v7749_v45 = vpop.f32.mrb[1].mxu1 }
 0x30d   : > { %v2364_v19 = vsel %vm7366_vm15, %v2353_v55, %v2325_v20  ;;  %v7735_v61 = vrot.slane %v2375_v0, %v7383_v35  ;;  %v2142_v60 = vrot.slane %v2135_v24, %v7298_v5  ;;  %v2295_v4 = vcombine.high %v2294_v11, %v2294_v11  ;;  %v7759_v16 = vpop.f32.mrb[2].mxu1 }
 0x30e   : > { %v2383_v62 = vcombine.low %v2363_v17, %v2364_v19  ;;  %v2033_v58 = vrot.slane %v2019_v15, %v7298_v5  ;;  %v2302_v22 = vrot.slane %v2294_v11, %v7298_v5  ;;  %v2053_v33 = vshrl.u32 %v2026_v21, 16  ;;  %v7763_v44 = vpop.f32.mrb[3].mxu1 }
 0x30f   : > { %v2498_v51 = vcombine.low %v7735_v61, %v7726_v10  ;;  %v2143_v9 = vcombine.high %v2142_v60, %v2142_v60  ;;  %v2150_v12 = vrot.slane %v2142_v60, %v7298_v5  ;;  %v2309_v49 = vrot.slane %v2295_v4, %v7298_v5  ;;  %v6296_v60 = vld [vmem:[#allocation10 + $0x110] ss:$8 sps:$4 sm:$0xff]  }
 0x310   : > { %v7746_v31 = vrot.slane %v2383_v62, %v7383_v35  ;;  %v2056_v46 = vshrl.u32 %v2033_v58, 16  ;;  %v7757_v36 = vcombine.high %v7735_v61, %v7735_v61  ;;  %v2335_v40 = vshll.u32 %v2302_v22, 16 }
 0x311   : > { %v7752_v63 = vrot.slane %v2498_v51, %v7383_v35  ;;  %v2157_v41 = vrot.slane %v2143_v9, %v7298_v5  ;;  %v2201_v43 = vshrl.u32 %v2150_v12, 16  ;;  %v2204_v3 = vshll.u32 %v2150_v12, 16  ;;  %v6304_v9 = vld [vmem:[#allocation10 + $0x124] ss:$8 sps:$4 sm:$0xff]  }
 0x312   : > { %v2497_v38 = vcombine.low %v7735_v61, %v7746_v31  ;;  %v2339_v42 = vshll.u32 %v2309_v49, 16  ;;  %v2517_v5 = vcombine.low %v7746_v31, %v7735_v61  ;;  %v2337_v28 = vrot.slane %v2335_v40, 6  ;;  %v6302_v40 = vld [vmem:[#allocation10 + $0x120] ss:$8 sps:$4 sm:$0xff]  }
 0x313   : > { %v2203_v30 = vrot.slane %v2201_v43, 7  ;;  %v2208_v54 = vshrl.u32 %v2157_v41, 16  ;;  %v2211_v1 = vshll.u32 %v2157_v41, 16  ;;  %v7770_v32 = vcombine.high %v7746_v31, %v7746_v31 }
 0x314   : > { %v2505_v27 = vrot.slane %v2497_v38, %v7383_v35  ;;  %v2341_v37 = vrot.slane %v2339_v42, 6  ;;  %v7774_v50 = vcombine.high %v7726_v10, %v7726_v10  ;;  %v2419_v53 = vshrl.u32 %v7735_v61, 16 }
 0x315   : > { %v2206_v18 = vor.u32 %v2204_v3, %v2203_v30  ;;  %v2210_v48 = vrot.slane %v2208_v54, 7  ;;  %v2422_v56 = vshll.u32 %v7735_v61, 16  ;;  %v2428_v39 = vshll.u32 %v7757_v36, 16 }
 0x316   : > { %v2514_v55 = vcombine.high %v2505_v27, %v7752_v63  ;;  %v2513_v52 = vcombine.low %v2505_v27, %v7752_v63  ;;  %v2421_v7 = vrot.slane %v2419_v53, 6  ;;  %v2433_v47 = vshrl.u32 %v7746_v31, 16 }
 0x317   : > { %v2213_v59 = vor.u32 %v2211_v1, %v2210_v48  ;;  %v2356_v2 = vsel %vm7305_vm8, %v2053_v33, %v2206_v18  ;;  %v7787_v20 = vrot.slane %v2517_v5, %v7383_v35  ;;  %v2424_v0 = vrot.slane %v2422_v56, 7  ;;  %v6308_v56 = vld [vmem:[#allocation10 + $0x130] ss:$8 sps:$4 sm:$0xff]  }
 0x318   : > { %4834 = vmatprep.mubr.bf16.mxu0 %v2514_v55  ;;  %v2367_v8 = vsel %vm7366_vm15, %v2356_v2, %v2337_v28  ;;  %v2436_v24 = vshll.u32 %v7746_v31, 16  ;;  %v2435_v21 = vrot.slane %v2433_v47, 6  ;;  %v2442_v11 = vshll.u32 %v7770_v32, 16 }
 0x319   : > { %4835 = vmatmul.mubr.bf16.vlgmr.msra.gmra.mrb[12].mxu0 %v2513_v52  ;;  %v2357_v15 = vsel %vm7305_vm8, %v2056_v46, %v2213_v59  ;;  %v2447_v17 = vshrl.u32 %v7726_v10, 16  ;;  %v2425_v62 = vor.u32 %v2424_v0, %v2421_v7  ;;  %v2450_v4 = vshll.u32 %v7726_v10, 16 }
 0x31a   : > { %4846 = vmatpush1.bf16.msra.mxu0 %v6290_v57  ;;  %v2368_v19 = vsel %vm7366_vm15, %v2357_v15, %v2341_v37  ;;  %v2438_v58 = vrot.slane %v2436_v24, 7  ;;  %v2430_v12 = vrot.slane %v2428_v39, 7  ;;  %v2456_v22 = vshll.u32 %v7774_v50, 16 }
 0x31b   : > { %v2401_v51 = vcombine.low %v2367_v8, %v2368_v19  ;;  %4847 = vmatprep.subr.bf16.mxu0 %v6298_v6  ;;  %v2449_v14 = vrot.slane %v2447_v17, 6  ;;  %v2426_v33 = vrot.slane %v2425_v62, 2  ;;  %v2444_v49 = vrot.slane %v2442_v11, 7  ;;  %v6316_v8 = vld [vmem:[#allocation10 + $0x144] ss:$8 sps:$4 sm:$0xff]  }
 0x31c   : > { %v2439_v46 = vor.u32 %v2438_v58, %v2435_v21  ;;  %v2452_v41 = vrot.slane %v2450_v4, 7  ;;  %v2458_v23 = vrot.slane %v2456_v22, 7  ;;  %v5525_v38 = vrot.slane %v7735_v61, 9  ;;  %v6314_v62 = vld [vmem:[#allocation10 + $0x140] ss:$8 sps:$4 sm:$0xff]  }
 0x31d   : > { %v7799_v43 = vrot.slane %v2401_v51, %v7383_v35  ;;  %v2483_v3 = vrot.slane %v7757_v36, 7  ;;  %v5526_v54 = vrot.slane %v7746_v31, 9  ;;  %v2487_v1 = vrot.slane %v7770_v32, 7  ;;  %v6310_v36 = vld [vmem:[#allocation10 + $0x134] ss:$8 sps:$4 sm:$0xff]  }
 0x31e   : > { %4848 = vmatpush1.bf16.msra.mxu0 %v6296_v60  ;;  %v2440_v42 = vrot.slane %v2439_v46, 2  ;;  %v2453_v30 = vor.u32 %v2452_v41, %v2449_v14  ;;  %v2431_v37 = vsel %vm7447_vm6, %v2426_v33, %v2430_v12  ;;  %v5527_v11 = vrot.slane %v7726_v10, 9  ;;  %v6322_v12 = vld [vmem:[#allocation10 + $0x154] ss:$8 sps:$4 sm:$0xff]  }
 0x31f   : > { %v2518_v5 = vcombine.low %v7726_v10, %v7799_v43  ;;  %4849 = vmatprep.subr.bf16.mxu0 %v6304_v9  ;;  %v2460_v27 = vcombine.high %v7799_v43, %v7799_v43  ;;  %v2462_v28 = vshrl.u32 %v7799_v43, 16  ;;  %v2465_v61 = vshll.u32 %v7799_v43, 16 }
 0x320   : > { %v2454_v18 = vrot.slane %v2453_v30, 2  ;;  %v2537_v31 = vcombine.low %v7799_v43, %v7726_v10  ;;  %v2484_v32 = vsel %vm7456_vm7, %v5525_v38, %v2483_v3  ;;  %v2488_v59 = vsel %vm7456_vm7, %v5526_v54, %v2487_v1  ;;  %v6328_v30 = vld [vmem:[#allocation10 + $0x164] ss:$8 sps:$4 sm:$0xff]  }
 0x321   : > { %v7818_v48 = vrot.slane %v2518_v5, %v7383_v35  ;;  %v2464_v53 = vrot.slane %v2462_v28, 6  ;;  %v2467_v55 = vrot.slane %v2465_v61, 7  ;;  %v2471_v57 = vshll.u32 %v2460_v27, 16 }
 0x322   : > { %4850 = vmatpush1.bf16.msra.mxu0 %v6302_v40  ;;  %v2459_v52 = vsel %vm7447_vm6, %v2454_v18, %v2458_v23  ;;  %v7823_v39 = vrot.slane %v2537_v31, %v7383_v35  ;;  %v2445_v6 = vsel %vm7447_vm6, %v2440_v42, %v2444_v49  ;;  %v2491_v17 = vrot.slane %v7774_v50, 7 }
 0x323   : > { %v2534_v2 = vcombine.high %v7787_v20, %v7818_v48  ;;  %v2468_v7 = vor.u32 %v2467_v55, %v2464_v53  ;;  %v2550_v47 = vcombine.low %v2431_v37, %v2459_v52  ;;  %4851 = vmatprep.subr.bf16.mxu0 %v6310_v36  ;;  %v2473_v0 = vrot.slane %v2471_v57, 7  ;;  %v6326_v57 = vld [vmem:[#allocation10 + $0x160] ss:$8 sps:$4 sm:$0xff]  }
 0x324   : > { %v2569_v24 = vcombine.low %v2445_v6, %v2431_v37  ;;  %v2546_v15 = vcombine.high %v7752_v63, %v7823_v39  ;;  %v2601_v19 = vcombine.low %v2484_v32, %v2488_v59  ;;  %v2545_v58 = vcombine.low %v7752_v63, %v7823_v39  ;;  %v6487_v63 = vld [vmem:[#allocation10 + $0x6e4] ss:$8 sps:$4 sm:$0xff]   ;;  %v6500_v39 = vld [vmem:[#allocation10 + $0x330] ss:$8 sps:$4 sm:$0xff]  }
 0x325   : > { %4877 = vmatprep.mubr.bf16.mxu0 %v2534_v2  ;;  %v2469_v21 = vrot.slane %v2468_v7, 2  ;;  %v7836_v60 = vrot.slane %v2550_v47, %v7383_v35  ;;  %v2549_v4 = vcombine.low %v2431_v37, %v2445_v6  ;;  %v2495_v51 = vrot.slane %v2460_v27, 7  ;;  %v6305_v27 = vld [vmem:[#allocation10 + $0x500] ss:$8 sps:$4 sm:$0xff]   ;;  %v6313_v37 = vld [vmem:[#allocation10 + $0x514] ss:$8 sps:$4 sm:$0xff]  }
 0x326   : > { %4852 = vmatpush1.bf16.msra.mxu0 %v6308_v56  ;;  %v2492_v10 = vsel %vm7456_vm7, %v5527_v11, %v2491_v17  ;;  %v5528_v50 = vrot.slane %v7799_v43, 9  ;;  %v2621_v14 = vcombine.low %v2488_v59, %v2484_v32  ;;  %v2577_v41 = vrot.slane %v2569_v24, %v7383_v35  ;;  %v6320_v43 = vld [vmem:[#allocation10 + $0x150] ss:$8 sps:$4 sm:$0xff]   ;;  %v6319_v47 = vld [vmem:[#allocation10 + $0x524] ss:$8 sps:$4 sm:$0xff]  }
 0x327   : > { %v2474_v9 = vsel %vm7447_vm6, %v2469_v21, %v2473_v0  ;;  %4853 = vmatprep.subr.bf16.mxu0 %v6316_v8  ;;  %v2602_v46 = vcombine.low %v2484_v32, %v2492_v10  ;;  %v7846_v49 = vrot.slane %v2549_v4, %v7383_v35  ;;  %v7850_v23 = vrot.slane %v2601_v19, %v7383_v35  ;;  %v6311_v6 = vld [vmem:[#allocation10 + $0x510] ss:$8 sps:$4 sm:$0xff]   ;;  %v6340_v0 = vld [vmem:[#allocation10 + $0x184] ss:$8 sps:$4 sm:$0xff]   ;;  %v6317_v24 = vld [vmem:[#allocation10 + $0x520] ss:$8 sps:$4 sm:$0xff]  }
 0x328   : > { %v2570_v22 = vcombine.low %v2459_v52, %v2474_v9  ;;  %v2589_v33 = vcombine.low %v2474_v9, %v2459_v52  ;;  %v2496_v13 = vsel %vm7456_vm7, %v5528_v50, %v2495_v51  ;;  %v7868_v36 = vrot.slane %v2621_v14, %v7383_v35  ;;  %v6334_v52 = vld [vmem:[#allocation10 + $0x174] ss:$8 sps:$4 sm:$0xff]   ;;  %v6332_v8 = vld [vmem:[#allocation10 + $0x170] ss:$8 sps:$4 sm:$0xff]   ;;  %v6338_v11 = vld [vmem:[#allocation10 + $0x180] ss:$8 sps:$4 sm:$0xff]  }
 0x329   : > { %v7859_v40 = vrot.slane %v2602_v46, %v7383_v35  ;;  %v2566_v42 = vcombine.high %v7846_v49, %v7836_v60  ;;  %v2622_v54 = vcombine.low %v2492_v10, %v2496_v13  ;;  %v2565_v25 = vcombine.low %v7846_v49, %v7836_v60  ;;  %v6325_v21 = vld [vmem:[#allocation10 + $0x534] ss:$8 sps:$4 sm:$0xff]   ;;  %v6323_v19 = vld [vmem:[#allocation10 + $0x530] ss:$8 sps:$4 sm:$0xff]   ;;  %v6352_v51 = vld [vmem:[#allocation10 + $0x1a4] ss:$8 sps:$4 sm:$0xff]  }
 0x32a   : > { %v2584_v38 = vrot.slane %v2570_v22, %v7383_v35  ;;  %v7856_v3 = vrot.slane %v2589_v33, %v7383_v35  ;;  %4854 = vmatpush1.bf16.msra.mxu0 %v6314_v62  ;;  %v2641_v1 = vcombine.low %v2496_v13, %v2492_v10  ;;  %v6346_v17 = vld [vmem:[#allocation10 + $0x194] ss:$8 sps:$4 sm:$0xff]   ;;  %v6331_v62 = vld [vmem:[#allocation10 + $0x544] ss:$8 sps:$4 sm:$0xff]   ;;  %v6344_v4 = vld [vmem:[#allocation10 + $0x190] ss:$8 sps:$4 sm:$0xff]  }
 0x32b   : > { %4855 = vmatprep.subr.bf16.mxu0 %v6322_v12  ;;  %v2618_v18 = vcombine.high %v7850_v23, %v7859_v40  ;;  %v2617_v31 = vcombine.low %v7850_v23, %v7859_v40  ;;  %v7875_v32 = vrot.slane %v2622_v54, %v7383_v35  ;;  %v6329_v9 = vld [vmem:[#allocation10 + $0x540] ss:$8 sps:$4 sm:$0xff]   ;;  %v6337_v12 = vld [vmem:[#allocation10 + $0x554] ss:$8 sps:$4 sm:$0xff]   ;;  %v6335_v14 = vld [vmem:[#allocation10 + $0x550] ss:$8 sps:$4 sm:$0xff]  }
 0x32c   : > { %v2586_v5 = vcombine.high %v2577_v41, %v2584_v38  ;;  %v2585_v28 = vcombine.low %v2577_v41, %v2584_v38  ;;  %v2597_v61 = vcombine.low %v7836_v60, %v7856_v3  ;;  %v7878_v53 = vrot.slane %v2641_v1, %v7383_v35  ;;  %v6350_v10 = vld [vmem:[#allocation10 + $0x1a0] ss:$8 sps:$4 sm:$0xff]   ;;  %v6358_v50 = vld [vmem:[#allocation10 + $0x1b4] ss:$8 sps:$4 sm:$0xff]   ;;  %v6343_v22 = vld [vmem:[#allocation10 + $0x564] ss:$8 sps:$4 sm:$0xff]  }
 0x32d   : > { %v2598_v55 = vcombine.high %v7836_v60, %v7856_v3  ;;  %v2638_v56 = vcombine.high %v7868_v36, %v7875_v32  ;;  %v2637_v59 = vcombine.low %v7868_v36, %v7875_v32  ;;  %v6356_v33 = vld [vmem:[#allocation10 + $0x1b0] ss:$8 sps:$4 sm:$0xff]   ;;  %v6364_v46 = vld [vmem:[#allocation10 + $0x1c4] ss:$8 sps:$4 sm:$0xff]   ;;  %v6341_v41 = vld [vmem:[#allocation10 + $0x560] ss:$8 sps:$4 sm:$0xff]  }
 0x32e   : > { %5006 = vmatprep.mubr.bf16.mxu1 %v2586_v5  ;;  %4856 = vmatpush1.bf16.msra.mxu0 %v6320_v43  ;;  %v2650_v2 = vcombine.high %v7859_v40, %v7878_v53  ;;  %v2649_v7 = vcombine.low %v7859_v40, %v7878_v53  ;;  %v6349_v13 = vld [vmem:[#allocation10 + $0x574] ss:$8 sps:$4 sm:$0xff]   ;;  %v6362_v38 = vld [vmem:[#allocation10 + $0x1c0] ss:$8 sps:$4 sm:$0xff]   ;;  %v6355_v54 = vld [vmem:[#allocation10 + $0x584] ss:$8 sps:$4 sm:$0xff]  }
 0x32f   : > { %5007 = vmatmul.mubr.bf16.vlgmr.msra.gmra.mrb[4].mxu1 %v2585_v28  ;;  %4857 = vmatprep.subr.bf16.mxu0 %v6328_v30  ;;  %v6370_v43 = vld [vmem:[#allocation10 + $0x1d4] ss:$8 sps:$4 sm:$0xff]   ;;  %v6347_v30 = vld [vmem:[#allocation10 + $0x570] ss:$8 sps:$4 sm:$0xff]   ;;  %v6376_v5 = vld [vmem:[#allocation10 + $0x1e4] ss:$8 sps:$4 sm:$0xff]  }
 0x330   : > { %5018 = vmatpush1.bf16.msra.mxu1 %v6305_v27  ;;  %5049 = vmatprep.mubr.bf16.mxu1 %v2598_v55  ;;  %v6368_v1 = vld [vmem:[#allocation10 + $0x1d0] ss:$8 sps:$4 sm:$0xff]   ;;  %v6353_v27 = vld [vmem:[#allocation10 + $0x580] ss:$8 sps:$4 sm:$0xff]   ;;  %v6361_v28 = vld [vmem:[#allocation10 + $0x594] ss:$8 sps:$4 sm:$0xff]  }
 0x331   : > { %5019 = vmatprep.subr.bf16.mxu1 %v6313_v37  ;;  %v6374_v37 = vld [vmem:[#allocation10 + $0x1e0] ss:$8 sps:$4 sm:$0xff]   ;;  %v6382_v55 = vld [vmem:[#allocation10 + $0x1f4] ss:$8 sps:$4 sm:$0xff]   ;;  %v6587_v49 = vld [vmem:[#allocation10 + $0x810] ss:$8 sps:$4 sm:$0xff]  }
 0x332   : > { %4858 = vmatpush1.bf16.msra.mxu0 %v6326_v57  ;;  %v6359_v57 = vld [vmem:[#allocation10 + $0x590] ss:$8 sps:$4 sm:$0xff]   ;;  %v6434_v3 = vld [vmem:[#allocation10 + $0x280] ss:$8 sps:$4 sm:$0xff]   ;;  %v6589_v60 = vld [vmem:[#allocation10 + $0x814] ss:$8 sps:$4 sm:$0xff]  }
 0x333   : > { %4859 = vmatprep.subr.bf16.mxu0 %v6334_v52  ;;  %v6367_v52 = vld [vmem:[#allocation10 + $0x5a4] ss:$8 sps:$4 sm:$0xff]   ;;  %v6530_v23 = vld [vmem:[#allocation10 + $0x380] ss:$8 sps:$4 sm:$0xff]   ;;  %v6601_v36 = vld [vmem:[#allocation10 + $0x854] ss:$8 sps:$4 sm:$0xff]  }
 0x334   : > { %5020 = vmatpush1.bf16.msra.mxu1 %v6311_v6  ;;  %v6380_v6 = vld [vmem:[#allocation10 + $0x1f0] ss:$8 sps:$4 sm:$0xff]  }
 0x335   : > { %5021 = vmatprep.subr.bf16.mxu1 %v6319_v47  ;;  %v6388_v47 = vld [vmem:[#allocation10 + $0x204] ss:$8 sps:$4 sm:$0xff]   ;;  %v6599_v32 = vld [vmem:[#allocation10 + $0x850] ss:$8 sps:$4 sm:$0xff]  }
 0x336   : > { %4860 = vmatpush1.bf16.msra.mxu0 %v6332_v8  ;;  %v6365_v8 = vld [vmem:[#allocation10 + $0x5a0] ss:$8 sps:$4 sm:$0xff]  }
 0x337   : > { %4861 = vmatprep.subr.bf16.mxu0 %v6340_v0  ;;  %v6373_v0 = vld [vmem:[#allocation10 + $0x5b4] ss:$8 sps:$4 sm:$0xff]  }
 0x338   : > { %5022 = vmatpush1.bf16.msra.mxu1 %v6317_v24  ;;  %v6386_v24 = vld [vmem:[#allocation10 + $0x200] ss:$8 sps:$4 sm:$0xff]  }
 0x339   : > { %5023 = vmatprep.subr.bf16.mxu1 %v6325_v21  ;;  %v2533_v21 = vcombine.low %v7787_v20, %v7818_v48  ;;  %v6398_v20 = vld [vmem:[#allocation10 + $0x220] ss:$8 sps:$4 sm:$0xff]   ;;  %v6406_v48 = vld [vmem:[#allocation10 + $0x234] ss:$8 sps:$4 sm:$0xff]  }
 0x33a   : > { %4862 = vmatpush1.bf16.msra.mxu0 %v6338_v11  ;;  %v6394_v11 = vld [vmem:[#allocation10 + $0x214] ss:$8 sps:$4 sm:$0xff]  }
 0x33b   : > { %4863 = vmatprep.subr.bf16.mxu0 %v6346_v17  ;;  %v6371_v17 = vld [vmem:[#allocation10 + $0x5b0] ss:$8 sps:$4 sm:$0xff]  }
 0x33c   : > { %5024 = vmatpush1.bf16.msra.mxu1 %v6323_v19  ;;  %v6379_v19 = vld [vmem:[#allocation10 + $0x5c4] ss:$8 sps:$4 sm:$0xff]  }
 0x33d   : > { %5025 = vmatprep.subr.bf16.mxu1 %v6331_v62  ;;  %v6392_v62 = vld [vmem:[#allocation10 + $0x210] ss:$8 sps:$4 sm:$0xff]  }
 0x33e   : > { %4864 = vmatpush1.bf16.msra.mxu0 %v6344_v4  ;;  %v6400_v4 = vld [vmem:[#allocation10 + $0x224] ss:$8 sps:$4 sm:$0xff]  }
 0x33f   : > { %4865 = vmatprep.subr.bf16.mxu0 %v6352_v51  ;;  %v6377_v51 = vld [vmem:[#allocation10 + $0x5c0] ss:$8 sps:$4 sm:$0xff]  }
 0x340   : > { %5026 = vmatpush1.bf16.msra.mxu1 %v6329_v9  ;;  %v6385_v9 = vld [vmem:[#allocation10 + $0x5d4] ss:$8 sps:$4 sm:$0xff]  }
 0x341   : > { %5027 = vmatprep.subr.bf16.mxu1 %v6337_v12  ;;  %v6383_v12 = vld [vmem:[#allocation10 + $0x5d0] ss:$8 sps:$4 sm:$0xff]  }
 0x342   : > { %4866 = vmatpush1.bf16.msra.mxu0 %v6350_v10  ;;  %v6391_v10 = vld [vmem:[#allocation10 + $0x5e4] ss:$8 sps:$4 sm:$0xff]  }
 0x343   : > { %4867 = vmatprep.subr.bf16.mxu0 %v6358_v50  ;;  %v6404_v50 = vld [vmem:[#allocation10 + $0x230] ss:$8 sps:$4 sm:$0xff]  }
 0x344   : > { %5028 = vmatpush1.bf16.msra.mxu1 %v6335_v14  ;;  %v6412_v14 = vld [vmem:[#allocation10 + $0x244] ss:$8 sps:$4 sm:$0xff]  }
 0x345   : > { %5029 = vmatprep.subr.bf16.mxu1 %v6343_v22  ;;  %v6397_v22 = vld [vmem:[#allocation10 + $0x5f4] ss:$8 sps:$4 sm:$0xff]  }
 0x346   : > { %4868 = vmatpush1.bf16.msra.mxu0 %v6356_v33  ;;  %v6410_v33 = vld [vmem:[#allocation10 + $0x240] ss:$8 sps:$4 sm:$0xff]  }
 0x347   : > { %4869 = vmatprep.subr.bf16.mxu0 %v6364_v46  ;;  %v6418_v46 = vld [vmem:[#allocation10 + $0x254] ss:$8 sps:$4 sm:$0xff]  }
 0x348   : > { %5030 = vmatpush1.bf16.msra.mxu1 %v6341_v41  ;;  %v6395_v41 = vld [vmem:[#allocation10 + $0x5f0] ss:$8 sps:$4 sm:$0xff]  }
 0x349   : > { %5031 = vmatprep.subr.bf16.mxu1 %v6349_v13  ;;  %v6403_v13 = vld [vmem:[#allocation10 + $0x604] ss:$8 sps:$4 sm:$0xff]  }
 0x34a   : > { %4870 = vmatpush1.bf16.msra.mxu0 %v6362_v38  ;;  %v6416_v38 = vld [vmem:[#allocation10 + $0x250] ss:$8 sps:$4 sm:$0xff]  }
 0x34b   : > { %4871 = vmatprep.subr.bf16.mxu0 %v6370_v43  ;;  %v6424_v43 = vld [vmem:[#allocation10 + $0x264] ss:$8 sps:$4 sm:$0xff]  }
 0x34c   : > { %5032 = vmatpush1.bf16.msra.mxu1 %v6347_v30  ;;  %v6401_v30 = vld [vmem:[#allocation10 + $0x600] ss:$8 sps:$4 sm:$0xff]  }
 0x34d   : > { %5033 = vmatprep.subr.bf16.mxu1 %v6355_v54  ;;  %v6409_v54 = vld [vmem:[#allocation10 + $0x614] ss:$8 sps:$4 sm:$0xff]  }
 0x34e   : > { %4872 = vmatpush1.bf16.msra.mxu0 %v6368_v1  ;;  %v6422_v1 = vld [vmem:[#allocation10 + $0x260] ss:$8 sps:$4 sm:$0xff]  }
 0x34f   : > { %4873 = vmatprep.subr.bf16.mxu0 %v6376_v5  ;;  %v6430_v5 = vld [vmem:[#allocation10 + $0x274] ss:$8 sps:$4 sm:$0xff]  }
 0x350   : > { %5034 = vmatpush1.bf16.msra.mxu1 %v6353_v27  ;;  %v6407_v27 = vld [vmem:[#allocation10 + $0x610] ss:$8 sps:$4 sm:$0xff]  }
 0x351   : > { %5035 = vmatprep.subr.bf16.mxu1 %v6361_v28  ;;  %v6415_v28 = vld [vmem:[#allocation10 + $0x624] ss:$8 sps:$4 sm:$0xff]  }
 0x352   : > { %4874 = vmatpush1.bf16.msra.mxu0 %v6374_v37  ;;  %v6428_v37 = vld [vmem:[#allocation10 + $0x270] ss:$8 sps:$4 sm:$0xff]  }
 0x353   : > { %4875 = vmatprep.subr.bf16.mxu0 %v6382_v55  ;;  %v6436_v55 = vld [vmem:[#allocation10 + $0x284] ss:$8 sps:$4 sm:$0xff]  }
 0x354   : > { %5036 = vmatpush1.bf16.msra.mxu1 %v6359_v57  ;;  %v6413_v57 = vld [vmem:[#allocation10 + $0x620] ss:$8 sps:$4 sm:$0xff]  }
 0x355   : > { %5037 = vmatprep.subr.bf16.mxu1 %v6367_v52  ;;  %v6421_v52 = vld [vmem:[#allocation10 + $0x634] ss:$8 sps:$4 sm:$0xff]  }
 0x356   : > { %4876 = vmatpush1.bf16.msra.mxu0 %v6380_v6  ;;  %v6419_v6 = vld [vmem:[#allocation10 + $0x630] ss:$8 sps:$4 sm:$0xff]  }
 0x357   : > { %4888 = vmatprep.subr.bf16.mxu0 %v6388_v47  ;;  %v6427_v47 = vld [vmem:[#allocation10 + $0x644] ss:$8 sps:$4 sm:$0xff]  }
 0x358   : > { %5038 = vmatpush1.bf16.msra.mxu1 %v6365_v8  ;;  %v6448_v8 = vld [vmem:[#allocation10 + $0x2a4] ss:$8 sps:$4 sm:$0xff]  }
 0x359   : > { %5039 = vmatprep.subr.bf16.mxu1 %v6373_v0  ;;  %4878 = vmatmul.mubr.bf16.vlgmr.msra.gmra.mrb[12].mxu0 %v2533_v21  ;;  %v6425_v0 = vld [vmem:[#allocation10 + $0x640] ss:$8 sps:$4 sm:$0xff]  }
 0x35a   : > { %4889 = vmatpush1.bf16.msra.mxu0 %v6386_v24  ;;  %4920 = vmatprep.mubr.bf16.mxu0 %v2546_v15  ;;  %v6389_v15 = vld [vmem:[#allocation10 + $0x5e0] ss:$8 sps:$4 sm:$0xff]   ;;  %v6433_v24 = vld [vmem:[#allocation10 + $0x654] ss:$8 sps:$4 sm:$0xff]  }
 0x35b   : > { %4890 = vmatprep.subr.bf16.mxu0 %v6394_v11  ;;  %v6446_v21 = vld [vmem:[#allocation10 + $0x2a0] ss:$8 sps:$4 sm:$0xff]   ;;  %v6454_v11 = vld [vmem:[#allocation10 + $0x2b4] ss:$8 sps:$4 sm:$0xff]  }
 0x35c   : > { %5040 = vmatpush1.bf16.msra.mxu1 %v6371_v17  ;;  %v6431_v17 = vld [vmem:[#allocation10 + $0x650] ss:$8 sps:$4 sm:$0xff]  }
 0x35d   : > { %5041 = vmatprep.subr.bf16.mxu1 %v6379_v19  ;;  %v6439_v19 = vld [vmem:[#allocation10 + $0x664] ss:$8 sps:$4 sm:$0xff]  }
 0x35e   : > { %4891 = vmatpush1.bf16.msra.mxu0 %v6392_v62  ;;  %v6452_v62 = vld [vmem:[#allocation10 + $0x2b0] ss:$8 sps:$4 sm:$0xff]  }
 0x35f   : > { %4892 = vmatprep.subr.bf16.mxu0 %v6400_v4  ;;  %v6460_v4 = vld [vmem:[#allocation10 + $0x2c4] ss:$8 sps:$4 sm:$0xff]  }
 0x360   : > { %5042 = vmatpush1.bf16.msra.mxu1 %v6377_v51  ;;  %v6437_v51 = vld [vmem:[#allocation10 + $0x660] ss:$8 sps:$4 sm:$0xff]  }
 0x361   : > { %5043 = vmatprep.subr.bf16.mxu1 %v6385_v9  ;;  %v6445_v9 = vld [vmem:[#allocation10 + $0x674] ss:$8 sps:$4 sm:$0xff]  }
 0x362   : > { %4893 = vmatpush1.bf16.msra.mxu0 %v6398_v20  ;;  %v6458_v20 = vld [vmem:[#allocation10 + $0x2c0] ss:$8 sps:$4 sm:$0xff]  }
 0x363   : > { %4894 = vmatprep.subr.bf16.mxu0 %v6406_v48  ;;  %v6466_v48 = vld [vmem:[#allocation10 + $0x2d4] ss:$8 sps:$4 sm:$0xff]  }
 0x364   : > { %5044 = vmatpush1.bf16.msra.mxu1 %v6383_v12  ;;  %v6443_v12 = vld [vmem:[#allocation10 + $0x670] ss:$8 sps:$4 sm:$0xff]  }
 0x365   : > { %5045 = vmatprep.subr.bf16.mxu1 %v6391_v10  ;;  %v6451_v10 = vld [vmem:[#allocation10 + $0x684] ss:$8 sps:$4 sm:$0xff]  }
 0x366   : > { %4895 = vmatpush1.bf16.msra.mxu0 %v6404_v50  ;;  %v6464_v50 = vld [vmem:[#allocation10 + $0x2d0] ss:$8 sps:$4 sm:$0xff]  }
 0x367   : > { %4896 = vmatprep.subr.bf16.mxu0 %v6412_v14  ;;  %v6472_v14 = vld [vmem:[#allocation10 + $0x2e4] ss:$8 sps:$4 sm:$0xff]  }
 0x368   : > { %5046 = vmatpush1.bf16.msra.mxu1 %v6389_v15  ;;  %v6449_v15 = vld [vmem:[#allocation10 + $0x680] ss:$8 sps:$4 sm:$0xff]  }
 0x369   : > { %5047 = vmatprep.subr.bf16.mxu1 %v6397_v22  ;;  %v6457_v22 = vld [vmem:[#allocation10 + $0x694] ss:$8 sps:$4 sm:$0xff]  }
 0x36a   : > { %4897 = vmatpush1.bf16.msra.mxu0 %v6410_v33  ;;  %v6470_v33 = vld [vmem:[#allocation10 + $0x2e0] ss:$8 sps:$4 sm:$0xff]  }
 0x36b   : > { %4898 = vmatprep.subr.bf16.mxu0 %v6418_v46  ;;  %v6478_v46 = vld [vmem:[#allocation10 + $0x2f4] ss:$8 sps:$4 sm:$0xff]  }
 0x36c   : > { %5048 = vmatpush1.bf16.msra.mxu1 %v6395_v41  ;;  %v6455_v41 = vld [vmem:[#allocation10 + $0x690] ss:$8 sps:$4 sm:$0xff]  }
 0x36d   : > { %5060 = vmatprep.subr.bf16.mxu1 %v6403_v13  ;;  %v6463_v13 = vld [vmem:[#allocation10 + $0x6a4] ss:$8 sps:$4 sm:$0xff]  }
 0x36e   : > { %4899 = vmatpush1.bf16.msra.mxu0 %v6416_v38  ;;  %v6476_v38 = vld [vmem:[#allocation10 + $0x2f0] ss:$8 sps:$4 sm:$0xff]  }
 0x36f   : > { %5050 = vmatmul.mubr.bf16.vlgmr.msra.gmra.mrb[4].mxu1 %v2597_v61  ;;  %4900 = vmatprep.subr.bf16.mxu0 %v6424_v43  ;;  %v6442_v61 = vld [vmem:[#allocation10 + $0x294] ss:$8 sps:$4 sm:$0xff]   ;;  %v6484_v43 = vld [vmem:[#allocation10 + $0x304] ss:$8 sps:$4 sm:$0xff]  }
 0x370   : > { %5061 = vmatpush1.bf16.msra.mxu1 %v6401_v30  ;;  %5092 = vmatprep.mubr.bf16.mxu1 %v2618_v18  ;;  %v6440_v18 = vld [vmem:[#allocation10 + $0x290] ss:$8 sps:$4 sm:$0xff]   ;;  %v6461_v30 = vld [vmem:[#allocation10 + $0x6a0] ss:$8 sps:$4 sm:$0xff]  }
 0x371   : > { %5062 = vmatprep.subr.bf16.mxu1 %v6409_v54  ;;  %v6469_v54 = vld [vmem:[#allocation10 + $0x6b4] ss:$8 sps:$4 sm:$0xff]  }
 0x372   : > { %4901 = vmatpush1.bf16.msra.mxu0 %v6422_v1  ;;  %v6482_v1 = vld [vmem:[#allocation10 + $0x300] ss:$8 sps:$4 sm:$0xff]  }
 0x373   : > { %4902 = vmatprep.subr.bf16.mxu0 %v6430_v5  ;;  %v6490_v5 = vld [vmem:[#allocation10 + $0x314] ss:$8 sps:$4 sm:$0xff]  }
 0x374   : > { %5063 = vmatpush1.bf16.msra.mxu1 %v6407_v27  ;;  %v6467_v27 = vld [vmem:[#allocation10 + $0x6b0] ss:$8 sps:$4 sm:$0xff]  }
 0x375   : > { %5064 = vmatprep.subr.bf16.mxu1 %v6415_v28  ;;  %v6475_v28 = vld [vmem:[#allocation10 + $0x6c4] ss:$8 sps:$4 sm:$0xff]  }
 0x376   : > { %4903 = vmatpush1.bf16.msra.mxu0 %v6428_v37  ;;  %v6488_v37 = vld [vmem:[#allocation10 + $0x310] ss:$8 sps:$4 sm:$0xff]  }
 0x377   : > { %4904 = vmatprep.subr.bf16.mxu0 %v6436_v55  ;;  %v6496_v55 = vld [vmem:[#allocation10 + $0x324] ss:$8 sps:$4 sm:$0xff]  }
 0x378   : > { %5065 = vmatpush1.bf16.msra.mxu1 %v6413_v57  ;;  %v6473_v57 = vld [vmem:[#allocation10 + $0x6c0] ss:$8 sps:$4 sm:$0xff]  }
 0x379   : > { %5066 = vmatprep.subr.bf16.mxu1 %v6421_v52  ;;  %v6481_v52 = vld [vmem:[#allocation10 + $0x6d4] ss:$8 sps:$4 sm:$0xff]  }
 0x37a   : > { %4905 = vmatpush1.bf16.msra.mxu0 %v6434_v3  ;;  %v6494_v3 = vld [vmem:[#allocation10 + $0x320] ss:$8 sps:$4 sm:$0xff]  }
 0x37b   : > { %4906 = vmatprep.subr.bf16.mxu0 %v6442_v61  ;;  %v6502_v61 = vld [vmem:[#allocation10 + $0x334] ss:$8 sps:$4 sm:$0xff]  }
 0x37c   : > { %5067 = vmatpush1.bf16.msra.mxu1 %v6419_v6  ;;  %v6479_v6 = vld [vmem:[#allocation10 + $0x6d0] ss:$8 sps:$4 sm:$0xff]  }
 0x37d   : > { %5068 = vmatprep.subr.bf16.mxu1 %v6427_v47  ;;  %v6493_v47 = vld [vmem:[#allocation10 + $0x6f4] ss:$8 sps:$4 sm:$0xff]  }
 0x37e   : > { %4907 = vmatpush1.bf16.msra.mxu0 %v6440_v18  ;;  %v6506_v18 = vld [vmem:[#allocation10 + $0x340] ss:$8 sps:$4 sm:$0xff]  }
 0x37f   : > { %4908 = vmatprep.subr.bf16.mxu0 %v6448_v8  ;;  %v6514_v8 = vld [vmem:[#allocation10 + $0x354] ss:$8 sps:$4 sm:$0xff]  }
 0x380   : > { %5069 = vmatpush1.bf16.msra.mxu1 %v6425_v0  ;;  %v6491_v0 = vld [vmem:[#allocation10 + $0x6f0] ss:$8 sps:$4 sm:$0xff]  }
 0x381   : > { %5070 = vmatprep.subr.bf16.mxu1 %v6433_v24  ;;  %v6499_v24 = vld [vmem:[#allocation10 + $0x704] ss:$8 sps:$4 sm:$0xff]  }
 0x382   : > { %4909 = vmatpush1.bf16.msra.mxu0 %v6446_v21  ;;  %v6512_v21 = vld [vmem:[#allocation10 + $0x350] ss:$8 sps:$4 sm:$0xff]  }
 0x383   : > { %4910 = vmatprep.subr.bf16.mxu0 %v6454_v11  ;;  %v6520_v11 = vld [vmem:[#allocation10 + $0x364] ss:$8 sps:$4 sm:$0xff]  }
 0x384   : > { %5071 = vmatpush1.bf16.msra.mxu1 %v6431_v17  ;;  %v6497_v17 = vld [vmem:[#allocation10 + $0x700] ss:$8 sps:$4 sm:$0xff]  }
 0x385   : > { %5072 = vmatprep.subr.bf16.mxu1 %v6439_v19  ;;  %v6505_v19 = vld [vmem:[#allocation10 + $0x714] ss:$8 sps:$4 sm:$0xff]  }
 0x386   : > { %4911 = vmatpush1.bf16.msra.mxu0 %v6452_v62  ;;  %v6518_v62 = vld [vmem:[#allocation10 + $0x360] ss:$8 sps:$4 sm:$0xff]  }
 0x387   : > { %4912 = vmatprep.subr.bf16.mxu0 %v6460_v4  ;;  %v6526_v4 = vld [vmem:[#allocation10 + $0x374] ss:$8 sps:$4 sm:$0xff]  }
 0x388   : > { %5073 = vmatpush1.bf16.msra.mxu1 %v6437_v51  ;;  %v6503_v51 = vld [vmem:[#allocation10 + $0x710] ss:$8 sps:$4 sm:$0xff]  }
 0x389   : > { %5074 = vmatprep.subr.bf16.mxu1 %v6445_v9  ;;  %v6511_v9 = vld [vmem:[#allocation10 + $0x724] ss:$8 sps:$4 sm:$0xff]  }
 0x38a   : > { %4913 = vmatpush1.bf16.msra.mxu0 %v6458_v20  ;;  %v6524_v20 = vld [vmem:[#allocation10 + $0x370] ss:$8 sps:$4 sm:$0xff]  }
 0x38b   : > { %4914 = vmatprep.subr.bf16.mxu0 %v6466_v48  ;;  %v6532_v48 = vld [vmem:[#allocation10 + $0x384] ss:$8 sps:$4 sm:$0xff]  }
 0x38c   : > { %5075 = vmatpush1.bf16.msra.mxu1 %v6443_v12  ;;  %v6509_v12 = vld [vmem:[#allocation10 + $0x720] ss:$8 sps:$4 sm:$0xff]  }
 0x38d   : > { %5076 = vmatprep.subr.bf16.mxu1 %v6451_v10  ;;  %v6517_v10 = vld [vmem:[#allocation10 + $0x734] ss:$8 sps:$4 sm:$0xff]  }
 0x38e   : > { %4915 = vmatpush1.bf16.msra.mxu0 %v6464_v50  ;;  %v6515_v50 = vld [vmem:[#allocation10 + $0x730] ss:$8 sps:$4 sm:$0xff]  }
 0x38f   : > { %4916 = vmatprep.subr.bf16.mxu0 %v6472_v14  ;;  %v6523_v14 = vld [vmem:[#allocation10 + $0x744] ss:$8 sps:$4 sm:$0xff]  }
 0x390   : > { %5077 = vmatpush1.bf16.msra.mxu1 %v6449_v15  ;;  %v6544_v15 = vld [vmem:[#allocation10 + $0x3a4] ss:$8 sps:$4 sm:$0xff]  }
 0x391   : > { %5078 = vmatprep.subr.bf16.mxu1 %v6457_v22  ;;  %v6521_v22 = vld [vmem:[#allocation10 + $0x740] ss:$8 sps:$4 sm:$0xff]  }
 0x392   : > { %4917 = vmatpush1.bf16.msra.mxu0 %v6470_v33  ;;  %v6529_v33 = vld [vmem:[#allocation10 + $0x754] ss:$8 sps:$4 sm:$0xff]  }
 0x393   : > { %4918 = vmatprep.subr.bf16.mxu0 %v6478_v46  ;;  %v6542_v46 = vld [vmem:[#allocation10 + $0x3a0] ss:$8 sps:$4 sm:$0xff]  }
 0x394   : > { %5079 = vmatpush1.bf16.msra.mxu1 %v6455_v41  ;;  %v6550_v41 = vld [vmem:[#allocation10 + $0x3b4] ss:$8 sps:$4 sm:$0xff]  }
 0x395   : > { %5080 = vmatprep.subr.bf16.mxu1 %v6463_v13  ;;  %v6527_v13 = vld [vmem:[#allocation10 + $0x750] ss:$8 sps:$4 sm:$0xff]  }
 0x396   : > { %4919 = vmatpush1.bf16.msra.mxu0 %v6476_v38  ;;  %v6535_v38 = vld [vmem:[#allocation10 + $0x764] ss:$8 sps:$4 sm:$0xff]  }
 0x397   : > { %4931 = vmatprep.subr.bf16.mxu0 %v6484_v43  ;;  %v6548_v43 = vld [vmem:[#allocation10 + $0x3b0] ss:$8 sps:$4 sm:$0xff]  }
 0x398   : > { %5081 = vmatpush1.bf16.msra.mxu1 %v6461_v30  ;;  %v6556_v30 = vld [vmem:[#allocation10 + $0x3c4] ss:$8 sps:$4 sm:$0xff]  }
 0x399   : > { %5082 = vmatprep.subr.bf16.mxu1 %v6469_v54  ;;  %4921 = vmatmul.mubr.bf16.vlgmr.msra.gmra.mrb[12].mxu0 %v2545_v58  ;;  %v6508_v58 = vld [vmem:[#allocation10 + $0x344] ss:$8 sps:$4 sm:$0xff]   ;;  %v6533_v54 = vld [vmem:[#allocation10 + $0x760] ss:$8 sps:$4 sm:$0xff]  }
 0x39a   : > { %4932 = vmatpush1.bf16.msra.mxu0 %v6482_v1  ;;  %4963 = vmatprep.mubr.bf16.mxu0 %v2566_v42  ;;  %v6485_v42 = vld [vmem:[#allocation10 + $0x6e0] ss:$8 sps:$4 sm:$0xff]   ;;  %v6541_v1 = vld [vmem:[#allocation10 + $0x774] ss:$8 sps:$4 sm:$0xff]  }
 0x39b   : > { %4933 = vmatprep.subr.bf16.mxu0 %v6490_v5  ;;  %v6554_v5 = vld [vmem:[#allocation10 + $0x3c0] ss:$8 sps:$4 sm:$0xff]  }
 0x39c   : > { %5083 = vmatpush1.bf16.msra.mxu1 %v6467_v27  ;;  %v6562_v27 = vld [vmem:[#allocation10 + $0x3d4] ss:$8 sps:$4 sm:$0xff]  }
 0x39d   : > { %5084 = vmatprep.subr.bf16.mxu1 %v6475_v28  ;;  %v6539_v28 = vld [vmem:[#allocation10 + $0x770] ss:$8 sps:$4 sm:$0xff]  }
 0x39e   : > { %4934 = vmatpush1.bf16.msra.mxu0 %v6488_v37  ;;  %v6547_v37 = vld [vmem:[#allocation10 + $0x784] ss:$8 sps:$4 sm:$0xff]  }
 0x39f   : > { %4935 = vmatprep.subr.bf16.mxu0 %v6496_v55  ;;  %v6560_v55 = vld [vmem:[#allocation10 + $0x3d0] ss:$8 sps:$4 sm:$0xff]  }
 0x3a0   : > { %5085 = vmatpush1.bf16.msra.mxu1 %v6473_v57  ;;  %v6568_v57 = vld [vmem:[#allocation10 + $0x3e4] ss:$8 sps:$4 sm:$0xff]  }
 0x3a1   : > { %5086 = vmatprep.subr.bf16.mxu1 %v6481_v52  ;;  %v6545_v52 = vld [vmem:[#allocation10 + $0x780] ss:$8 sps:$4 sm:$0xff]  }
 0x3a2   : > { %4936 = vmatpush1.bf16.msra.mxu0 %v6494_v3  ;;  %v6553_v3 = vld [vmem:[#allocation10 + $0x794] ss:$8 sps:$4 sm:$0xff]  }
 0x3a3   : > { %4937 = vmatprep.subr.bf16.mxu0 %v6502_v61  ;;  %v6566_v61 = vld [vmem:[#allocation10 + $0x3e0] ss:$8 sps:$4 sm:$0xff]  }
 0x3a4   : > { %5087 = vmatpush1.bf16.msra.mxu1 %v6479_v6  ;;  %v6574_v6 = vld [vmem:[#allocation10 + $0x3f4] ss:$8 sps:$4 sm:$0xff]  }
 0x3a5   : > { %5088 = vmatprep.subr.bf16.mxu1 %v6487_v63  ;;  %v6551_v63 = vld [vmem:[#allocation10 + $0x790] ss:$8 sps:$4 sm:$0xff]  }
 0x3a6   : > { %4938 = vmatpush1.bf16.msra.mxu0 %v6500_v39  ;;  %v6559_v39 = vld [vmem:[#allocation10 + $0x7a4] ss:$8 sps:$4 sm:$0xff]  }
 0x3a7   : > { %4939 = vmatprep.subr.bf16.mxu0 %v6508_v58  ;;  %v6572_v58 = vld [vmem:[#allocation10 + $0x3f0] ss:$8 sps:$4 sm:$0xff]  }
 0x3a8   : > { %5089 = vmatpush1.bf16.msra.mxu1 %v6485_v42  ;;  %v6557_v42 = vld [vmem:[#allocation10 + $0x7a0] ss:$8 sps:$4 sm:$0xff]  }
 0x3a9   : > { %5090 = vmatprep.subr.bf16.mxu1 %v6493_v47  ;;  %v6565_v47 = vld [vmem:[#allocation10 + $0x7b4] ss:$8 sps:$4 sm:$0xff]  }
 0x3aa   : > { %4940 = vmatpush1.bf16.msra.mxu0 %v6506_v18  ;;  %v6563_v18 = vld [vmem:[#allocation10 + $0x7b0] ss:$8 sps:$4 sm:$0xff]  }
 0x3ab   : > { %4941 = vmatprep.subr.bf16.mxu0 %v6514_v8  ;;  %v6571_v8 = vld [vmem:[#allocation10 + $0x7c4] ss:$8 sps:$4 sm:$0xff]  }
 0x3ac   : > { %5091 = vmatpush1.bf16.msra.mxu1 %v6491_v0  ;;  %v6569_v0 = vld [vmem:[#allocation10 + $0x7c0] ss:$8 sps:$4 sm:$0xff]  }
 0x3ad   : > { %5103 = vmatprep.subr.bf16.mxu1 %v6499_v24  ;;  %v6577_v24 = vld [vmem:[#allocation10 + $0x7d4] ss:$8 sps:$4 sm:$0xff]  }
 0x3ae   : > { %4942 = vmatpush1.bf16.msra.mxu0 %v6512_v21  ;;  %v6575_v21 = vld [vmem:[#allocation10 + $0x7d0] ss:$8 sps:$4 sm:$0xff]  }
 0x3af   : > { %5093 = vmatmul.mubr.bf16.vlgmr.msra.gmra.mrb[4].mxu1 %v2617_v31  ;;  %4943 = vmatprep.subr.bf16.mxu0 %v6520_v11  ;;  %v6538_v31 = vld [vmem:[#allocation10 + $0x394] ss:$8 sps:$4 sm:$0xff]   ;;  %v6580_v11 = vld [vmem:[#allocation10 + $0x7e4] ss:$8 sps:$4 sm:$0xff]  }
 0x3b0   : > { %5104 = vmatpush1.bf16.msra.mxu1 %v6497_v17  ;;  %5135 = vmatprep.mubr.bf16.mxu1 %v2638_v56  ;;  %v6536_v56 = vld [vmem:[#allocation10 + $0x390] ss:$8 sps:$4 sm:$0xff]   ;;  %v6578_v17 = vld [vmem:[#allocation10 + $0x7e0] ss:$8 sps:$4 sm:$0xff]  }
 0x3b1   : > { %5105 = vmatprep.subr.bf16.mxu1 %v6505_v19  ;;  %v6583_v19 = vld [vmem:[#allocation10 + $0x7f4] ss:$8 sps:$4 sm:$0xff]  }
 0x3b2   : > { %4944 = vmatpush1.bf16.msra.mxu0 %v6518_v62  ;;  %v6581_v62 = vld [vmem:[#allocation10 + $0x7f0] ss:$8 sps:$4 sm:$0xff]  }
 0x3b3   : > { %4945 = vmatprep.subr.bf16.mxu0 %v6526_v4  ;;  %v6586_v4 = vld [vmem:[#allocation10 + $0x804] ss:$8 sps:$4 sm:$0xff]  }
 0x3b4   : > { %5106 = vmatpush1.bf16.msra.mxu1 %v6503_v51  ;;  %v6584_v51 = vld [vmem:[#allocation10 + $0x800] ss:$8 sps:$4 sm:$0xff]  }
 0x3b5   : > { %5107 = vmatprep.subr.bf16.mxu1 %v6511_v9  ;;  %v6590_v9 = vld [vmem:[#allocation10 + $0x820] ss:$8 sps:$4 sm:$0xff]  }
 0x3b6   : > { %4946 = vmatpush1.bf16.msra.mxu0 %v6524_v20  ;;  %v6595_v20 = vld [vmem:[#allocation10 + $0x834] ss:$8 sps:$4 sm:$0xff]  }
 0x3b7   : > { %4947 = vmatprep.subr.bf16.mxu0 %v6532_v48  ;;  %v6593_v48 = vld [vmem:[#allocation10 + $0x830] ss:$8 sps:$4 sm:$0xff]  }
 0x3b8   : > { %5108 = vmatpush1.bf16.msra.mxu1 %v6509_v12  ;;  %v6598_v12 = vld [vmem:[#allocation10 + $0x844] ss:$8 sps:$4 sm:$0xff]  }
 0x3b9   : > { %5109 = vmatprep.subr.bf16.mxu1 %v6517_v10  ;;  %v6596_v10 = vld [vmem:[#allocation10 + $0x840] ss:$8 sps:$4 sm:$0xff]  }
 0x3ba   : > { %4948 = vmatpush1.bf16.msra.mxu0 %v6530_v23  ;;  %v6607_v23 = vld [vmem:[#allocation10 + $0x874] ss:$8 sps:$4 sm:$0xff]  }
 0x3bb   : > { %4949 = vmatprep.subr.bf16.mxu0 %v6538_v31  ;;  %v6605_v31 = vld [vmem:[#allocation10 + $0x870] ss:$8 sps:$4 sm:$0xff]  }
 0x3bc   : > { %5110 = vmatpush1.bf16.msra.mxu1 %v6515_v50  ;;  %v6610_v50 = vld [vmem:[#allocation10 + $0x884] ss:$8 sps:$4 sm:$0xff]  }
 0x3bd   : > { %5111 = vmatprep.subr.bf16.mxu1 %v6523_v14  ;;  %v6608_v14 = vld [vmem:[#allocation10 + $0x880] ss:$8 sps:$4 sm:$0xff]  }
 0x3be   : > { %4950 = vmatpush1.bf16.msra.mxu0 %v6536_v56  ;;  %v6613_v56 = vld [vmem:[#allocation10 + $0x894] ss:$8 sps:$4 sm:$0xff]  }
 0x3bf   : > { %4951 = vmatprep.subr.bf16.mxu0 %v6544_v15  ;;  %v6611_v15 = vld [vmem:[#allocation10 + $0x890] ss:$8 sps:$4 sm:$0xff]  }
 0x3c0   : > { %5112 = vmatpush1.bf16.msra.mxu1 %v6521_v22  ;;  %v6616_v22 = vld [vmem:[#allocation10 + $0x8a4] ss:$8 sps:$4 sm:$0xff]  }
 0x3c1   : > { %5113 = vmatprep.subr.bf16.mxu1 %v6529_v33  ;;  %v6614_v33 = vld [vmem:[#allocation10 + $0x8a0] ss:$8 sps:$4 sm:$0xff]  }
 0x3c2   : > { %4952 = vmatpush1.bf16.msra.mxu0 %v6542_v46  ;;  %v6619_v46 = vld [vmem:[#allocation10 + $0x8b4] ss:$8 sps:$4 sm:$0xff]  }
 0x3c3   : > { %4953 = vmatprep.subr.bf16.mxu0 %v6550_v41  ;;  %v6617_v41 = vld [vmem:[#allocation10 + $0x8b0] ss:$8 sps:$4 sm:$0xff]  }
 0x3c4   : > { %5114 = vmatpush1.bf16.msra.mxu1 %v6527_v13  ;;  %v6622_v13 = vld [vmem:[#allocation10 + $0x8c4] ss:$8 sps:$4 sm:$0xff]  }
 0x3c5   : > { %5115 = vmatprep.subr.bf16.mxu1 %v6535_v38  ;;  %v6620_v38 = vld [vmem:[#allocation10 + $0x8c0] ss:$8 sps:$4 sm:$0xff]  }
 0x3c6   : > { %4954 = vmatpush1.bf16.msra.mxu0 %v6548_v43  ;;  %v6625_v43 = vld [vmem:[#allocation10 + $0x8d4] ss:$8 sps:$4 sm:$0xff]  }
 0x3c7   : > { %4955 = vmatprep.subr.bf16.mxu0 %v6556_v30  ;;  %v6623_v30 = vld [vmem:[#allocation10 + $0x8d0] ss:$8 sps:$4 sm:$0xff]  }
 0x3c8   : > { %5116 = vmatpush1.bf16.msra.mxu1 %v6533_v54  ;;  %v6628_v54 = vld [vmem:[#allocation10 + $0x8e4] ss:$8 sps:$4 sm:$0xff]  }
 0x3c9   : > { %5117 = vmatprep.subr.bf16.mxu1 %v6541_v1  ;;  %v6626_v1 = vld [vmem:[#allocation10 + $0x8e0] ss:$8 sps:$4 sm:$0xff]  }
 0x3ca   : > { %4956 = vmatpush1.bf16.msra.mxu0 %v6554_v5  ;;  %v6631_v5 = vld [vmem:[#allocation10 + $0x8f4] ss:$8 sps:$4 sm:$0xff]  }
 0x3cb   : > { %4957 = vmatprep.subr.bf16.mxu0 %v6562_v27  ;;  %v6629_v27 = vld [vmem:[#allocation10 + $0x8f0] ss:$8 sps:$4 sm:$0xff]  }
 0x3cc   : > { %5118 = vmatpush1.bf16.msra.mxu1 %v6539_v28 }
 0x3cd   : > { %5119 = vmatprep.subr.bf16.mxu1 %v6547_v37 }
 0x3ce   : > { %4958 = vmatpush1.bf16.msra.mxu0 %v6560_v55 }
 0x3cf   : > { %4959 = vmatprep.subr.bf16.mxu0 %v6568_v57 }
 0x3d0   : > { %5120 = vmatpush1.bf16.msra.mxu1 %v6545_v52 }
 0x3d1   : > { %5121 = vmatprep.subr.bf16.mxu1 %v6553_v3 }
 0x3d2   : > { %4960 = vmatpush1.bf16.msra.mxu0 %v6566_v61 }
 0x3d3   : > { %4961 = vmatprep.subr.bf16.mxu0 %v6574_v6 }
 0x3d4   : > { %5122 = vmatpush1.bf16.msra.mxu1 %v6551_v63  ;;  %v5189_v63 = vld [vmem:[#allocation13] sm:$0x3] }
 0x3d5   : > { %5123 = vmatprep.subr.bf16.mxu1 %v6559_v39  ;;  %v5194_v39 = vrot.slane %v5189_v63, %v7585_v26 }
 0x3d6   : > { %4962 = vmatpush1.bf16.msra.mxu0 %v6572_v58 }
 0x3d8   : > { %5124 = vmatpush1.bf16.msra.mxu1 %v6557_v42  ;;  %v5198_v42 = vrot.slane %v5189_v63, %v7588_v29 }
 0x3d9   : > { %5125 = vmatprep.subr.bf16.mxu1 %v6565_v47  ;;  %4964 = vmatmul.mubr.bf16.vlgmr.msra.gmra.mrb[12].mxu0 %v2565_v25  ;;  %v6592_v25 = vld [vmem:[#allocation10 + $0x824] ss:$8 sps:$4 sm:$0xff]  }
 0x3dc   : > { %5126 = vmatpush1.bf16.msra.mxu1 %v6563_v18 }
 0x3dd   : > { %5127 = vmatprep.subr.bf16.mxu1 %v6571_v8 }
 0x3e0   : > { %5128 = vmatpush1.bf16.msra.mxu1 %v6569_v0 }
 0x3e1   : > { %5129 = vmatprep.subr.bf16.mxu1 %v6577_v24 }
 0x3e4   : > { %5130 = vmatpush1.bf16.msra.mxu1 %v6575_v21 }
 0x3e5   : > { %5131 = vmatprep.subr.bf16.mxu1 %v6580_v11 }
 0x3e8   : > { %5132 = vmatpush1.bf16.msra.mxu1 %v6578_v17 }
 0x3e9   : > { %5133 = vmatprep.subr.bf16.mxu1 %v6583_v19 }
 0x3ec   : > { %5134 = vmatpush1.bf16.msra.mxu1 %v6581_v62 }
 0x3ed   : > { %5146 = vmatprep.subr.bf16.mxu1 %v6586_v4 }
 0x3ef   : > { %5136 = vmatmul.mubr.bf16.vlgmr.msra.gmra.mrb[4].mxu1 %v2637_v59  ;;  %v6604_v59 = vld [vmem:[#allocation10 + $0x864] ss:$8 sps:$4 sm:$0xff]  }
 0x3f0   : > { %5147 = vmatpush1.bf16.msra.mxu1 %v6584_v51  ;;  %5178 = vmatprep.mubr.bf16.mxu1 %v2650_v2  ;;  %v6602_v2 = vld [vmem:[#allocation10 + $0x860] ss:$8 sps:$4 sm:$0xff]  }
 0x3f1   : > { %5148 = vmatprep.subr.bf16.mxu1 %v6589_v60 }
 0x3f4   : > { %5149 = vmatpush1.bf16.msra.mxu1 %v6587_v49 }
 0x3f5   : > { %5150 = vmatprep.subr.bf16.mxu1 %v6592_v25 }
 0x3f8   : > { %5151 = vmatpush1.bf16.msra.mxu1 %v6590_v9 }
 0x3f9   : > { %5152 = vmatprep.subr.bf16.mxu1 %v6595_v20 }
 0x3fc   : > { %5153 = vmatpush1.bf16.msra.mxu1 %v6593_v48 }
 0x3fd   : > { %5154 = vmatprep.subr.bf16.mxu1 %v6598_v12 }
 0x400   : > { %5155 = vmatpush1.bf16.msra.mxu1 %v6596_v10 }
 0x401   : > { %5156 = vmatprep.subr.bf16.mxu1 %v6601_v36 }
 0x404   : > { %5157 = vmatpush1.bf16.msra.mxu1 %v6599_v32 }
 0x405   : > { %5158 = vmatprep.subr.bf16.mxu1 %v6604_v59 }
 0x408   : > { %5159 = vmatpush1.bf16.msra.mxu1 %v6602_v2 }
 0x409   : > { %5160 = vmatprep.subr.bf16.mxu1 %v6607_v23 }
 0x40c   : > { %5161 = vmatpush1.bf16.msra.mxu1 %v6605_v31 }
 0x40d   : > { %5162 = vmatprep.subr.bf16.mxu1 %v6610_v50 }
 0x410   : > { %5163 = vmatpush1.bf16.msra.mxu1 %v6608_v14 }
 0x411   : > { %5164 = vmatprep.subr.bf16.mxu1 %v6613_v56 }
 0x414   : > { %5165 = vmatpush1.bf16.msra.mxu1 %v6611_v15 }
 0x415   : > { %5166 = vmatprep.subr.bf16.mxu1 %v6616_v22 }
 0x418   : > { %5167 = vmatpush1.bf16.msra.mxu1 %v6614_v33 }
 0x419   : > { %5168 = vmatprep.subr.bf16.mxu1 %v6619_v46 }
 0x41c   : > { %5169 = vmatpush1.bf16.msra.mxu1 %v6617_v41 }
 0x41d   : > { %5170 = vmatprep.subr.bf16.mxu1 %v6622_v13 }
 0x420   : > { %5171 = vmatpush1.bf16.msra.mxu1 %v6620_v38 }
 0x421   : > { %5172 = vmatprep.subr.bf16.mxu1 %v6625_v43 }
 0x424   : > { %5173 = vmatpush1.bf16.msra.mxu1 %v6623_v30 }
 0x425   : > { %5174 = vmatprep.subr.bf16.mxu1 %v6628_v54 }
 0x428   : > { %5175 = vmatpush1.bf16.msra.mxu1 %v6626_v1 }
 0x429   : > { %5176 = vmatprep.subr.bf16.mxu1 %v6631_v5 }
 0x42c   : > { %5177 = vmatpush1.bf16.msra.mxu1 %v6629_v27 }
 0x42f   : > { %5179 = vmatmul.mubr.bf16.vlgmr.msra.gmra.mrb[4].mxu1 %v2649_v7 }
 0x4ac   : > { %v4965_v28 = vpop.f32.mrb[12].mxu0 }
 0x4ad   : > { %v5880_v37 = vadd.f32 %v4965_v28, %v7738_v34  ;;  %v4967_v55 = vpop.f32.mrb[13].mxu0 }
 0x4ae   : > { %v5882_v57 = vadd.f32 %v4967_v55, %v7749_v45  ;;  %v4969_v52 = vpop.f32.mrb[14].mxu0 }
 0x4af   : > { %v5884_v3 = vadd.f32 %v4969_v52, %v7759_v16  ;;  %v4971_v61 = vpop.f32.mrb[15].mxu0 }
 0x4b0   : > { %v5886_v6 = vadd.f32 %v4971_v61, %v7763_v44 }
 0x502   : > { %v5180_v58 = vpop.f32.mrb[4].mxu1 }
 0x503   : > { %v5881_v40 = vadd.f32 %v5880_v37, %v5180_v58  ;;  %v5182_v53 = vpop.f32.mrb[5].mxu1 }
 0x504   : > { %v5883_v7 = vadd.f32 %v5882_v57, %v5182_v53  ;;  %v5184_v47 = vpop.f32.mrb[6].mxu1 }
 0x505   : > { %v5201_v34 = vadd.f32 %v5881_v40, %v5194_v39  ;;  %v5885_v18 = vadd.f32 %v5884_v3, %v5184_v47  ;;  %v5186_v8 = vpop.f32.mrb[7].mxu1 }
 0x506   : > { %v5202_v45 = vadd.f32 %v5883_v7, %v5198_v42  ;;  %v5887_v0 = vadd.f32 %v5886_v6, %v5186_v8 }
 0x507   : > { %v5209_v24 = vmin.f32 %v5201_v34, 0.0  ;;  %v5203_v16 = vadd.f32 %v5885_v18, %v5194_v39  ;;  %vm5205_vm5 = vcmp.gt.f32.partialorder %v5201_v34, 0.0 }
 0x508   : > { %v5210_v21 = vmin.f32 %v5202_v45, 0.0  ;;  %v5204_v44 = vadd.f32 %v5887_v0, %v5198_v42  ;;  %vm5206_vm8 = vcmp.gt.f32.partialorder %v5202_v45, 0.0 }
 0x509   : > { %v5213_v11 = vmul.f32 1.442695, %v5209_v24  ;;  %v5211_v17 = vmin.f32 %v5203_v16, 0.0  ;;  %vm5207_vm13 = vcmp.gt.f32.partialorder %v5203_v16, 0.0 }
 0x50a   : > { %v5215_v26 = vmul.f32 1.442695, %v5210_v21  ;;  %v5212_v19 = vmin.f32 %v5204_v44, 0.0  ;;  %vm5208_vm14 = vcmp.gt.f32.partialorder %v5204_v44, 0.0 }
 0x50b   : > { %6636 = vpow2.f32 %v5213_v11  ;;  %v5217_v29 = vmul.f32 1.442695, %v5211_v17 }
 0x50c   : > { %6638 = vpow2.f32 %v5215_v26  ;;  %v5219_v62 = vmul.f32 1.442695, %v5212_v19 }
 0x50d   : > { %6640 = vpow2.f32 %v5217_v29 }
 0x50e   : > { %6642 = vpow2.f32 %v5219_v62 }
 0x515   : > { %v6637_v4 = vpop.eup %6636 }
 0x516   : > { %v6639_v51 = vpop.eup %6638  ;;  %v5864_v60 = vadd.f32 -1.0, %v6637_v4 }
 0x517   : > { %v6641_v49 = vpop.eup %6640  ;;  %v5865_v25 = vadd.f32 -1.0, %v6639_v51 }
 0x518   : > { %v6643_v9 = vpop.eup %6642  ;;  %v5225_v20 = vsel %vm5205_vm5, %v5201_v34, %v5864_v60  ;;  %v5866_v48 = vadd.f32 -1.0, %v6641_v49 }
 0x519   : > { %v5226_v12 = vsel %vm5206_vm8, %v5202_v45, %v5865_v25  ;;  %v5867_v10 = vadd.f32 -1.0, %v6643_v9 }
 0x51a   : > { %v5868_v36 = vpack.c.bf16 %v5226_v12, %v5225_v20  ;;  %v5227_v32 = vsel %vm5207_vm13, %v5203_v16, %v5866_v48 }
 0x51b   : > { %v5228_v59 = vsel %vm5208_vm14, %v5204_v44, %v5867_v10 }
 0x51c   : > { %v5241_v2 = vrot.slane %v5868_v36, %v7383_v35  ;;  %5870 = vst.sshfl [vmem:[%s404_s2] sm:$0x33 pattern:$0x76325410] %v5868_v36  ;;  %v5869_v23 = vpack.c.bf16 %v5228_v59, %v5227_v32 }
 0x51e   : > { %v5249_v31 = vcombine.high %v5241_v2, %v5241_v2  ;;  %v5248_v50 = vrot.slane %v5869_v23, %v7383_v35  ;;  %5871 = vst.sshfl [vmem:[%s404_s2 + $0x8] sm:$0x33 pattern:$0x76325410] %v5869_v23 }
 0x520   : > { %5256 = vst [vmem:[%s404_s2 + $0x4] sm:$0xf] %v5249_v31  ;;  %v5250_v14 = vcombine.high %v5248_v50, %v5248_v50 }
 0x522   : > { %5258 = vst [vmem:[%s404_s2 + $0xc] sm:$0xf] %v5250_v14 }
 0x523   : > { %6857 = shalt.err (!%p6854_p8)
}
 0x524   : > { %s6858_s10 = scalar_lea.hbm %s7938_s20, 256  ;;  %s6862_s8 = scalar_lea.hbm %s7993_s7, 512 }
 0x525   : > { %p6859_p11 = scmp.ne.s32.totalorder %s7938_s20, %s6858_s10  ;;  %p6863_p1 = scmp.lt.u32.totalorder %s7938_s20, %s7993_s7 }
 0x526   : > { %p6864_p13 = scmp.lt.u32.totalorder %s6862_s8, %s6858_s10  ;;  %p6866_p7 = scmp.lt.u32.totalorder %s6858_s10, %s7938_s20 }
 0x527   : > { %p6860_p3 = pnand %p6859_p11, %p8038_p2 }
 0x528   : > { %p6865_p0 = por %p6864_p13, %p6863_p1 }
 0x529   : > { %p6861_p12 = pneg %p6860_p3 }
 0x52a   : > { %p6867_p6 = por %p6866_p7, %p6865_p0 }
 0x52c   : > { %p6868_p10 = pnand %p6867_p6, %p6861_p12 }
 0x52e   : > { %6871 = shalt.err (!%p6868_p10)
}
 0x52f   : > { %s6947_s0 = smov 4  }
 0x530   : > { %5948 = dma.vmem_to_hbm [thread:$0]  (%p8038_p2), %s7940_s19, 256, %s7938_s20, %s5260_s5, %s6942_s22, %s6942_s22, %s6947_s0  }
 0x531 PF: > { %s5288_s2 = sand.u32 1, %s6914_s24   ;;  %p8039_p5 = scmp.ne.s32.totalorder %s8012_s15, 0 }
 0x532   : > { %p8040_p9 = scmp.ge.s32.totalorder %s6926_s27, 2  ;;  %s5289_s23 = scalar_lea.sflag [#allocation4], %s5288_s2 }
 0x534   : > { %p5974_p4 = pnand %p8040_p9, %p8039_p5 }
 0x536   : > { %6909 = dma.done.wait (!%p5974_p4), %s5289_s23, 256  }
 0x537   : > { %6911 = vsyncadd (!%p5974_p4), %s5289_s23, 4294967040  ;;  %p25_p8 = scmp.ge.s32.totalorder %s7155_s11, 4   ;;  %s8041_s24 = smov %s6918_s25 }
 0x538   : > { %s8042_s25 = smov %s6922_s26  ;;  %s8043_s26 = smov %s7167_s29 }
 0x539   : > { %s8044_s27 = smov %s7155_s11  ;;  %27 = sbr.rel (!%p25_p8) target bundleno = 15 (0xf), region = 126 }
 0x540   :  { %5294 = vsyncpa [#allocation3], 1 }
 0x541   :  { %5296 = vsyncpa [#allocation3 + $0x1], 1 }
 0x542   :  { %5297 = vsyncpa [#allocation6], 1 }
 0x543   :  { %5299 = vsyncpa [#allocation6 + $0x1], 1 }
 0x544   :  { %5300 = vsyncpa [#allocation9], 1 }
 0x545   :  { %5301 = vsyncpa [#allocation12], 1 }
 0x546   :  { %5302 = vsyncpa [#allocation4], 1 }
 0x547   :  { %5304 = vsyncpa [#allocation4 + $0x1], 1 }

</bundles_post_ra>
